<compile_context>
chip_gen: v5e
topology: v5e:2x2
jax: 0.10.0
libtpu: 0.0.40
codegen_flags: <defaults>
</compile_context>

<pallas_src>
import functools

import jax
import jax.numpy as jnp
from jax.experimental import pallas as pl
from jax.experimental.pallas import tpu as pltpu


_MM_TILE = 256                    # matmul M-row tile
_EW_TILE = 512                    # elementwise row tile (memory-bound kernels)
_K_TILE = 512                     # K tile for the matmul accumulator (large K)
_VMEM_LIMIT = 32 * 1024 * 1024    # fits v5e/v6e/v7x scoped-VMEM budgets


def _round_up(x, m):
    return (x + m - 1) // m * m


def _row_blocks(m, max_tile):
    """Pick (row_tile, padded_rows).  Single full block when it fits."""
    if m <= max_tile:
        return m, m
    return max_tile, _round_up(m, max_tile)


# ---------------------------------------------------------------------------
# Fused conv matmul: bf16 MXU matmul (f32 accum) + bias + optional LeakyReLU
# epilogue + per-channel sum / sum-of-squares partials (for BatchNorm).
# ---------------------------------------------------------------------------
def _conv_mm_kernel(a_ref, b_ref, bias_ref, o_ref, st_ref, acc_ref,
                    *, alpha, valid_m, mask_rows):
    k = pl.program_id(1)

    @pl.when(k == 0)
    def _():
        acc_ref[...] = jnp.zeros_like(acc_ref)

    acc_ref[...] += jnp.dot(a_ref[...], b_ref[...],
                            preferred_element_type=jnp.float32)

    @pl.when(k == pl.num_programs(1) - 1)
    def _():
        y = acc_ref[...] + bias_ref[...]
        if alpha is not None:
            y = jnp.where(y >= 0, y, alpha * y)
        o_ref[...] = y
        # Per-channel partial sums on the tile that is already resident in
        # VMEM (no extra HBM pass for the BatchNorm statistics).
        tm = o_ref.shape[0]
        if mask_rows:
            rows = (pl.program_id(0) * tm
                    + jax.lax.broadcasted_iota(jnp.int32, (tm, 1), 0))
            ym = jnp.where(rows < valid_m, y, 0.0)
        else:
            ym = y
        st_ref[0:1, :] = jnp.sum(ym, axis=0, keepdims=True)
        st_ref[1:2, :] = jnp.sum(ym * ym, axis=0, keepdims=True)


def fused_conv_matmul(a, b, bias, alpha=None):
    """a:(M,K) bf16 @ b:(K,N) bf16 + bias:(N,) f32 -> f32 output.

    Returns (out (M,N) f32, col_sum (N,), col_sumsq (N,)); the column
    statistics are over the M valid rows (BatchNorm batch statistics).
    """
    m, k = a.shape
    _, n = b.shape
    np_ = _round_up(n, 128)
    if k > _K_TILE:                       # large-K path: K-tiled accumulator
        tk = _K_TILE
        kp = _round_up(k, tk)
    else:
        kp = _round_up(k, 128)
        tk = kp
    tm, mp = _row_blocks(m, _MM_TILE)

    a_p = a if (mp == m and kp == k) else jnp.pad(a, ((0, mp - m), (0, kp - k)))
    b_p = b if (kp == k and np_ == n) else jnp.pad(b, ((0, kp - k), (0, np_ - n)))
    bias_p = jnp.pad(bias, (0, np_ - n)).reshape(1, np_)

    grid = (mp // tm, kp // tk)
    kern = functools.partial(_conv_mm_kernel, alpha=alpha, valid_m=m,
                             mask_rows=(mp != m))
    out, st = pl.pallas_call(
        kern,
        out_shape=(jax.ShapeDtypeStruct((mp, np_), jnp.float32),
                   jax.ShapeDtypeStruct((grid[0] * 8, np_), jnp.float32)),
        grid_spec=pltpu.PrefetchScalarGridSpec(
            num_scalar_prefetch=0,
            grid=grid,
            in_specs=[
                pl.BlockSpec((tm, tk), lambda i, kk: (i, kk)),
                pl.BlockSpec((tk, np_), lambda i, kk: (kk, 0)),
                pl.BlockSpec((1, np_), lambda i, kk: (0, 0)),
            ],
            out_specs=(
                pl.BlockSpec((tm, np_), lambda i, kk: (i, 0)),
                pl.BlockSpec((8, np_), lambda i, kk: (i, 0)),
            ),
            scratch_shapes=[pltpu.VMEM((tm, np_), jnp.float32)],
        ),
        compiler_params=pltpu.CompilerParams(
            dimension_semantics=("parallel", "arbitrary"),
            vmem_limit_bytes=_VMEM_LIMIT),
    )(a_p, b_p, bias_p)

    if mp != m or np_ != n:
        out = out[:m, :n]
    col_sum = st[0::8, :n].sum(axis=0)
    col_sumsq = st[1::8, :n].sum(axis=0)
    return out, col_sum, col_sumsq


# ---------------------------------------------------------------------------
# Convolution via im2col (JAX glue) + fused Pallas matmul.
# ---------------------------------------------------------------------------
def conv2d(x, w, bias, stride, pad, alpha=None):
    """x:(N,H,W,Cin) f32 NHWC, w:(kh,kw,Cin,Cout), bias:(Cout,) or None.

    Returns (out NHWC f32, per-channel sum, per-channel sumsq over N*Ho*Wo).
    `alpha` fuses LeakyReLU into the matmul epilogue.
    """
    n, h, wd, cin = x.shape
    kh, kw, _, cout = w.shape
    ho = (h + 2 * pad - kh) // stride + 1
    wo = (wd + 2 * pad - kw) // stride + 1
    # TODO(synk): im2col patches are still materialized in HBM by XLA; a fully
    # fused shifted-window accumulation inside the matmul kernel would remove it.
    xp = jnp.pad(x, ((0, 0), (pad, pad), (pad, pad), (0, 0))).astype(jnp.bfloat16)
    cols = []
    for i in range(kh):
        for j in range(kw):
            cols.append(xp[:, i:i + stride * ho:stride,
                           j:j + stride * wo:stride, :])
    patches = jnp.stack(cols, axis=3).reshape(n * ho * wo, kh * kw * cin)
    wmat = w.reshape(kh * kw * cin, cout).astype(jnp.bfloat16)
    if bias is None:
        bias = jnp.zeros((cout,), jnp.float32)
    out, s, ss = fused_conv_matmul(patches, wmat, bias, alpha=alpha)
    return out.reshape(n, ho, wo, cout), s, ss


# ---------------------------------------------------------------------------
# Fused affine (BatchNorm apply) + LeakyReLU (+ residual add), lane-dense.
# ---------------------------------------------------------------------------
def _affine_leaky_kernel(x_ref, s_ref, t_ref, o_ref, *, alpha):
    y = x_ref[...] * s_ref[...] + t_ref[...]
    o_ref[...] = jnp.where(y >= 0, y, alpha * y)


def _affine_leaky_res_kernel(x_ref, s_ref, t_ref, r_ref, o_ref, *, alpha):
    y = x_ref[...] * s_ref[...] + t_ref[...] + r_ref[...]
    o_ref[...] = jnp.where(y >= 0, y, alpha * y)


def affine_leaky_2d(x2d, scale_l, shift_l, alpha, residual=None):
    """y = leaky(x*scale + shift [+ residual]) on a lane-dense (R, L) slab."""
    r, l = x2d.shape
    tr, rp = _row_blocks(r, _EW_TILE)
    x_p = x2d if rp == r else jnp.pad(x2d, ((0, rp - r), (0, 0)))
    s2 = scale_l.reshape(1, l)
    t2 = shift_l.reshape(1, l)
    in_specs = [pl.BlockSpec((tr, l), lambda i: (i, 0)),
                pl.BlockSpec((1, l), lambda i: (0, 0)),
                pl.BlockSpec((1, l), lambda i: (0, 0))]
    args = [x_p, s2, t2]
    if residual is not None:
        r_p = residual if rp == r else jnp.pad(residual, ((0, rp - r), (0, 0)))
        in_specs.append(pl.BlockSpec((tr, l), lambda i: (i, 0)))
        args.append(r_p)
        kern = functools.partial(_affine_leaky_res_kernel, alpha=alpha)
    else:
        kern = functools.partial(_affine_leaky_kernel, alpha=alpha)
    out = pl.pallas_call(
        kern,
        out_shape=jax.ShapeDtypeStruct((rp, l), jnp.float32),
        grid_spec=pltpu.PrefetchScalarGridSpec(
            num_scalar_prefetch=0,
            grid=(rp // tr,),
            in_specs=in_specs,
            out_specs=pl.BlockSpec((tr, l), lambda i: (i, 0)),
        ),
        compiler_params=pltpu.CompilerParams(
            dimension_semantics=("parallel",),
            vmem_limit_bytes=_VMEM_LIMIT),
    )(*args)
    return out if rp == r else out[:r]


# ---------------------------------------------------------------------------
# MaxPool2d(2,2): two single-input passes, each a max over contiguous halves
# of the lane axis (no strided / padded copies in HBM).
# ---------------------------------------------------------------------------
def _halfmax_kernel(x_ref, o_ref):
    half = o_ref.shape[-1]
    x = x_ref[...]
    o_ref[...] = jnp.maximum(x[:, :half], x[:, half:])


def _pairmax_lanes(x2d):
    """(R, 2L) -> (R, L): elementwise max of the two contiguous lane halves."""
    r, l2 = x2d.shape
    l = l2 // 2
    tr, rp = _row_blocks(r, _EW_TILE)
    x_p = x2d if rp == r else jnp.pad(x2d, ((0, rp - r), (0, 0)))
    out = pl.pallas_call(
        _halfmax_kernel,
        out_shape=jax.ShapeDtypeStruct((rp, l), jnp.float32),
        grid_spec=pltpu.PrefetchScalarGridSpec(
            num_scalar_prefetch=0,
            grid=(rp // tr,),
            in_specs=[pl.BlockSpec((tr, l2), lambda i: (i, 0))],
            out_specs=pl.BlockSpec((tr, l), lambda i: (i, 0)),
        ),
        compiler_params=pltpu.CompilerParams(
            dimension_semantics=("parallel",),
            vmem_limit_bytes=_VMEM_LIMIT),
    )(x_p)
    return out if rp == r else out[:r]


def maxpool2x2(x):
    """NHWC (n,h,w,c) -> (n,h/2,w/2,c), 2x2 / stride-2 max pooling."""
    n, h, w, c = x.shape
    ho, wo = h // 2, w // 2
    y = _pairmax_lanes(x.reshape(n * ho, 2 * w * c))        # pool height
    z = _pairmax_lanes(y.reshape(n * ho * wo, 2 * c))       # pool width
    return z.reshape(n, ho, wo, c)


# ---------------------------------------------------------------------------
# BatchNorm (training-mode batch stats, biased var) + LeakyReLU (+ residual).
# Statistics come fused out of the conv matmul; the affine runs on a
# lane-dense (n*h, w*c) layout with the per-channel params tiled over w.
# ---------------------------------------------------------------------------
def batchnorm_leaky(x, col_sum, col_sumsq, gamma, beta, alpha,
                    residual_folded=None, eps=1e-5):
    n, h, w, c = x.shape
    count = n * h * w
    mean = col_sum / count
    var = jnp.maximum(col_sumsq / count - mean * mean, 0.0)   # clamp >= 0
    scale = gamma * jax.lax.rsqrt(var + eps)
    shift = beta - mean * scale
    scale_l = jnp.tile(scale, w)            # matches lane layout of (n*h, w*c)
    shift_l = jnp.tile(shift, w)
    y = affine_leaky_2d(x.reshape(n * h, w * c), scale_l, shift_l, alpha,
                        residual=residual_folded)
    return y.reshape(n, h, w, c)


def residual_block(x, p, alpha=0.1):
    # conv1 (3x3, s2, no bias) -> bn1 -> LeakyReLU(0.1)
    out, s1, ss1 = conv2d(x, p["w1"], None, stride=2, pad=1)
    out = batchnorm_leaky(out, s1, ss1, p["g1"], p["b1"], alpha)
    # conv2 (3x3, s1, no bias)
    out, s2, ss2 = conv2d(out, p["w2"], None, stride=1, pad=1)
    # skip: 1x1 conv (no bias) then MaxPool2d(2,2)
    skip, _, _ = conv2d(x, p["wskip"], None, stride=1, pad=0)
    skip = maxpool2x2(skip)
    n, ho, wo, c = out.shape
    res_folded = skip.reshape(n * ho, wo * c)
    # bn2 -> += residual -> LeakyReLU(0.1), fused in one elementwise pass
    return batchnorm_leaky(out, s2, ss2, p["g2"], p["b2"], alpha,
                           residual_folded=res_folded)


def nlayer_discriminator(x_nchw, params, n_layers=3):
    """PatchGAN discriminator forward; x_nchw is NCHW like PyTorch."""
    x = jnp.transpose(x_nchw, (0, 2, 3, 1)).astype(jnp.float32)  # -> NHWC

    # Conv2d(input_nc, ndf, 4, s=2, p=1, bias=True) + LeakyReLU(0.2) fused
    x, _, _ = conv2d(x, params["w0"], params["bias0"], stride=2, pad=1,
                     alpha=0.2)

    # residual blocks (stride 2 conv, maxpool downsample on skip)
    for i in range(1, n_layers):
        x = residual_block(x, params[f"res{i}"], alpha=0.1)

    # Conv2d(k=4, s=1, p=1, bias=False) + BatchNorm + LeakyReLU(0.2)
    x, s, ss = conv2d(x, params["w_pen"], None, stride=1, pad=1)
    x = batchnorm_leaky(x, s, ss, params["g_pen"], params["b_pen"], 0.2)

    # Conv2d(ndf*8, 1, k=4, s=1, p=1, bias=True)
    x, _, _ = conv2d(x, params["w_out"], params["bias_out"], stride=1, pad=1)
    return jnp.transpose(x, (0, 3, 1, 2))  # back to NCHW


# ------------------------------------------------------------- param init
def init_params(key, input_nc, ndf, n_layers=3):
    keys = iter(jax.random.split(key, 64))

    def conv_w(k, kh, kw, cin, cout):
        fan_in = kh * kw * cin
        return (jax.random.normal(k, (kh, kw, cin, cout), jnp.float32)
                / jnp.sqrt(jnp.float32(fan_in)))

    params = {
        "w0": conv_w(next(keys), 4, 4, input_nc, ndf),
        "bias0": 0.01 * jax.random.normal(next(keys), (ndf,), jnp.float32),
    }
    nf_mult = 1
    for i in range(1, n_layers):
        nf_prev, nf_mult = nf_mult, min(2 ** i, 8)
        cin, cout = ndf * nf_prev, ndf * nf_mult
        params[f"res{i}"] = {
            "w1": conv_w(next(keys), 3, 3, cin, cout),
            "g1": 1.0 + 0.1 * jax.random.normal(next(keys), (cout,), jnp.float32),
            "b1": 0.1 * jax.random.normal(next(keys), (cout,), jnp.float32),
            "w2": conv_w(next(keys), 3, 3, cout, cout),
            "g2": 1.0 + 0.1 * jax.random.normal(next(keys), (cout,), jnp.float32),
            "b2": 0.1 * jax.random.normal(next(keys), (cout,), jnp.float32),
            "wskip": conv_w(next(keys), 1, 1, cin, cout),
        }
    nf_prev, nf_mult = nf_mult, min(2 ** n_layers, 8)
    cin, cout = ndf * nf_prev, ndf * nf_mult
    params["w_pen"] = conv_w(next(keys), 4, 4, cin, cout)
    params["g_pen"] = 1.0 + 0.1 * jax.random.normal(next(keys), (cout,), jnp.float32)
    params["b_pen"] = 0.1 * jax.random.normal(next(keys), (cout,), jnp.float32)
    params["w_out"] = conv_w(next(keys), 4, 4, cout, 1)
    params["bias_out"] = 0.01 * jax.random.normal(next(keys), (1,), jnp.float32)
    return params


if __name__ == "__main__":
    key = jax.random.PRNGKey(0)
    kx, kparam = jax.random.split(key)
    input_nc, ndf, n_layers = 3, 8, 3
    # spatial 32 so that all kw=4, pad=1 convs stay valid down the stack
    x = jax.random.normal(kx, (2, input_nc, 32, 32), jnp.float32)
    params = init_params(kparam, input_nc, ndf, n_layers)

    fwd = jax.jit(functools.partial(nlayer_discriminator, n_layers=n_layers))
    out = fwd(x, params)
    jax.block_until_ready(out)
    assert out.shape == (2, 1, 2, 2), out.shape
    assert out.dtype == jnp.float32
    print("KERNEL_OK")
</pallas_src>

<mosaic_0001>
module attributes {stable_mosaic.version = 11 : i64} {
  func.func @_conv_mm_kernel(%arg0: i32, %arg1: i32, %arg2: memref<256x128xbf16, #tpu.memory_space<vmem>>, %arg3: memref<128x128xbf16, #tpu.memory_space<vmem>>, %arg4: memref<1x128xf32, #tpu.memory_space<vmem>>, %arg5: memref<256x128xf32, #tpu.memory_space<vmem>>, %arg6: memref<8x128xf32, #tpu.memory_space<vmem>>, %arg7: memref<256x128xf32, #tpu.memory_space<vmem>>) attributes {dimension_semantics = [#tpu.dimension_semantics<parallel>, #tpu.dimension_semantics<arbitrary>], iteration_bounds = array<i64: 2, 1>, scalar_prefetch = 0 : i64, scratch_operands = 1 : i64, tpu.core_type = #tpu.core_type<tc>, window_params = [{transform_indices = @transform_0, window_bounds = array<i64: 256, 128>}, {transform_indices = @transform_1, window_bounds = array<i64: 128, 128>}, {pipeline_mode = #tpu.pipeline_mode<synchronous>, transform_indices = @transform_2, window_bounds = array<i64: 1, 128>}, {transform_indices = @transform_3, window_bounds = array<i64: 256, 128>}, {transform_indices = @transform_4, window_bounds = array<i64: 8, 128>}]} {
    %c0_i32 = arith.constant 0 : i32
    %0 = arith.cmpi eq, %arg1, %c0_i32 : i32
    %1 = arith.extui %0 : i1 to i32
    %c0_i32_0 = arith.constant 0 : i32
    %2 = arith.cmpi ne, %1, %c0_i32_0 : i32
    scf.if %2 {
      %cst_10 = arith.constant 0.000000e+00 : f32
      %12 = vector.broadcast %cst_10 : f32 to vector<256x128xf32>
      %c0_11 = arith.constant 0 : index
      %c0_12 = arith.constant 0 : index
      %13 = vector.load %arg7[%c0_11, %c0_12] : memref<256x128xf32, #tpu.memory_space<vmem>>, vector<256x128xf32>
      tpu.vector_store %arg7[%c0_11, %c0_12], %12 {strides = array<i32>} : memref<256x128xf32, #tpu.memory_space<vmem>>, vector<256x128xf32>,
    } else {
    }
    %c0 = arith.constant 0 : index
    %c0_1 = arith.constant 0 : index
    %3 = vector.load %arg7[%c0, %c0_1] : memref<256x128xf32, #tpu.memory_space<vmem>>, vector<256x128xf32>
    %c0_2 = arith.constant 0 : index
    %c0_3 = arith.constant 0 : index
    %4 = vector.load %arg2[%c0_2, %c0_3] : memref<256x128xbf16, #tpu.memory_space<vmem>>, vector<256x128xbf16>
    %c0_4 = arith.constant 0 : index
    %c0_5 = arith.constant 0 : index
    %5 = vector.load %arg3[%c0_4, %c0_5] : memref<128x128xbf16, #tpu.memory_space<vmem>>, vector<128x128xbf16>
    %cst = arith.constant dense<0.000000e+00> : vector<256x128xf32>
    %6 = tpu.matmul %4, %5, %cst {dimension_numbers = #tpu.dot_dimension_numbers<[1], [0], [0], [1], [0, 0, 1, 1], [], []>} : vector<256x128xbf16>, vector<128x128xbf16>, vector<256x128xf32> -> vector<256x128xf32>
    %7 = arith.addf %3, %6 : vector<256x128xf32>
    %c0_6 = arith.constant 0 : index
    %c0_7 = arith.constant 0 : index
    %8 = vector.load %arg7[%c0_6, %c0_7] : memref<256x128xf32, #tpu.memory_space<vmem>>, vector<256x128xf32>
    tpu.vector_store %arg7[%c0_6, %c0_7], %7 {strides = array<i32>} : memref<256x128xf32, #tpu.memory_space<vmem>>, vector<256x128xf32>,
    %c0_i32_8 = arith.constant 0 : i32
    %9 = arith.cmpi eq, %arg1, %c0_i32_8 : i32
    %10 = arith.extui %9 : i1 to i32
    %c0_i32_9 = arith.constant 0 : i32
    %11 = arith.cmpi ne, %10, %c0_i32_9 : i32
    scf.if %11 {
      %c0_10 = arith.constant 0 : index
      %c0_11 = arith.constant 0 : index
      %12 = vector.load %arg7[%c0_10, %c0_11] : memref<256x128xf32, #tpu.memory_space<vmem>>, vector<256x128xf32>
      %c0_12 = arith.constant 0 : index
      %c0_13 = arith.constant 0 : index
      %13 = vector.load %arg4[%c0_12, %c0_13] : memref<1x128xf32, #tpu.memory_space<vmem>>, vector<1x128xf32>
      %14 = vector.broadcast %13 : vector<1x128xf32> to vector<256x128xf32>
      %15 = arith.addf %12, %14 : vector<256x128xf32>
      %cst_14 = arith.constant 0.000000e+00 : f32
      %16 = vector.broadcast %cst_14 : f32 to vector<256x128xf32>
      %17 = arith.cmpf oge, %15, %16 : vector<256x128xf32>
      %cst_15 = arith.constant 2.000000e-01 : f32
      %18 = vector.broadcast %cst_15 : f32 to vector<256x128xf32>
      %19 = arith.mulf %18, %15 : vector<256x128xf32>
      %20 = arith.select %17, %15, %19 : vector<256x128xi1>, vector<256x128xf32>
      %c0_16 = arith.constant 0 : index
      %c0_17 = arith.constant 0 : index
      %21 = vector.load %arg5[%c0_16, %c0_17] : memref<256x128xf32, #tpu.memory_space<vmem>>, vector<256x128xf32>
      tpu.vector_store %arg5[%c0_16, %c0_17], %20 {strides = array<i32>} : memref<256x128xf32, #tpu.memory_space<vmem>>, vector<256x128xf32>,
      %cst_18 = arith.constant dense<0.000000e+00> : vector<128xf32>
      %22 = vector.multi_reduction <add>, %20, %cst_18 [0] : vector<256x128xf32> to vector<128xf32>
      %23 = vector.shape_cast %22 : vector<128xf32> to vector<1x128xf32>
      %c0_19 = arith.constant 0 : index
      %c0_20 = arith.constant 0 : index
      %24 = vector.load %arg6[%c0_19, %c0_20] : memref<8x128xf32, #tpu.memory_space<vmem>>, vector<1x128xf32>
      tpu.vector_store %arg6[%c0_19, %c0_20], %23 {strides = array<i32>} : memref<8x128xf32, #tpu.memory_space<vmem>>, vector<1x128xf32>,
      %25 = arith.mulf %20, %20 : vector<256x128xf32>
      %cst_21 = arith.constant dense<0.000000e+00> : vector<128xf32>
      %26 = vector.multi_reduction <add>, %25, %cst_21 [0] : vector<256x128xf32> to vector<128xf32>
      %27 = vector.shape_cast %26 : vector<128xf32> to vector<1x128xf32>
      %c1 = arith.constant 1 : index
      %c0_22 = arith.constant 0 : index
      %28 = vector.load %arg6[%c1, %c0_22] : memref<8x128xf32, #tpu.memory_space<vmem>>, vector<1x128xf32>
      tpu.vector_store %arg6[%c1, %c0_22], %27 {strides = array<i32>} : memref<8x128xf32, #tpu.memory_space<vmem>>, vector<1x128xf32>,
    } else {
    }
    return
  }
  func.func @transform_0(%arg0: i32, %arg1: i32) -> (i32, i32) {
    %c0_i32 = arith.constant 0 : i32
    return %arg0, %arg1 : i32, i32
  }
  func.func @transform_1(%arg0: i32, %arg1: i32) -> (i32, i32) {
    %c0_i32 = arith.constant 0 : i32
    %c0_i32_0 = arith.constant 0 : i32
    return %arg1, %c0_i32 : i32, i32
  }
  func.func @transform_2(%arg0: i32, %arg1: i32) -> (i32, i32) {
    %c0_i32 = arith.constant 0 : i32
    %c0_i32_0 = arith.constant 0 : i32
    %c0_i32_1 = arith.constant 0 : i32
    return %c0_i32, %c0_i32_0 : i32, i32
  }
  func.func @transform_3(%arg0: i32, %arg1: i32) -> (i32, i32) {
    %c0_i32 = arith.constant 0 : i32
    %c0_i32_0 = arith.constant 0 : i32
    return %arg0, %c0_i32 : i32, i32
  }
  func.func @transform_4(%arg0: i32, %arg1: i32) -> (i32, i32) {
    %c0_i32 = arith.constant 0 : i32
    %c0_i32_0 = arith.constant 0 : i32
    return %arg0, %c0_i32 : i32, i32
  }
}

module attributes {stable_mosaic.version = 11 : i64} {
  func.func @_conv_mm_kernel(%arg0: i32, %arg1: i32, %arg2: memref<128x128xbf16, #tpu.memory_space<vmem>>, %arg3: memref<128x128xbf16, #tpu.memory_space<vmem>>, %arg4: memref<1x128xf32, #tpu.memory_space<vmem>>, %arg5: memref<128x128xf32, #tpu.memory_space<vmem>>, %arg6: memref<8x128xf32, #tpu.memory_space<vmem>>, %arg7: memref<128x128xf32, #tpu.memory_space<vmem>>) attributes {dimension_semantics = [#tpu.dimension_semantics<parallel>, #tpu.dimension_semantics<arbitrary>], iteration_bounds = array<i64: 1, 1>, scalar_prefetch = 0 : i64, scratch_operands = 1 : i64, tpu.core_type = #tpu.core_type<tc>, window_params = [{transform_indices = @transform_0, window_bounds = array<i64: 128, 128>}, {transform_indices = @transform_1, window_bounds = array<i64: 128, 128>}, {pipeline_mode = #tpu.pipeline_mode<synchronous>, transform_indices = @transform_2, window_bounds = array<i64: 1, 128>}, {transform_indices = @transform_3, window_bounds = array<i64: 128, 128>}, {transform_indices = @transform_4, window_bounds = array<i64: 8, 128>}]} {
    %c0_i32 = arith.constant 0 : i32
    %0 = arith.cmpi eq, %arg1, %c0_i32 : i32
    %1 = arith.extui %0 : i1 to i32
    %c0_i32_0 = arith.constant 0 : i32
    %2 = arith.cmpi ne, %1, %c0_i32_0 : i32
    scf.if %2 {
      %cst_10 = arith.constant 0.000000e+00 : f32
      %12 = vector.broadcast %cst_10 : f32 to vector<128x128xf32>
      %c0_11 = arith.constant 0 : index
      %c0_12 = arith.constant 0 : index
      %13 = vector.load %arg7[%c0_11, %c0_12] : memref<128x128xf32, #tpu.memory_space<vmem>>, vector<128x128xf32>
      tpu.vector_store %arg7[%c0_11, %c0_12], %12 {strides = array<i32>} : memref<128x128xf32, #tpu.memory_space<vmem>>, vector<128x128xf32>,
    } else {
    }
    %c0 = arith.constant 0 : index
    %c0_1 = arith.constant 0 : index
    %3 = vector.load %arg7[%c0, %c0_1] : memref<128x128xf32, #tpu.memory_space<vmem>>, vector<128x128xf32>
    %c0_2 = arith.constant 0 : index
    %c0_3 = arith.constant 0 : index
    %4 = vector.load %arg2[%c0_2, %c0_3] : memref<128x128xbf16, #tpu.memory_space<vmem>>, vector<128x128xbf16>
    %c0_4 = arith.constant 0 : index
    %c0_5 = arith.constant 0 : index
    %5 = vector.load %arg3[%c0_4, %c0_5] : memref<128x128xbf16, #tpu.memory_space<vmem>>, vector<128x128xbf16>
    %cst = arith.constant dense<0.000000e+00> : vector<128x128xf32>
    %6 = tpu.matmul %4, %5, %cst {dimension_numbers = #tpu.dot_dimension_numbers<[1], [0], [0], [1], [0, 0, 1, 1], [], []>} : vector<128x128xbf16>, vector<128x128xbf16>, vector<128x128xf32> -> vector<128x128xf32>
    %7 = arith.addf %3, %6 : vector<128x128xf32>
    %c0_6 = arith.constant 0 : index
    %c0_7 = arith.constant 0 : index
    %8 = vector.load %arg7[%c0_6, %c0_7] : memref<128x128xf32, #tpu.memory_space<vmem>>, vector<128x128xf32>
    tpu.vector_store %arg7[%c0_6, %c0_7], %7 {strides = array<i32>} : memref<128x128xf32, #tpu.memory_space<vmem>>, vector<128x128xf32>,
    %c0_i32_8 = arith.constant 0 : i32
    %9 = arith.cmpi eq, %arg1, %c0_i32_8 : i32
    %10 = arith.extui %9 : i1 to i32
    %c0_i32_9 = arith.constant 0 : i32
    %11 = arith.cmpi ne, %10, %c0_i32_9 : i32
    scf.if %11 {
      %c0_10 = arith.constant 0 : index
      %c0_11 = arith.constant 0 : index
      %12 = vector.load %arg7[%c0_10, %c0_11] : memref<128x128xf32, #tpu.memory_space<vmem>>, vector<128x128xf32>
      %c0_12 = arith.constant 0 : index
      %c0_13 = arith.constant 0 : index
      %13 = vector.load %arg4[%c0_12, %c0_13] : memref<1x128xf32, #tpu.memory_space<vmem>>, vector<1x128xf32>
      %14 = vector.broadcast %13 : vector<1x128xf32> to vector<128x128xf32>
      %15 = arith.addf %12, %14 : vector<128x128xf32>
      %c0_14 = arith.constant 0 : index
      %c0_15 = arith.constant 0 : index
      %16 = vector.load %arg5[%c0_14, %c0_15] : memref<128x128xf32, #tpu.memory_space<vmem>>, vector<128x128xf32>
      tpu.vector_store %arg5[%c0_14, %c0_15], %15 {strides = array<i32>} : memref<128x128xf32, #tpu.memory_space<vmem>>, vector<128x128xf32>,
      %cst_16 = arith.constant dense<0.000000e+00> : vector<128xf32>
      %17 = vector.multi_reduction <add>, %15, %cst_16 [0] : vector<128x128xf32> to vector<128xf32>
      %18 = vector.shape_cast %17 : vector<128xf32> to vector<1x128xf32>
      %c0_17 = arith.constant 0 : index
      %c0_18 = arith.constant 0 : index
      %19 = vector.load %arg6[%c0_17, %c0_18] : memref<8x128xf32, #tpu.memory_space<vmem>>, vector<1x128xf32>
      tpu.vector_store %arg6[%c0_17, %c0_18], %18 {strides = array<i32>} : memref<8x128xf32, #tpu.memory_space<vmem>>, vector<1x128xf32>,
      %20 = arith.mulf %15, %15 : vector<128x128xf32>
      %cst_19 = arith.constant dense<0.000000e+00> : vector<128xf32>
      %21 = vector.multi_reduction <add>, %20, %cst_19 [0] : vector<128x128xf32> to vector<128xf32>
      %22 = vector.shape_cast %21 : vector<128xf32> to vector<1x128xf32>
      %c1 = arith.constant 1 : index
      %c0_20 = arith.constant 0 : index
      %23 = vector.load %arg6[%c1, %c0_20] : memref<8x128xf32, #tpu.memory_space<vmem>>, vector<1x128xf32>
      tpu.vector_store %arg6[%c1, %c0_20], %22 {strides = array<i32>} : memref<8x128xf32, #tpu.memory_space<vmem>>, vector<1x128xf32>,
    } else {
    }
    return
  }
  func.func @transform_0(%arg0: i32, %arg1: i32) -> (i32, i32) {
    %c0_i32 = arith.constant 0 : i32
    return %arg0, %arg1 : i32, i32
  }
  func.func @transform_1(%arg0: i32, %arg1: i32) -> (i32, i32) {
    %c0_i32 = arith.constant 0 : i32
    %c0_i32_0 = arith.constant 0 : i32
    return %arg1, %c0_i32 : i32, i32
  }
  func.func @transform_2(%arg0: i32, %arg1: i32) -> (i32, i32) {
    %c0_i32 = arith.constant 0 : i32
    %c0_i32_0 = arith.constant 0 : i32
    %c0_i32_1 = arith.constant 0 : i32
    return %c0_i32, %c0_i32_0 : i32, i32
  }
  func.func @transform_3(%arg0: i32, %arg1: i32) -> (i32, i32) {
    %c0_i32 = arith.constant 0 : i32
    %c0_i32_0 = arith.constant 0 : i32
    return %arg0, %c0_i32 : i32, i32
  }
  func.func @transform_4(%arg0: i32, %arg1: i32) -> (i32, i32) {
    %c0_i32 = arith.constant 0 : i32
    %c0_i32_0 = arith.constant 0 : i32
    return %arg0, %c0_i32 : i32, i32
  }
}

module attributes {stable_mosaic.version = 11 : i64} {
  func.func @_affine_leaky_kernel(%arg0: i32, %arg1: memref<16x128xf32, #tpu.memory_space<vmem>>, %arg2: memref<1x128xf32, #tpu.memory_space<vmem>>, %arg3: memref<1x128xf32, #tpu.memory_space<vmem>>, %arg4: memref<16x128xf32, #tpu.memory_space<vmem>>) attributes {dimension_semantics = [#tpu.dimension_semantics<parallel>], iteration_bounds = array<i64: 1>, scalar_prefetch = 0 : i64, scratch_operands = 0 : i64, tpu.core_type = #tpu.core_type<tc>, window_params = [{transform_indices = @transform_0, window_bounds = array<i64: 16, 128>}, {pipeline_mode = #tpu.pipeline_mode<synchronous>, transform_indices = @transform_1, window_bounds = array<i64: 1, 128>}, {pipeline_mode = #tpu.pipeline_mode<synchronous>, transform_indices = @transform_2, window_bounds = array<i64: 1, 128>}, {transform_indices = @transform_3, window_bounds = array<i64: 16, 128>}]} {
    %c0 = arith.constant 0 : index
    %c0_0 = arith.constant 0 : index
    %0 = vector.load %arg1[%c0, %c0_0] : memref<16x128xf32, #tpu.memory_space<vmem>>, vector<16x128xf32>
    %c0_1 = arith.constant 0 : index
    %c0_2 = arith.constant 0 : index
    %1 = vector.load %arg2[%c0_1, %c0_2] : memref<1x128xf32, #tpu.memory_space<vmem>>, vector<1x128xf32>
    %2 = vector.broadcast %1 : vector<1x128xf32> to vector<16x128xf32>
    %3 = arith.mulf %0, %2 : vector<16x128xf32>
    %c0_3 = arith.constant 0 : index
    %c0_4 = arith.constant 0 : index
    %4 = vector.load %arg3[%c0_3, %c0_4] : memref<1x128xf32, #tpu.memory_space<vmem>>, vector<1x128xf32>
    %5 = vector.broadcast %4 : vector<1x128xf32> to vector<16x128xf32>
    %6 = arith.addf %3, %5 : vector<16x128xf32>
    %cst = arith.constant 0.000000e+00 : f32
    %7 = vector.broadcast %cst : f32 to vector<16x128xf32>
    %8 = arith.cmpf oge, %6, %7 : vector<16x128xf32>
    %cst_5 = arith.constant 1.000000e-01 : f32
    %9 = vector.broadcast %cst_5 : f32 to vector<16x128xf32>
    %10 = arith.mulf %9, %6 : vector<16x128xf32>
    %11 = arith.select %8, %6, %10 : vector<16x128xi1>, vector<16x128xf32>
    %c0_6 = arith.constant 0 : index
    %c0_7 = arith.constant 0 : index
    %12 = vector.load %arg4[%c0_6, %c0_7] : memref<16x128xf32, #tpu.memory_space<vmem>>, vector<16x128xf32>
    tpu.vector_store %arg4[%c0_6, %c0_7], %11 {strides = array<i32>} : memref<16x128xf32, #tpu.memory_space<vmem>>, vector<16x128xf32>,
    return
  }
  func.func @transform_0(%arg0: i32) -> (i32, i32) {
    %c0_i32 = arith.constant 0 : i32
    %c0_i32_0 = arith.constant 0 : i32
    return %arg0, %c0_i32 : i32, i32
  }
  func.func @transform_1(%arg0: i32) -> (i32, i32) {
    %c0_i32 = arith.constant 0 : i32
    %c0_i32_0 = arith.constant 0 : i32
    %c0_i32_1 = arith.constant 0 : i32
    return %c0_i32, %c0_i32_0 : i32, i32
  }
  func.func @transform_2(%arg0: i32) -> (i32, i32) {
    %c0_i32 = arith.constant 0 : i32
    %c0_i32_0 = arith.constant 0 : i32
    %c0_i32_1 = arith.constant 0 : i32
    return %c0_i32, %c0_i32_0 : i32, i32
  }
  func.func @transform_3(%arg0: i32) -> (i32, i32) {
    %c0_i32 = arith.constant 0 : i32
    %c0_i32_0 = arith.constant 0 : i32
    return %arg0, %c0_i32 : i32, i32
  }
}

module attributes {stable_mosaic.version = 11 : i64} {
  func.func @_conv_mm_kernel(%arg0: i32, %arg1: i32, %arg2: memref<128x256xbf16, #tpu.memory_space<vmem>>, %arg3: memref<256x128xbf16, #tpu.memory_space<vmem>>, %arg4: memref<1x128xf32, #tpu.memory_space<vmem>>, %arg5: memref<128x128xf32, #tpu.memory_space<vmem>>, %arg6: memref<8x128xf32, #tpu.memory_space<vmem>>, %arg7: memref<128x128xf32, #tpu.memory_space<vmem>>) attributes {dimension_semantics = [#tpu.dimension_semantics<parallel>, #tpu.dimension_semantics<arbitrary>], iteration_bounds = array<i64: 1, 1>, scalar_prefetch = 0 : i64, scratch_operands = 1 : i64, tpu.core_type = #tpu.core_type<tc>, window_params = [{transform_indices = @transform_0, window_bounds = array<i64: 128, 256>}, {transform_indices = @transform_1, window_bounds = array<i64: 256, 128>}, {pipeline_mode = #tpu.pipeline_mode<synchronous>, transform_indices = @transform_2, window_bounds = array<i64: 1, 128>}, {transform_indices = @transform_3, window_bounds = array<i64: 128, 128>}, {transform_indices = @transform_4, window_bounds = array<i64: 8, 128>}]} {
    %c0_i32 = arith.constant 0 : i32
    %0 = arith.cmpi eq, %arg1, %c0_i32 : i32
    %1 = arith.extui %0 : i1 to i32
    %c0_i32_0 = arith.constant 0 : i32
    %2 = arith.cmpi ne, %1, %c0_i32_0 : i32
    scf.if %2 {
      %cst_10 = arith.constant 0.000000e+00 : f32
      %12 = vector.broadcast %cst_10 : f32 to vector<128x128xf32>
      %c0_11 = arith.constant 0 : index
      %c0_12 = arith.constant 0 : index
      %13 = vector.load %arg7[%c0_11, %c0_12] : memref<128x128xf32, #tpu.memory_space<vmem>>, vector<128x128xf32>
      tpu.vector_store %arg7[%c0_11, %c0_12], %12 {strides = array<i32>} : memref<128x128xf32, #tpu.memory_space<vmem>>, vector<128x128xf32>,
    } else {
    }
    %c0 = arith.constant 0 : index
    %c0_1 = arith.constant 0 : index
    %3 = vector.load %arg7[%c0, %c0_1] : memref<128x128xf32, #tpu.memory_space<vmem>>, vector<128x128xf32>
    %c0_2 = arith.constant 0 : index
    %c0_3 = arith.constant 0 : index
    %4 = vector.load %arg2[%c0_2, %c0_3] : memref<128x256xbf16, #tpu.memory_space<vmem>>, vector<128x256xbf16>
    %c0_4 = arith.constant 0 : index
    %c0_5 = arith.constant 0 : index
    %5 = vector.load %arg3[%c0_4, %c0_5] : memref<256x128xbf16, #tpu.memory_space<vmem>>, vector<256x128xbf16>
    %cst = arith.constant dense<0.000000e+00> : vector<128x128xf32>
    %6 = tpu.matmul %4, %5, %cst {dimension_numbers = #tpu.dot_dimension_numbers<[1], [0], [0], [1], [0, 0, 1, 1], [], []>} : vector<128x256xbf16>, vector<256x128xbf16>, vector<128x128xf32> -> vector<128x128xf32>
    %7 = arith.addf %3, %6 : vector<128x128xf32>
    %c0_6 = arith.constant 0 : index
    %c0_7 = arith.constant 0 : index
    %8 = vector.load %arg7[%c0_6, %c0_7] : memref<128x128xf32, #tpu.memory_space<vmem>>, vector<128x128xf32>
    tpu.vector_store %arg7[%c0_6, %c0_7], %7 {strides = array<i32>} : memref<128x128xf32, #tpu.memory_space<vmem>>, vector<128x128xf32>,
    %c0_i32_8 = arith.constant 0 : i32
    %9 = arith.cmpi eq, %arg1, %c0_i32_8 : i32
    %10 = arith.extui %9 : i1 to i32
    %c0_i32_9 = arith.constant 0 : i32
    %11 = arith.cmpi ne, %10, %c0_i32_9 : i32
    scf.if %11 {
      %c0_10 = arith.constant 0 : index
      %c0_11 = arith.constant 0 : index
      %12 = vector.load %arg7[%c0_10, %c0_11] : memref<128x128xf32, #tpu.memory_space<vmem>>, vector<128x128xf32>
      %c0_12 = arith.constant 0 : index
      %c0_13 = arith.constant 0 : index
      %13 = vector.load %arg4[%c0_12, %c0_13] : memref<1x128xf32, #tpu.memory_space<vmem>>, vector<1x128xf32>
      %14 = vector.broadcast %13 : vector<1x128xf32> to vector<128x128xf32>
      %15 = arith.addf %12, %14 : vector<128x128xf32>
      %c0_14 = arith.constant 0 : index
      %c0_15 = arith.constant 0 : index
      %16 = vector.load %arg5[%c0_14, %c0_15] : memref<128x128xf32, #tpu.memory_space<vmem>>, vector<128x128xf32>
      tpu.vector_store %arg5[%c0_14, %c0_15], %15 {strides = array<i32>} : memref<128x128xf32, #tpu.memory_space<vmem>>, vector<128x128xf32>,
      %cst_16 = arith.constant dense<0.000000e+00> : vector<128xf32>
      %17 = vector.multi_reduction <add>, %15, %cst_16 [0] : vector<128x128xf32> to vector<128xf32>
      %18 = vector.shape_cast %17 : vector<128xf32> to vector<1x128xf32>
      %c0_17 = arith.constant 0 : index
      %c0_18 = arith.constant 0 : index
      %19 = vector.load %arg6[%c0_17, %c0_18] : memref<8x128xf32, #tpu.memory_space<vmem>>, vector<1x128xf32>
      tpu.vector_store %arg6[%c0_17, %c0_18], %18 {strides = array<i32>} : memref<8x128xf32, #tpu.memory_space<vmem>>, vector<1x128xf32>,
      %20 = arith.mulf %15, %15 : vector<128x128xf32>
      %cst_19 = arith.constant dense<0.000000e+00> : vector<128xf32>
      %21 = vector.multi_reduction <add>, %20, %cst_19 [0] : vector<128x128xf32> to vector<128xf32>
      %22 = vector.shape_cast %21 : vector<128xf32> to vector<1x128xf32>
      %c1 = arith.constant 1 : index
      %c0_20 = arith.constant 0 : index
      %23 = vector.load %arg6[%c1, %c0_20] : memref<8x128xf32, #tpu.memory_space<vmem>>, vector<1x128xf32>
      tpu.vector_store %arg6[%c1, %c0_20], %22 {strides = array<i32>} : memref<8x128xf32, #tpu.memory_space<vmem>>, vector<1x128xf32>,
    } else {
    }
    return
  }
  func.func @transform_0(%arg0: i32, %arg1: i32) -> (i32, i32) {
    %c0_i32 = arith.constant 0 : i32
    return %arg0, %arg1 : i32, i32
  }
  func.func @transform_1(%arg0: i32, %arg1: i32) -> (i32, i32) {
    %c0_i32 = arith.constant 0 : i32
    %c0_i32_0 = arith.constant 0 : i32
    return %arg1, %c0_i32 : i32, i32
  }
  func.func @transform_2(%arg0: i32, %arg1: i32) -> (i32, i32) {
    %c0_i32 = arith.constant 0 : i32
    %c0_i32_0 = arith.constant 0 : i32
    %c0_i32_1 = arith.constant 0 : i32
    return %c0_i32, %c0_i32_0 : i32, i32
  }
  func.func @transform_3(%arg0: i32, %arg1: i32) -> (i32, i32) {
    %c0_i32 = arith.constant 0 : i32
    %c0_i32_0 = arith.constant 0 : i32
    return %arg0, %c0_i32 : i32, i32
  }
  func.func @transform_4(%arg0: i32, %arg1: i32) -> (i32, i32) {
    %c0_i32 = arith.constant 0 : i32
    %c0_i32_0 = arith.constant 0 : i32
    return %arg0, %c0_i32 : i32, i32
  }
}

module attributes {stable_mosaic.version = 11 : i64} {
  func.func @_conv_mm_kernel(%arg0: i32, %arg1: i32, %arg2: memref<256x128xbf16, #tpu.memory_space<vmem>>, %arg3: memref<128x128xbf16, #tpu.memory_space<vmem>>, %arg4: memref<1x128xf32, #tpu.memory_space<vmem>>, %arg5: memref<256x128xf32, #tpu.memory_space<vmem>>, %arg6: memref<8x128xf32, #tpu.memory_space<vmem>>, %arg7: memref<256x128xf32, #tpu.memory_space<vmem>>) attributes {dimension_semantics = [#tpu.dimension_semantics<parallel>, #tpu.dimension_semantics<arbitrary>], iteration_bounds = array<i64: 2, 1>, scalar_prefetch = 0 : i64, scratch_operands = 1 : i64, tpu.core_type = #tpu.core_type<tc>, window_params = [{transform_indices = @transform_0, window_bounds = array<i64: 256, 128>}, {transform_indices = @transform_1, window_bounds = array<i64: 128, 128>}, {pipeline_mode = #tpu.pipeline_mode<synchronous>, transform_indices = @transform_2, window_bounds = array<i64: 1, 128>}, {transform_indices = @transform_3, window_bounds = array<i64: 256, 128>}, {transform_indices = @transform_4, window_bounds = array<i64: 8, 128>}]} {
    %c0_i32 = arith.constant 0 : i32
    %0 = arith.cmpi eq, %arg1, %c0_i32 : i32
    %1 = arith.extui %0 : i1 to i32
    %c0_i32_0 = arith.constant 0 : i32
    %2 = arith.cmpi ne, %1, %c0_i32_0 : i32
    scf.if %2 {
      %cst_10 = arith.constant 0.000000e+00 : f32
      %12 = vector.broadcast %cst_10 : f32 to vector<256x128xf32>
      %c0_11 = arith.constant 0 : index
      %c0_12 = arith.constant 0 : index
      %13 = vector.load %arg7[%c0_11, %c0_12] : memref<256x128xf32, #tpu.memory_space<vmem>>, vector<256x128xf32>
      tpu.vector_store %arg7[%c0_11, %c0_12], %12 {strides = array<i32>} : memref<256x128xf32, #tpu.memory_space<vmem>>, vector<256x128xf32>,
    } else {
    }
    %c0 = arith.constant 0 : index
    %c0_1 = arith.constant 0 : index
    %3 = vector.load %arg7[%c0, %c0_1] : memref<256x128xf32, #tpu.memory_space<vmem>>, vector<256x128xf32>
    %c0_2 = arith.constant 0 : index
    %c0_3 = arith.constant 0 : index
    %4 = vector.load %arg2[%c0_2, %c0_3] : memref<256x128xbf16, #tpu.memory_space<vmem>>, vector<256x128xbf16>
    %c0_4 = arith.constant 0 : index
    %c0_5 = arith.constant 0 : index
    %5 = vector.load %arg3[%c0_4, %c0_5] : memref<128x128xbf16, #tpu.memory_space<vmem>>, vector<128x128xbf16>
    %cst = arith.constant dense<0.000000e+00> : vector<256x128xf32>
    %6 = tpu.matmul %4, %5, %cst {dimension_numbers = #tpu.dot_dimension_numbers<[1], [0], [0], [1], [0, 0, 1, 1], [], []>} : vector<256x128xbf16>, vector<128x128xbf16>, vector<256x128xf32> -> vector<256x128xf32>
    %7 = arith.addf %3, %6 : vector<256x128xf32>
    %c0_6 = arith.constant 0 : index
    %c0_7 = arith.constant 0 : index
    %8 = vector.load %arg7[%c0_6, %c0_7] : memref<256x128xf32, #tpu.memory_space<vmem>>, vector<256x128xf32>
    tpu.vector_store %arg7[%c0_6, %c0_7], %7 {strides = array<i32>} : memref<256x128xf32, #tpu.memory_space<vmem>>, vector<256x128xf32>,
    %c0_i32_8 = arith.constant 0 : i32
    %9 = arith.cmpi eq, %arg1, %c0_i32_8 : i32
    %10 = arith.extui %9 : i1 to i32
    %c0_i32_9 = arith.constant 0 : i32
    %11 = arith.cmpi ne, %10, %c0_i32_9 : i32
    scf.if %11 {
      %c0_10 = arith.constant 0 : index
      %c0_11 = arith.constant 0 : index
      %12 = vector.load %arg7[%c0_10, %c0_11] : memref<256x128xf32, #tpu.memory_space<vmem>>, vector<256x128xf32>
      %c0_12 = arith.constant 0 : index
      %c0_13 = arith.constant 0 : index
      %13 = vector.load %arg4[%c0_12, %c0_13] : memref<1x128xf32, #tpu.memory_space<vmem>>, vector<1x128xf32>
      %14 = vector.broadcast %13 : vector<1x128xf32> to vector<256x128xf32>
      %15 = arith.addf %12, %14 : vector<256x128xf32>
      %c0_14 = arith.constant 0 : index
      %c0_15 = arith.constant 0 : index
      %16 = vector.load %arg5[%c0_14, %c0_15] : memref<256x128xf32, #tpu.memory_space<vmem>>, vector<256x128xf32>
      tpu.vector_store %arg5[%c0_14, %c0_15], %15 {strides = array<i32>} : memref<256x128xf32, #tpu.memory_space<vmem>>, vector<256x128xf32>,
      %cst_16 = arith.constant dense<0.000000e+00> : vector<128xf32>
      %17 = vector.multi_reduction <add>, %15, %cst_16 [0] : vector<256x128xf32> to vector<128xf32>
      %18 = vector.shape_cast %17 : vector<128xf32> to vector<1x128xf32>
      %c0_17 = arith.constant 0 : index
      %c0_18 = arith.constant 0 : index
      %19 = vector.load %arg6[%c0_17, %c0_18] : memref<8x128xf32, #tpu.memory_space<vmem>>, vector<1x128xf32>
      tpu.vector_store %arg6[%c0_17, %c0_18], %18 {strides = array<i32>} : memref<8x128xf32, #tpu.memory_space<vmem>>, vector<1x128xf32>,
      %20 = arith.mulf %15, %15 : vector<256x128xf32>
      %cst_19 = arith.constant dense<0.000000e+00> : vector<128xf32>
      %21 = vector.multi_reduction <add>, %20, %cst_19 [0] : vector<256x128xf32> to vector<128xf32>
      %22 = vector.shape_cast %21 : vector<128xf32> to vector<1x128xf32>
      %c1 = arith.constant 1 : index
      %c0_20 = arith.constant 0 : index
      %23 = vector.load %arg6[%c1, %c0_20] : memref<8x128xf32, #tpu.memory_space<vmem>>, vector<1x128xf32>
      tpu.vector_store %arg6[%c1, %c0_20], %22 {strides = array<i32>} : memref<8x128xf32, #tpu.memory_space<vmem>>, vector<1x128xf32>,
    } else {
    }
    return
  }
  func.func @transform_0(%arg0: i32, %arg1: i32) -> (i32, i32) {
    %c0_i32 = arith.constant 0 : i32
    return %arg0, %arg1 : i32, i32
  }
  func.func @transform_1(%arg0: i32, %arg1: i32) -> (i32, i32) {
    %c0_i32 = arith.constant 0 : i32
    %c0_i32_0 = arith.constant 0 : i32
    return %arg1, %c0_i32 : i32, i32
  }
  func.func @transform_2(%arg0: i32, %arg1: i32) -> (i32, i32) {
    %c0_i32 = arith.constant 0 : i32
    %c0_i32_0 = arith.constant 0 : i32
    %c0_i32_1 = arith.constant 0 : i32
    return %c0_i32, %c0_i32_0 : i32, i32
  }
  func.func @transform_3(%arg0: i32, %arg1: i32) -> (i32, i32) {
    %c0_i32 = arith.constant 0 : i32
    %c0_i32_0 = arith.constant 0 : i32
    return %arg0, %c0_i32 : i32, i32
  }
  func.func @transform_4(%arg0: i32, %arg1: i32) -> (i32, i32) {
    %c0_i32 = arith.constant 0 : i32
    %c0_i32_0 = arith.constant 0 : i32
    return %arg0, %c0_i32 : i32, i32
  }
}

module attributes {stable_mosaic.version = 11 : i64} {
  func.func @_halfmax_kernel(%arg0: i32, %arg1: memref<16x512xf32, #tpu.memory_space<vmem>>, %arg2: memref<16x256xf32, #tpu.memory_space<vmem>>) attributes {dimension_semantics = [#tpu.dimension_semantics<parallel>], iteration_bounds = array<i64: 1>, scalar_prefetch = 0 : i64, scratch_operands = 0 : i64, tpu.core_type = #tpu.core_type<tc>, window_params = [{transform_indices = @transform_0, window_bounds = array<i64: 16, 512>}, {transform_indices = @transform_1, window_bounds = array<i64: 16, 256>}]} {
    %c0 = arith.constant 0 : index
    %c0_0 = arith.constant 0 : index
    %0 = vector.load %arg1[%c0, %c0_0] : memref<16x512xf32, #tpu.memory_space<vmem>>, vector<16x512xf32>
    %1 = vector.extract_strided_slice %0 {offsets = [0, 0], sizes = [16, 256], strides = [1, 1]} : vector<16x512xf32> to vector<16x256xf32>
    %2 = vector.extract_strided_slice %0 {offsets = [0, 256], sizes = [16, 256], strides = [1, 1]} : vector<16x512xf32> to vector<16x256xf32>
    %3 = arith.maximumf %1, %2 : vector<16x256xf32>
    %c0_1 = arith.constant 0 : index
    %c0_2 = arith.constant 0 : index
    %4 = vector.load %arg2[%c0_1, %c0_2] : memref<16x256xf32, #tpu.memory_space<vmem>>, vector<16x256xf32>
    tpu.vector_store %arg2[%c0_1, %c0_2], %3 {strides = array<i32>} : memref<16x256xf32, #tpu.memory_space<vmem>>, vector<16x256xf32>,
    return
  }
  func.func @transform_0(%arg0: i32) -> (i32, i32) {
    %c0_i32 = arith.constant 0 : i32
    %c0_i32_0 = arith.constant 0 : i32
    return %arg0, %c0_i32 : i32, i32
  }
  func.func @transform_1(%arg0: i32) -> (i32, i32) {
    %c0_i32 = arith.constant 0 : i32
    %c0_i32_0 = arith.constant 0 : i32
    return %arg0, %c0_i32 : i32, i32
  }
}

module attributes {stable_mosaic.version = 11 : i64} {
  func.func @_affine_leaky_res_kernel(%arg0: i32, %arg1: memref<16x128xf32, #tpu.memory_space<vmem>>, %arg2: memref<1x128xf32, #tpu.memory_space<vmem>>, %arg3: memref<1x128xf32, #tpu.memory_space<vmem>>, %arg4: memref<16x128xf32, #tpu.memory_space<vmem>>, %arg5: memref<16x128xf32, #tpu.memory_space<vmem>>) attributes {dimension_semantics = [#tpu.dimension_semantics<parallel>], iteration_bounds = array<i64: 1>, scalar_prefetch = 0 : i64, scratch_operands = 0 : i64, tpu.core_type = #tpu.core_type<tc>, window_params = [{transform_indices = @transform_0, window_bounds = array<i64: 16, 128>}, {pipeline_mode = #tpu.pipeline_mode<synchronous>, transform_indices = @transform_1, window_bounds = array<i64: 1, 128>}, {pipeline_mode = #tpu.pipeline_mode<synchronous>, transform_indices = @transform_2, window_bounds = array<i64: 1, 128>}, {transform_indices = @transform_3, window_bounds = array<i64: 16, 128>}, {transform_indices = @transform_4, window_bounds = array<i64: 16, 128>}]} {
    %c0 = arith.constant 0 : index
    %c0_0 = arith.constant 0 : index
    %0 = vector.load %arg1[%c0, %c0_0] : memref<16x128xf32, #tpu.memory_space<vmem>>, vector<16x128xf32>
    %c0_1 = arith.constant 0 : index
    %c0_2 = arith.constant 0 : index
    %1 = vector.load %arg2[%c0_1, %c0_2] : memref<1x128xf32, #tpu.memory_space<vmem>>, vector<1x128xf32>
    %2 = vector.broadcast %1 : vector<1x128xf32> to vector<16x128xf32>
    %3 = arith.mulf %0, %2 : vector<16x128xf32>
    %c0_3 = arith.constant 0 : index
    %c0_4 = arith.constant 0 : index
    %4 = vector.load %arg3[%c0_3, %c0_4] : memref<1x128xf32, #tpu.memory_space<vmem>>, vector<1x128xf32>
    %5 = vector.broadcast %4 : vector<1x128xf32> to vector<16x128xf32>
    %6 = arith.addf %3, %5 : vector<16x128xf32>
    %c0_5 = arith.constant 0 : index
    %c0_6 = arith.constant 0 : index
    %7 = vector.load %arg4[%c0_5, %c0_6] : memref<16x128xf32, #tpu.memory_space<vmem>>, vector<16x128xf32>
    %8 = arith.addf %6, %7 : vector<16x128xf32>
    %cst = arith.constant 0.000000e+00 : f32
    %9 = vector.broadcast %cst : f32 to vector<16x128xf32>
    %10 = arith.cmpf oge, %8, %9 : vector<16x128xf32>
    %cst_7 = arith.constant 1.000000e-01 : f32
    %11 = vector.broadcast %cst_7 : f32 to vector<16x128xf32>
    %12 = arith.mulf %11, %8 : vector<16x128xf32>
    %13 = arith.select %10, %8, %12 : vector<16x128xi1>, vector<16x128xf32>
    %c0_8 = arith.constant 0 : index
    %c0_9 = arith.constant 0 : index
    %14 = vector.load %arg5[%c0_8, %c0_9] : memref<16x128xf32, #tpu.memory_space<vmem>>, vector<16x128xf32>
    tpu.vector_store %arg5[%c0_8, %c0_9], %13 {strides = array<i32>} : memref<16x128xf32, #tpu.memory_space<vmem>>, vector<16x128xf32>,
    return
  }
  func.func @transform_0(%arg0: i32) -> (i32, i32) {
    %c0_i32 = arith.constant 0 : i32
    %c0_i32_0 = arith.constant 0 : i32
    return %arg0, %c0_i32 : i32, i32
  }
  func.func @transform_1(%arg0: i32) -> (i32, i32) {
    %c0_i32 = arith.constant 0 : i32
    %c0_i32_0 = arith.constant 0 : i32
    %c0_i32_1 = arith.constant 0 : i32
    return %c0_i32, %c0_i32_0 : i32, i32
  }
  func.func @transform_2(%arg0: i32) -> (i32, i32) {
    %c0_i32 = arith.constant 0 : i32
    %c0_i32_0 = arith.constant 0 : i32
    %c0_i32_1 = arith.constant 0 : i32
    return %c0_i32, %c0_i32_0 : i32, i32
  }
  func.func @transform_3(%arg0: i32) -> (i32, i32) {
    %c0_i32 = arith.constant 0 : i32
    %c0_i32_0 = arith.constant 0 : i32
    return %arg0, %c0_i32 : i32, i32
  }
  func.func @transform_4(%arg0: i32) -> (i32, i32) {
    %c0_i32 = arith.constant 0 : i32
    %c0_i32_0 = arith.constant 0 : i32
    return %arg0, %c0_i32 : i32, i32
  }
}

module attributes {stable_mosaic.version = 11 : i64} {
  func.func @_halfmax_kernel(%arg0: i32, %arg1: memref<128x32xf32, #tpu.memory_space<vmem>>, %arg2: memref<128x16xf32, #tpu.memory_space<vmem>>) attributes {dimension_semantics = [#tpu.dimension_semantics<parallel>], iteration_bounds = array<i64: 1>, scalar_prefetch = 0 : i64, scratch_operands = 0 : i64, tpu.core_type = #tpu.core_type<tc>, window_params = [{transform_indices = @transform_0, window_bounds = array<i64: 128, 32>}, {transform_indices = @transform_1, window_bounds = array<i64: 128, 16>}]} {
    %c0 = arith.constant 0 : index
    %c0_0 = arith.constant 0 : index
    %0 = vector.load %arg1[%c0, %c0_0] : memref<128x32xf32, #tpu.memory_space<vmem>>, vector<128x32xf32>
    %1 = vector.extract_strided_slice %0 {offsets = [0, 0], sizes = [128, 16], strides = [1, 1]} : vector<128x32xf32> to vector<128x16xf32>
    %2 = vector.extract_strided_slice %0 {offsets = [0, 16], sizes = [128, 16], strides = [1, 1]} : vector<128x32xf32> to vector<128x16xf32>
    %3 = arith.maximumf %1, %2 : vector<128x16xf32>
    %c0_1 = arith.constant 0 : index
    %c0_2 = arith.constant 0 : index
    %4 = vector.load %arg2[%c0_1, %c0_2] : memref<128x16xf32, #tpu.memory_space<vmem>>, vector<128x16xf32>
    tpu.vector_store %arg2[%c0_1, %c0_2], %3 {strides = array<i32>} : memref<128x16xf32, #tpu.memory_space<vmem>>, vector<128x16xf32>,
    return
  }
  func.func @transform_0(%arg0: i32) -> (i32, i32) {
    %c0_i32 = arith.constant 0 : i32
    %c0_i32_0 = arith.constant 0 : i32
    return %arg0, %c0_i32 : i32, i32
  }
  func.func @transform_1(%arg0: i32) -> (i32, i32) {
    %c0_i32 = arith.constant 0 : i32
    %c0_i32_0 = arith.constant 0 : i32
    return %arg0, %c0_i32 : i32, i32
  }
}

module attributes {stable_mosaic.version = 11 : i64} {
  func.func @_affine_leaky_kernel(%arg0: i32, %arg1: memref<8x128xf32, #tpu.memory_space<vmem>>, %arg2: memref<1x128xf32, #tpu.memory_space<vmem>>, %arg3: memref<1x128xf32, #tpu.memory_space<vmem>>, %arg4: memref<8x128xf32, #tpu.memory_space<vmem>>) attributes {dimension_semantics = [#tpu.dimension_semantics<parallel>], iteration_bounds = array<i64: 1>, scalar_prefetch = 0 : i64, scratch_operands = 0 : i64, tpu.core_type = #tpu.core_type<tc>, window_params = [{transform_indices = @transform_0, window_bounds = array<i64: 8, 128>}, {pipeline_mode = #tpu.pipeline_mode<synchronous>, transform_indices = @transform_1, window_bounds = array<i64: 1, 128>}, {pipeline_mode = #tpu.pipeline_mode<synchronous>, transform_indices = @transform_2, window_bounds = array<i64: 1, 128>}, {transform_indices = @transform_3, window_bounds = array<i64: 8, 128>}]} {
    %c0 = arith.constant 0 : index
    %c0_0 = arith.constant 0 : index
    %0 = vector.load %arg1[%c0, %c0_0] : memref<8x128xf32, #tpu.memory_space<vmem>>, vector<8x128xf32>
    %c0_1 = arith.constant 0 : index
    %c0_2 = arith.constant 0 : index
    %1 = vector.load %arg2[%c0_1, %c0_2] : memref<1x128xf32, #tpu.memory_space<vmem>>, vector<1x128xf32>
    %2 = vector.broadcast %1 : vector<1x128xf32> to vector<8x128xf32>
    %3 = arith.mulf %0, %2 : vector<8x128xf32>
    %c0_3 = arith.constant 0 : index
    %c0_4 = arith.constant 0 : index
    %4 = vector.load %arg3[%c0_3, %c0_4] : memref<1x128xf32, #tpu.memory_space<vmem>>, vector<1x128xf32>
    %5 = vector.broadcast %4 : vector<1x128xf32> to vector<8x128xf32>
    %6 = arith.addf %3, %5 : vector<8x128xf32>
    %cst = arith.constant 0.000000e+00 : f32
    %7 = vector.broadcast %cst : f32 to vector<8x128xf32>
    %8 = arith.cmpf oge, %6, %7 : vector<8x128xf32>
    %cst_5 = arith.constant 1.000000e-01 : f32
    %9 = vector.broadcast %cst_5 : f32 to vector<8x128xf32>
    %10 = arith.mulf %9, %6 : vector<8x128xf32>
    %11 = arith.select %8, %6, %10 : vector<8x128xi1>, vector<8x128xf32>
    %c0_6 = arith.constant 0 : index
    %c0_7 = arith.constant 0 : index
    %12 = vector.load %arg4[%c0_6, %c0_7] : memref<8x128xf32, #tpu.memory_space<vmem>>, vector<8x128xf32>
    tpu.vector_store %arg4[%c0_6, %c0_7], %11 {strides = array<i32>} : memref<8x128xf32, #tpu.memory_space<vmem>>, vector<8x128xf32>,
    return
  }
  func.func @transform_0(%arg0: i32) -> (i32, i32) {
    %c0_i32 = arith.constant 0 : i32
    %c0_i32_0 = arith.constant 0 : i32
    return %arg0, %c0_i32 : i32, i32
  }
  func.func @transform_1(%arg0: i32) -> (i32, i32) {
    %c0_i32 = arith.constant 0 : i32
    %c0_i32_0 = arith.constant 0 : i32
    %c0_i32_1 = arith.constant 0 : i32
    return %c0_i32, %c0_i32_0 : i32, i32
  }
  func.func @transform_2(%arg0: i32) -> (i32, i32) {
    %c0_i32 = arith.constant 0 : i32
    %c0_i32_0 = arith.constant 0 : i32
    %c0_i32_1 = arith.constant 0 : i32
    return %c0_i32, %c0_i32_0 : i32, i32
  }
  func.func @transform_3(%arg0: i32) -> (i32, i32) {
    %c0_i32 = arith.constant 0 : i32
    %c0_i32_0 = arith.constant 0 : i32
    return %arg0, %c0_i32 : i32, i32
  }
}

module attributes {stable_mosaic.version = 11 : i64} {
  func.func @_conv_mm_kernel(%arg0: i32, %arg1: i32, %arg2: memref<32x256xbf16, #tpu.memory_space<vmem>>, %arg3: memref<256x128xbf16, #tpu.memory_space<vmem>>, %arg4: memref<1x128xf32, #tpu.memory_space<vmem>>, %arg5: memref<32x128xf32, #tpu.memory_space<vmem>>, %arg6: memref<8x128xf32, #tpu.memory_space<vmem>>, %arg7: memref<32x128xf32, #tpu.memory_space<vmem>>) attributes {dimension_semantics = [#tpu.dimension_semantics<parallel>, #tpu.dimension_semantics<arbitrary>], iteration_bounds = array<i64: 1, 1>, scalar_prefetch = 0 : i64, scratch_operands = 1 : i64, tpu.core_type = #tpu.core_type<tc>, window_params = [{transform_indices = @transform_0, window_bounds = array<i64: 32, 256>}, {transform_indices = @transform_1, window_bounds = array<i64: 256, 128>}, {pipeline_mode = #tpu.pipeline_mode<synchronous>, transform_indices = @transform_2, window_bounds = array<i64: 1, 128>}, {transform_indices = @transform_3, window_bounds = array<i64: 32, 128>}, {transform_indices = @transform_4, window_bounds = array<i64: 8, 128>}]} {
    %c0_i32 = arith.constant 0 : i32
    %0 = arith.cmpi eq, %arg1, %c0_i32 : i32
    %1 = arith.extui %0 : i1 to i32
    %c0_i32_0 = arith.constant 0 : i32
    %2 = arith.cmpi ne, %1, %c0_i32_0 : i32
    scf.if %2 {
      %cst_10 = arith.constant 0.000000e+00 : f32
      %12 = vector.broadcast %cst_10 : f32 to vector<32x128xf32>
      %c0_11 = arith.constant 0 : index
      %c0_12 = arith.constant 0 : index
      %13 = vector.load %arg7[%c0_11, %c0_12] : memref<32x128xf32, #tpu.memory_space<vmem>>, vector<32x128xf32>
      tpu.vector_store %arg7[%c0_11, %c0_12], %12 {strides = array<i32>} : memref<32x128xf32, #tpu.memory_space<vmem>>, vector<32x128xf32>,
    } else {
    }
    %c0 = arith.constant 0 : index
    %c0_1 = arith.constant 0 : index
    %3 = vector.load %arg7[%c0, %c0_1] : memref<32x128xf32, #tpu.memory_space<vmem>>, vector<32x128xf32>
    %c0_2 = arith.constant 0 : index
    %c0_3 = arith.constant 0 : index
    %4 = vector.load %arg2[%c0_2, %c0_3] : memref<32x256xbf16, #tpu.memory_space<vmem>>, vector<32x256xbf16>
    %c0_4 = arith.constant 0 : index
    %c0_5 = arith.constant 0 : index
    %5 = vector.load %arg3[%c0_4, %c0_5] : memref<256x128xbf16, #tpu.memory_space<vmem>>, vector<256x128xbf16>
    %cst = arith.constant dense<0.000000e+00> : vector<32x128xf32>
    %6 = tpu.matmul %4, %5, %cst {dimension_numbers = #tpu.dot_dimension_numbers<[1], [0], [0], [1], [0, 0, 1, 1], [], []>} : vector<32x256xbf16>, vector<256x128xbf16>, vector<32x128xf32> -> vector<32x128xf32>
    %7 = arith.addf %3, %6 : vector<32x128xf32>
    %c0_6 = arith.constant 0 : index
    %c0_7 = arith.constant 0 : index
    %8 = vector.load %arg7[%c0_6, %c0_7] : memref<32x128xf32, #tpu.memory_space<vmem>>, vector<32x128xf32>
    tpu.vector_store %arg7[%c0_6, %c0_7], %7 {strides = array<i32>} : memref<32x128xf32, #tpu.memory_space<vmem>>, vector<32x128xf32>,
    %c0_i32_8 = arith.constant 0 : i32
    %9 = arith.cmpi eq, %arg1, %c0_i32_8 : i32
    %10 = arith.extui %9 : i1 to i32
    %c0_i32_9 = arith.constant 0 : i32
    %11 = arith.cmpi ne, %10, %c0_i32_9 : i32
    scf.if %11 {
      %c0_10 = arith.constant 0 : index
      %c0_11 = arith.constant 0 : index
      %12 = vector.load %arg7[%c0_10, %c0_11] : memref<32x128xf32, #tpu.memory_space<vmem>>, vector<32x128xf32>
      %c0_12 = arith.constant 0 : index
      %c0_13 = arith.constant 0 : index
      %13 = vector.load %arg4[%c0_12, %c0_13] : memref<1x128xf32, #tpu.memory_space<vmem>>, vector<1x128xf32>
      %14 = vector.broadcast %13 : vector<1x128xf32> to vector<32x128xf32>
      %15 = arith.addf %12, %14 : vector<32x128xf32>
      %c0_14 = arith.constant 0 : index
      %c0_15 = arith.constant 0 : index
      %16 = vector.load %arg5[%c0_14, %c0_15] : memref<32x128xf32, #tpu.memory_space<vmem>>, vector<32x128xf32>
      tpu.vector_store %arg5[%c0_14, %c0_15], %15 {strides = array<i32>} : memref<32x128xf32, #tpu.memory_space<vmem>>, vector<32x128xf32>,
      %cst_16 = arith.constant dense<0.000000e+00> : vector<128xf32>
      %17 = vector.multi_reduction <add>, %15, %cst_16 [0] : vector<32x128xf32> to vector<128xf32>
      %18 = vector.shape_cast %17 : vector<128xf32> to vector<1x128xf32>
      %c0_17 = arith.constant 0 : index
      %c0_18 = arith.constant 0 : index
      %19 = vector.load %arg6[%c0_17, %c0_18] : memref<8x128xf32, #tpu.memory_space<vmem>>, vector<1x128xf32>
      tpu.vector_store %arg6[%c0_17, %c0_18], %18 {strides = array<i32>} : memref<8x128xf32, #tpu.memory_space<vmem>>, vector<1x128xf32>,
      %20 = arith.mulf %15, %15 : vector<32x128xf32>
      %cst_19 = arith.constant dense<0.000000e+00> : vector<128xf32>
      %21 = vector.multi_reduction <add>, %20, %cst_19 [0] : vector<32x128xf32> to vector<128xf32>
      %22 = vector.shape_cast %21 : vector<128xf32> to vector<1x128xf32>
      %c1 = arith.constant 1 : index
      %c0_20 = arith.constant 0 : index
      %23 = vector.load %arg6[%c1, %c0_20] : memref<8x128xf32, #tpu.memory_space<vmem>>, vector<1x128xf32>
      tpu.vector_store %arg6[%c1, %c0_20], %22 {strides = array<i32>} : memref<8x128xf32, #tpu.memory_space<vmem>>, vector<1x128xf32>,
    } else {
    }
    return
  }
  func.func @transform_0(%arg0: i32, %arg1: i32) -> (i32, i32) {
    %c0_i32 = arith.constant 0 : i32
    return %arg0, %arg1 : i32, i32
  }
  func.func @transform_1(%arg0: i32, %arg1: i32) -> (i32, i32) {
    %c0_i32 = arith.constant 0 : i32
    %c0_i32_0 = arith.constant 0 : i32
    return %arg1, %c0_i32 : i32, i32
  }
  func.func @transform_2(%arg0: i32, %arg1: i32) -> (i32, i32) {
    %c0_i32 = arith.constant 0 : i32
    %c0_i32_0 = arith.constant 0 : i32
    %c0_i32_1 = arith.constant 0 : i32
    return %c0_i32, %c0_i32_0 : i32, i32
  }
  func.func @transform_3(%arg0: i32, %arg1: i32) -> (i32, i32) {
    %c0_i32 = arith.constant 0 : i32
    %c0_i32_0 = arith.constant 0 : i32
    return %arg0, %c0_i32 : i32, i32
  }
  func.func @transform_4(%arg0: i32, %arg1: i32) -> (i32, i32) {
    %c0_i32 = arith.constant 0 : i32
    %c0_i32_0 = arith.constant 0 : i32
    return %arg0, %c0_i32 : i32, i32
  }
}

module attributes {stable_mosaic.version = 11 : i64} {
  func.func @_conv_mm_kernel(%arg0: i32, %arg1: i32, %arg2: memref<32x384xbf16, #tpu.memory_space<vmem>>, %arg3: memref<384x128xbf16, #tpu.memory_space<vmem>>, %arg4: memref<1x128xf32, #tpu.memory_space<vmem>>, %arg5: memref<32x128xf32, #tpu.memory_space<vmem>>, %arg6: memref<8x128xf32, #tpu.memory_space<vmem>>, %arg7: memref<32x128xf32, #tpu.memory_space<vmem>>) attributes {dimension_semantics = [#tpu.dimension_semantics<parallel>, #tpu.dimension_semantics<arbitrary>], iteration_bounds = array<i64: 1, 1>, scalar_prefetch = 0 : i64, scratch_operands = 1 : i64, tpu.core_type = #tpu.core_type<tc>, window_params = [{transform_indices = @transform_0, window_bounds = array<i64: 32, 384>}, {transform_indices = @transform_1, window_bounds = array<i64: 384, 128>}, {pipeline_mode = #tpu.pipeline_mode<synchronous>, transform_indices = @transform_2, window_bounds = array<i64: 1, 128>}, {transform_indices = @transform_3, window_bounds = array<i64: 32, 128>}, {transform_indices = @transform_4, window_bounds = array<i64: 8, 128>}]} {
    %c0_i32 = arith.constant 0 : i32
    %0 = arith.cmpi eq, %arg1, %c0_i32 : i32
    %1 = arith.extui %0 : i1 to i32
    %c0_i32_0 = arith.constant 0 : i32
    %2 = arith.cmpi ne, %1, %c0_i32_0 : i32
    scf.if %2 {
      %cst_10 = arith.constant 0.000000e+00 : f32
      %12 = vector.broadcast %cst_10 : f32 to vector<32x128xf32>
      %c0_11 = arith.constant 0 : index
      %c0_12 = arith.constant 0 : index
      %13 = vector.load %arg7[%c0_11, %c0_12] : memref<32x128xf32, #tpu.memory_space<vmem>>, vector<32x128xf32>
      tpu.vector_store %arg7[%c0_11, %c0_12], %12 {strides = array<i32>} : memref<32x128xf32, #tpu.memory_space<vmem>>, vector<32x128xf32>,
    } else {
    }
    %c0 = arith.constant 0 : index
    %c0_1 = arith.constant 0 : index
    %3 = vector.load %arg7[%c0, %c0_1] : memref<32x128xf32, #tpu.memory_space<vmem>>, vector<32x128xf32>
    %c0_2 = arith.constant 0 : index
    %c0_3 = arith.constant 0 : index
    %4 = vector.load %arg2[%c0_2, %c0_3] : memref<32x384xbf16, #tpu.memory_space<vmem>>, vector<32x384xbf16>
    %c0_4 = arith.constant 0 : index
    %c0_5 = arith.constant 0 : index
    %5 = vector.load %arg3[%c0_4, %c0_5] : memref<384x128xbf16, #tpu.memory_space<vmem>>, vector<384x128xbf16>
    %cst = arith.constant dense<0.000000e+00> : vector<32x128xf32>
    %6 = tpu.matmul %4, %5, %cst {dimension_numbers = #tpu.dot_dimension_numbers<[1], [0], [0], [1], [0, 0, 1, 1], [], []>} : vector<32x384xbf16>, vector<384x128xbf16>, vector<32x128xf32> -> vector<32x128xf32>
    %7 = arith.addf %3, %6 : vector<32x128xf32>
    %c0_6 = arith.constant 0 : index
    %c0_7 = arith.constant 0 : index
    %8 = vector.load %arg7[%c0_6, %c0_7] : memref<32x128xf32, #tpu.memory_space<vmem>>, vector<32x128xf32>
    tpu.vector_store %arg7[%c0_6, %c0_7], %7 {strides = array<i32>} : memref<32x128xf32, #tpu.memory_space<vmem>>, vector<32x128xf32>,
    %c0_i32_8 = arith.constant 0 : i32
    %9 = arith.cmpi eq, %arg1, %c0_i32_8 : i32
    %10 = arith.extui %9 : i1 to i32
    %c0_i32_9 = arith.constant 0 : i32
    %11 = arith.cmpi ne, %10, %c0_i32_9 : i32
    scf.if %11 {
      %c0_10 = arith.constant 0 : index
      %c0_11 = arith.constant 0 : index
      %12 = vector.load %arg7[%c0_10, %c0_11] : memref<32x128xf32, #tpu.memory_space<vmem>>, vector<32x128xf32>
      %c0_12 = arith.constant 0 : index
      %c0_13 = arith.constant 0 : index
      %13 = vector.load %arg4[%c0_12, %c0_13] : memref<1x128xf32, #tpu.memory_space<vmem>>, vector<1x128xf32>
      %14 = vector.broadcast %13 : vector<1x128xf32> to vector<32x128xf32>
      %15 = arith.addf %12, %14 : vector<32x128xf32>
      %c0_14 = arith.constant 0 : index
      %c0_15 = arith.constant 0 : index
      %16 = vector.load %arg5[%c0_14, %c0_15] : memref<32x128xf32, #tpu.memory_space<vmem>>, vector<32x128xf32>
      tpu.vector_store %arg5[%c0_14, %c0_15], %15 {strides = array<i32>} : memref<32x128xf32, #tpu.memory_space<vmem>>, vector<32x128xf32>,
      %cst_16 = arith.constant dense<0.000000e+00> : vector<128xf32>
      %17 = vector.multi_reduction <add>, %15, %cst_16 [0] : vector<32x128xf32> to vector<128xf32>
      %18 = vector.shape_cast %17 : vector<128xf32> to vector<1x128xf32>
      %c0_17 = arith.constant 0 : index
      %c0_18 = arith.constant 0 : index
      %19 = vector.load %arg6[%c0_17, %c0_18] : memref<8x128xf32, #tpu.memory_space<vmem>>, vector<1x128xf32>
      tpu.vector_store %arg6[%c0_17, %c0_18], %18 {strides = array<i32>} : memref<8x128xf32, #tpu.memory_space<vmem>>, vector<1x128xf32>,
      %20 = arith.mulf %15, %15 : vector<32x128xf32>
      %cst_19 = arith.constant dense<0.000000e+00> : vector<128xf32>
      %21 = vector.multi_reduction <add>, %20, %cst_19 [0] : vector<32x128xf32> to vector<128xf32>
      %22 = vector.shape_cast %21 : vector<128xf32> to vector<1x128xf32>
      %c1 = arith.constant 1 : index
      %c0_20 = arith.constant 0 : index
      %23 = vector.load %arg6[%c1, %c0_20] : memref<8x128xf32, #tpu.memory_space<vmem>>, vector<1x128xf32>
      tpu.vector_store %arg6[%c1, %c0_20], %22 {strides = array<i32>} : memref<8x128xf32, #tpu.memory_space<vmem>>, vector<1x128xf32>,
    } else {
    }
    return
  }
  func.func @transform_0(%arg0: i32, %arg1: i32) -> (i32, i32) {
    %c0_i32 = arith.constant 0 : i32
    return %arg0, %arg1 : i32, i32
  }
  func.func @transform_1(%arg0: i32, %arg1: i32) -> (i32, i32) {
    %c0_i32 = arith.constant 0 : i32
    %c0_i32_0 = arith.constant 0 : i32
    return %arg1, %c0_i32 : i32, i32
  }
  func.func @transform_2(%arg0: i32, %arg1: i32) -> (i32, i32) {
    %c0_i32 = arith.constant 0 : i32
    %c0_i32_0 = arith.constant 0 : i32
    %c0_i32_1 = arith.constant 0 : i32
    return %c0_i32, %c0_i32_0 : i32, i32
  }
  func.func @transform_3(%arg0: i32, %arg1: i32) -> (i32, i32) {
    %c0_i32 = arith.constant 0 : i32
    %c0_i32_0 = arith.constant 0 : i32
    return %arg0, %c0_i32 : i32, i32
  }
  func.func @transform_4(%arg0: i32, %arg1: i32) -> (i32, i32) {
    %c0_i32 = arith.constant 0 : i32
    %c0_i32_0 = arith.constant 0 : i32
    return %arg0, %c0_i32 : i32, i32
  }
}

module attributes {stable_mosaic.version = 11 : i64} {
  func.func @_halfmax_kernel(%arg0: i32, %arg1: memref<8x512xf32, #tpu.memory_space<vmem>>, %arg2: memref<8x256xf32, #tpu.memory_space<vmem>>) attributes {dimension_semantics = [#tpu.dimension_semantics<parallel>], iteration_bounds = array<i64: 1>, scalar_prefetch = 0 : i64, scratch_operands = 0 : i64, tpu.core_type = #tpu.core_type<tc>, window_params = [{transform_indices = @transform_0, window_bounds = array<i64: 8, 512>}, {transform_indices = @transform_1, window_bounds = array<i64: 8, 256>}]} {
    %c0 = arith.constant 0 : index
    %c0_0 = arith.constant 0 : index
    %0 = vector.load %arg1[%c0, %c0_0] : memref<8x512xf32, #tpu.memory_space<vmem>>, vector<8x512xf32>
    %1 = vector.extract_strided_slice %0 {offsets = [0, 0], sizes = [8, 256], strides = [1, 1]} : vector<8x512xf32> to vector<8x256xf32>
    %2 = vector.extract_strided_slice %0 {offsets = [0, 256], sizes = [8, 256], strides = [1, 1]} : vector<8x512xf32> to vector<8x256xf32>
    %3 = arith.maximumf %1, %2 : vector<8x256xf32>
    %c0_1 = arith.constant 0 : index
    %c0_2 = arith.constant 0 : index
    %4 = vector.load %arg2[%c0_1, %c0_2] : memref<8x256xf32, #tpu.memory_space<vmem>>, vector<8x256xf32>
    tpu.vector_store %arg2[%c0_1, %c0_2], %3 {strides = array<i32>} : memref<8x256xf32, #tpu.memory_space<vmem>>, vector<8x256xf32>,
    return
  }
  func.func @transform_0(%arg0: i32) -> (i32, i32) {
    %c0_i32 = arith.constant 0 : i32
    %c0_i32_0 = arith.constant 0 : i32
    return %arg0, %c0_i32 : i32, i32
  }
  func.func @transform_1(%arg0: i32) -> (i32, i32) {
    %c0_i32 = arith.constant 0 : i32
    %c0_i32_0 = arith.constant 0 : i32
    return %arg0, %c0_i32 : i32, i32
  }
}

module attributes {stable_mosaic.version = 11 : i64} {
  func.func @_conv_mm_kernel(%arg0: i32, %arg1: i32, %arg2: memref<128x128xbf16, #tpu.memory_space<vmem>>, %arg3: memref<128x128xbf16, #tpu.memory_space<vmem>>, %arg4: memref<1x128xf32, #tpu.memory_space<vmem>>, %arg5: memref<128x128xf32, #tpu.memory_space<vmem>>, %arg6: memref<8x128xf32, #tpu.memory_space<vmem>>, %arg7: memref<128x128xf32, #tpu.memory_space<vmem>>) attributes {dimension_semantics = [#tpu.dimension_semantics<parallel>, #tpu.dimension_semantics<arbitrary>], iteration_bounds = array<i64: 1, 1>, scalar_prefetch = 0 : i64, scratch_operands = 1 : i64, tpu.core_type = #tpu.core_type<tc>, window_params = [{transform_indices = @transform_0, window_bounds = array<i64: 128, 128>}, {transform_indices = @transform_1, window_bounds = array<i64: 128, 128>}, {pipeline_mode = #tpu.pipeline_mode<synchronous>, transform_indices = @transform_2, window_bounds = array<i64: 1, 128>}, {transform_indices = @transform_3, window_bounds = array<i64: 128, 128>}, {transform_indices = @transform_4, window_bounds = array<i64: 8, 128>}]} {
    %c0_i32 = arith.constant 0 : i32
    %0 = arith.cmpi eq, %arg1, %c0_i32 : i32
    %1 = arith.extui %0 : i1 to i32
    %c0_i32_0 = arith.constant 0 : i32
    %2 = arith.cmpi ne, %1, %c0_i32_0 : i32
    scf.if %2 {
      %cst_10 = arith.constant 0.000000e+00 : f32
      %12 = vector.broadcast %cst_10 : f32 to vector<128x128xf32>
      %c0_11 = arith.constant 0 : index
      %c0_12 = arith.constant 0 : index
      %13 = vector.load %arg7[%c0_11, %c0_12] : memref<128x128xf32, #tpu.memory_space<vmem>>, vector<128x128xf32>
      tpu.vector_store %arg7[%c0_11, %c0_12], %12 {strides = array<i32>} : memref<128x128xf32, #tpu.memory_space<vmem>>, vector<128x128xf32>,
    } else {
    }
    %c0 = arith.constant 0 : index
    %c0_1 = arith.constant 0 : index
    %3 = vector.load %arg7[%c0, %c0_1] : memref<128x128xf32, #tpu.memory_space<vmem>>, vector<128x128xf32>
    %c0_2 = arith.constant 0 : index
    %c0_3 = arith.constant 0 : index
    %4 = vector.load %arg2[%c0_2, %c0_3] : memref<128x128xbf16, #tpu.memory_space<vmem>>, vector<128x128xbf16>
    %c0_4 = arith.constant 0 : index
    %c0_5 = arith.constant 0 : index
    %5 = vector.load %arg3[%c0_4, %c0_5] : memref<128x128xbf16, #tpu.memory_space<vmem>>, vector<128x128xbf16>
    %cst = arith.constant dense<0.000000e+00> : vector<128x128xf32>
    %6 = tpu.matmul %4, %5, %cst {dimension_numbers = #tpu.dot_dimension_numbers<[1], [0], [0], [1], [0, 0, 1, 1], [], []>} : vector<128x128xbf16>, vector<128x128xbf16>, vector<128x128xf32> -> vector<128x128xf32>
    %7 = arith.addf %3, %6 : vector<128x128xf32>
    %c0_6 = arith.constant 0 : index
    %c0_7 = arith.constant 0 : index
    %8 = vector.load %arg7[%c0_6, %c0_7] : memref<128x128xf32, #tpu.memory_space<vmem>>, vector<128x128xf32>
    tpu.vector_store %arg7[%c0_6, %c0_7], %7 {strides = array<i32>} : memref<128x128xf32, #tpu.memory_space<vmem>>, vector<128x128xf32>,
    %c0_i32_8 = arith.constant 0 : i32
    %9 = arith.cmpi eq, %arg1, %c0_i32_8 : i32
    %10 = arith.extui %9 : i1 to i32
    %c0_i32_9 = arith.constant 0 : i32
    %11 = arith.cmpi ne, %10, %c0_i32_9 : i32
    scf.if %11 {
      %c0_10 = arith.constant 0 : index
      %c0_11 = arith.constant 0 : index
      %12 = vector.load %arg7[%c0_10, %c0_11] : memref<128x128xf32, #tpu.memory_space<vmem>>, vector<128x128xf32>
      %c0_12 = arith.constant 0 : index
      %c0_13 = arith.constant 0 : index
      %13 = vector.load %arg4[%c0_12, %c0_13] : memref<1x128xf32, #tpu.memory_space<vmem>>, vector<1x128xf32>
      %14 = vector.broadcast %13 : vector<1x128xf32> to vector<128x128xf32>
      %15 = arith.addf %12, %14 : vector<128x128xf32>
      %c0_14 = arith.constant 0 : index
      %c0_15 = arith.constant 0 : index
      %16 = vector.load %arg5[%c0_14, %c0_15] : memref<128x128xf32, #tpu.memory_space<vmem>>, vector<128x128xf32>
      tpu.vector_store %arg5[%c0_14, %c0_15], %15 {strides = array<i32>} : memref<128x128xf32, #tpu.memory_space<vmem>>, vector<128x128xf32>,
      %cst_16 = arith.constant dense<0.000000e+00> : vector<128xf32>
      %17 = vector.multi_reduction <add>, %15, %cst_16 [0] : vector<128x128xf32> to vector<128xf32>
      %18 = vector.shape_cast %17 : vector<128xf32> to vector<1x128xf32>
      %c0_17 = arith.constant 0 : index
      %c0_18 = arith.constant 0 : index
      %19 = vector.load %arg6[%c0_17, %c0_18] : memref<8x128xf32, #tpu.memory_space<vmem>>, vector<1x128xf32>
      tpu.vector_store %arg6[%c0_17, %c0_18], %18 {strides = array<i32>} : memref<8x128xf32, #tpu.memory_space<vmem>>, vector<1x128xf32>,
      %20 = arith.mulf %15, %15 : vector<128x128xf32>
      %cst_19 = arith.constant dense<0.000000e+00> : vector<128xf32>
      %21 = vector.multi_reduction <add>, %20, %cst_19 [0] : vector<128x128xf32> to vector<128xf32>
      %22 = vector.shape_cast %21 : vector<128xf32> to vector<1x128xf32>
      %c1 = arith.constant 1 : index
      %c0_20 = arith.constant 0 : index
      %23 = vector.load %arg6[%c1, %c0_20] : memref<8x128xf32, #tpu.memory_space<vmem>>, vector<1x128xf32>
      tpu.vector_store %arg6[%c1, %c0_20], %22 {strides = array<i32>} : memref<8x128xf32, #tpu.memory_space<vmem>>, vector<1x128xf32>,
    } else {
    }
    return
  }
  func.func @transform_0(%arg0: i32, %arg1: i32) -> (i32, i32) {
    %c0_i32 = arith.constant 0 : i32
    return %arg0, %arg1 : i32, i32
  }
  func.func @transform_1(%arg0: i32, %arg1: i32) -> (i32, i32) {
    %c0_i32 = arith.constant 0 : i32
    %c0_i32_0 = arith.constant 0 : i32
    return %arg1, %c0_i32 : i32, i32
  }
  func.func @transform_2(%arg0: i32, %arg1: i32) -> (i32, i32) {
    %c0_i32 = arith.constant 0 : i32
    %c0_i32_0 = arith.constant 0 : i32
    %c0_i32_1 = arith.constant 0 : i32
    return %c0_i32, %c0_i32_0 : i32, i32
  }
  func.func @transform_3(%arg0: i32, %arg1: i32) -> (i32, i32) {
    %c0_i32 = arith.constant 0 : i32
    %c0_i32_0 = arith.constant 0 : i32
    return %arg0, %c0_i32 : i32, i32
  }
  func.func @transform_4(%arg0: i32, %arg1: i32) -> (i32, i32) {
    %c0_i32 = arith.constant 0 : i32
    %c0_i32_0 = arith.constant 0 : i32
    return %arg0, %c0_i32 : i32, i32
  }
}

module attributes {stable_mosaic.version = 11 : i64} {
  func.func @_halfmax_kernel(%arg0: i32, %arg1: memref<32x64xf32, #tpu.memory_space<vmem>>, %arg2: memref<32x32xf32, #tpu.memory_space<vmem>>) attributes {dimension_semantics = [#tpu.dimension_semantics<parallel>], iteration_bounds = array<i64: 1>, scalar_prefetch = 0 : i64, scratch_operands = 0 : i64, tpu.core_type = #tpu.core_type<tc>, window_params = [{transform_indices = @transform_0, window_bounds = array<i64: 32, 64>}, {transform_indices = @transform_1, window_bounds = array<i64: 32, 32>}]} {
    %c0 = arith.constant 0 : index
    %c0_0 = arith.constant 0 : index
    %0 = vector.load %arg1[%c0, %c0_0] : memref<32x64xf32, #tpu.memory_space<vmem>>, vector<32x64xf32>
    %1 = vector.extract_strided_slice %0 {offsets = [0, 0], sizes = [32, 32], strides = [1, 1]} : vector<32x64xf32> to vector<32x32xf32>
    %2 = vector.extract_strided_slice %0 {offsets = [0, 32], sizes = [32, 32], strides = [1, 1]} : vector<32x64xf32> to vector<32x32xf32>
    %3 = arith.maximumf %1, %2 : vector<32x32xf32>
    %c0_1 = arith.constant 0 : index
    %c0_2 = arith.constant 0 : index
    %4 = vector.load %arg2[%c0_1, %c0_2] : memref<32x32xf32, #tpu.memory_space<vmem>>, vector<32x32xf32>
    tpu.vector_store %arg2[%c0_1, %c0_2], %3 {strides = array<i32>} : memref<32x32xf32, #tpu.memory_space<vmem>>, vector<32x32xf32>,
    return
  }
  func.func @transform_0(%arg0: i32) -> (i32, i32) {
    %c0_i32 = arith.constant 0 : i32
    %c0_i32_0 = arith.constant 0 : i32
    return %arg0, %c0_i32 : i32, i32
  }
  func.func @transform_1(%arg0: i32) -> (i32, i32) {
    %c0_i32 = arith.constant 0 : i32
    %c0_i32_0 = arith.constant 0 : i32
    return %arg0, %c0_i32 : i32, i32
  }
}

module attributes {stable_mosaic.version = 11 : i64} {
  func.func @_affine_leaky_res_kernel(%arg0: i32, %arg1: memref<8x128xf32, #tpu.memory_space<vmem>>, %arg2: memref<1x128xf32, #tpu.memory_space<vmem>>, %arg3: memref<1x128xf32, #tpu.memory_space<vmem>>, %arg4: memref<8x128xf32, #tpu.memory_space<vmem>>, %arg5: memref<8x128xf32, #tpu.memory_space<vmem>>) attributes {dimension_semantics = [#tpu.dimension_semantics<parallel>], iteration_bounds = array<i64: 1>, scalar_prefetch = 0 : i64, scratch_operands = 0 : i64, tpu.core_type = #tpu.core_type<tc>, window_params = [{transform_indices = @transform_0, window_bounds = array<i64: 8, 128>}, {pipeline_mode = #tpu.pipeline_mode<synchronous>, transform_indices = @transform_1, window_bounds = array<i64: 1, 128>}, {pipeline_mode = #tpu.pipeline_mode<synchronous>, transform_indices = @transform_2, window_bounds = array<i64: 1, 128>}, {transform_indices = @transform_3, window_bounds = array<i64: 8, 128>}, {transform_indices = @transform_4, window_bounds = array<i64: 8, 128>}]} {
    %c0 = arith.constant 0 : index
    %c0_0 = arith.constant 0 : index
    %0 = vector.load %arg1[%c0, %c0_0] : memref<8x128xf32, #tpu.memory_space<vmem>>, vector<8x128xf32>
    %c0_1 = arith.constant 0 : index
    %c0_2 = arith.constant 0 : index
    %1 = vector.load %arg2[%c0_1, %c0_2] : memref<1x128xf32, #tpu.memory_space<vmem>>, vector<1x128xf32>
    %2 = vector.broadcast %1 : vector<1x128xf32> to vector<8x128xf32>
    %3 = arith.mulf %0, %2 : vector<8x128xf32>
    %c0_3 = arith.constant 0 : index
    %c0_4 = arith.constant 0 : index
    %4 = vector.load %arg3[%c0_3, %c0_4] : memref<1x128xf32, #tpu.memory_space<vmem>>, vector<1x128xf32>
    %5 = vector.broadcast %4 : vector<1x128xf32> to vector<8x128xf32>
    %6 = arith.addf %3, %5 : vector<8x128xf32>
    %c0_5 = arith.constant 0 : index
    %c0_6 = arith.constant 0 : index
    %7 = vector.load %arg4[%c0_5, %c0_6] : memref<8x128xf32, #tpu.memory_space<vmem>>, vector<8x128xf32>
    %8 = arith.addf %6, %7 : vector<8x128xf32>
    %cst = arith.constant 0.000000e+00 : f32
    %9 = vector.broadcast %cst : f32 to vector<8x128xf32>
    %10 = arith.cmpf oge, %8, %9 : vector<8x128xf32>
    %cst_7 = arith.constant 1.000000e-01 : f32
    %11 = vector.broadcast %cst_7 : f32 to vector<8x128xf32>
    %12 = arith.mulf %11, %8 : vector<8x128xf32>
    %13 = arith.select %10, %8, %12 : vector<8x128xi1>, vector<8x128xf32>
    %c0_8 = arith.constant 0 : index
    %c0_9 = arith.constant 0 : index
    %14 = vector.load %arg5[%c0_8, %c0_9] : memref<8x128xf32, #tpu.memory_space<vmem>>, vector<8x128xf32>
    tpu.vector_store %arg5[%c0_8, %c0_9], %13 {strides = array<i32>} : memref<8x128xf32, #tpu.memory_space<vmem>>, vector<8x128xf32>,
    return
  }
  func.func @transform_0(%arg0: i32) -> (i32, i32) {
    %c0_i32 = arith.constant 0 : i32
    %c0_i32_0 = arith.constant 0 : i32
    return %arg0, %c0_i32 : i32, i32
  }
  func.func @transform_1(%arg0: i32) -> (i32, i32) {
    %c0_i32 = arith.constant 0 : i32
    %c0_i32_0 = arith.constant 0 : i32
    %c0_i32_1 = arith.constant 0 : i32
    return %c0_i32, %c0_i32_0 : i32, i32
  }
  func.func @transform_2(%arg0: i32) -> (i32, i32) {
    %c0_i32 = arith.constant 0 : i32
    %c0_i32_0 = arith.constant 0 : i32
    %c0_i32_1 = arith.constant 0 : i32
    return %c0_i32, %c0_i32_0 : i32, i32
  }
  func.func @transform_3(%arg0: i32) -> (i32, i32) {
    %c0_i32 = arith.constant 0 : i32
    %c0_i32_0 = arith.constant 0 : i32
    return %arg0, %c0_i32 : i32, i32
  }
  func.func @transform_4(%arg0: i32) -> (i32, i32) {
    %c0_i32 = arith.constant 0 : i32
    %c0_i32_0 = arith.constant 0 : i32
    return %arg0, %c0_i32 : i32, i32
  }
}

module attributes {stable_mosaic.version = 11 : i64} {
  func.func @_conv_mm_kernel(%arg0: i32, %arg1: i32, %arg2: memref<18x512xbf16, #tpu.memory_space<vmem>>, %arg3: memref<512x128xbf16, #tpu.memory_space<vmem>>, %arg4: memref<1x128xf32, #tpu.memory_space<vmem>>, %arg5: memref<18x128xf32, #tpu.memory_space<vmem>>, %arg6: memref<8x128xf32, #tpu.memory_space<vmem>>, %arg7: memref<18x128xf32, #tpu.memory_space<vmem>>) attributes {dimension_semantics = [#tpu.dimension_semantics<parallel>, #tpu.dimension_semantics<arbitrary>], iteration_bounds = array<i64: 1, 1>, scalar_prefetch = 0 : i64, scratch_operands = 1 : i64, tpu.core_type = #tpu.core_type<tc>, window_params = [{transform_indices = @transform_0, window_bounds = array<i64: 18, 512>}, {transform_indices = @transform_1, window_bounds = array<i64: 512, 128>}, {pipeline_mode = #tpu.pipeline_mode<synchronous>, transform_indices = @transform_2, window_bounds = array<i64: 1, 128>}, {transform_indices = @transform_3, window_bounds = array<i64: 18, 128>}, {transform_indices = @transform_4, window_bounds = array<i64: 8, 128>}]} {
    %c0_i32 = arith.constant 0 : i32
    %0 = arith.cmpi eq, %arg1, %c0_i32 : i32
    %1 = arith.extui %0 : i1 to i32
    %c0_i32_0 = arith.constant 0 : i32
    %2 = arith.cmpi ne, %1, %c0_i32_0 : i32
    scf.if %2 {
      %cst_10 = arith.constant 0.000000e+00 : f32
      %12 = vector.broadcast %cst_10 : f32 to vector<18x128xf32>
      %c0_11 = arith.constant 0 : index
      %c0_12 = arith.constant 0 : index
      %13 = vector.load %arg7[%c0_11, %c0_12] : memref<18x128xf32, #tpu.memory_space<vmem>>, vector<18x128xf32>
      tpu.vector_store %arg7[%c0_11, %c0_12], %12 {strides = array<i32>} : memref<18x128xf32, #tpu.memory_space<vmem>>, vector<18x128xf32>,
    } else {
    }
    %c0 = arith.constant 0 : index
    %c0_1 = arith.constant 0 : index
    %3 = vector.load %arg7[%c0, %c0_1] : memref<18x128xf32, #tpu.memory_space<vmem>>, vector<18x128xf32>
    %c0_2 = arith.constant 0 : index
    %c0_3 = arith.constant 0 : index
    %4 = vector.load %arg2[%c0_2, %c0_3] : memref<18x512xbf16, #tpu.memory_space<vmem>>, vector<18x512xbf16>
    %c0_4 = arith.constant 0 : index
    %c0_5 = arith.constant 0 : index
    %5 = vector.load %arg3[%c0_4, %c0_5] : memref<512x128xbf16, #tpu.memory_space<vmem>>, vector<512x128xbf16>
    %cst = arith.constant dense<0.000000e+00> : vector<18x128xf32>
    %6 = tpu.matmul %4, %5, %cst {dimension_numbers = #tpu.dot_dimension_numbers<[1], [0], [0], [1], [0, 0, 1, 1], [], []>} : vector<18x512xbf16>, vector<512x128xbf16>, vector<18x128xf32> -> vector<18x128xf32>
    %7 = arith.addf %3, %6 : vector<18x128xf32>
    %c0_6 = arith.constant 0 : index
    %c0_7 = arith.constant 0 : index
    %8 = vector.load %arg7[%c0_6, %c0_7] : memref<18x128xf32, #tpu.memory_space<vmem>>, vector<18x128xf32>
    tpu.vector_store %arg7[%c0_6, %c0_7], %7 {strides = array<i32>} : memref<18x128xf32, #tpu.memory_space<vmem>>, vector<18x128xf32>,
    %c0_i32_8 = arith.constant 0 : i32
    %9 = arith.cmpi eq, %arg1, %c0_i32_8 : i32
    %10 = arith.extui %9 : i1 to i32
    %c0_i32_9 = arith.constant 0 : i32
    %11 = arith.cmpi ne, %10, %c0_i32_9 : i32
    scf.if %11 {
      %c0_10 = arith.constant 0 : index
      %c0_11 = arith.constant 0 : index
      %12 = vector.load %arg7[%c0_10, %c0_11] : memref<18x128xf32, #tpu.memory_space<vmem>>, vector<18x128xf32>
      %c0_12 = arith.constant 0 : index
      %c0_13 = arith.constant 0 : index
      %13 = vector.load %arg4[%c0_12, %c0_13] : memref<1x128xf32, #tpu.memory_space<vmem>>, vector<1x128xf32>
      %14 = vector.broadcast %13 : vector<1x128xf32> to vector<18x128xf32>
      %15 = arith.addf %12, %14 : vector<18x128xf32>
      %c0_14 = arith.constant 0 : index
      %c0_15 = arith.constant 0 : index
      %16 = vector.load %arg5[%c0_14, %c0_15] : memref<18x128xf32, #tpu.memory_space<vmem>>, vector<18x128xf32>
      tpu.vector_store %arg5[%c0_14, %c0_15], %15 {strides = array<i32>} : memref<18x128xf32, #tpu.memory_space<vmem>>, vector<18x128xf32>,
      %cst_16 = arith.constant dense<0.000000e+00> : vector<128xf32>
      %17 = vector.multi_reduction <add>, %15, %cst_16 [0] : vector<18x128xf32> to vector<128xf32>
      %18 = vector.shape_cast %17 : vector<128xf32> to vector<1x128xf32>
      %c0_17 = arith.constant 0 : index
      %c0_18 = arith.constant 0 : index
      %19 = vector.load %arg6[%c0_17, %c0_18] : memref<8x128xf32, #tpu.memory_space<vmem>>, vector<1x128xf32>
      tpu.vector_store %arg6[%c0_17, %c0_18], %18 {strides = array<i32>} : memref<8x128xf32, #tpu.memory_space<vmem>>, vector<1x128xf32>,
      %20 = arith.mulf %15, %15 : vector<18x128xf32>
      %cst_19 = arith.constant dense<0.000000e+00> : vector<128xf32>
      %21 = vector.multi_reduction <add>, %20, %cst_19 [0] : vector<18x128xf32> to vector<128xf32>
      %22 = vector.shape_cast %21 : vector<128xf32> to vector<1x128xf32>
      %c1 = arith.constant 1 : index
      %c0_20 = arith.constant 0 : index
      %23 = vector.load %arg6[%c1, %c0_20] : memref<8x128xf32, #tpu.memory_space<vmem>>, vector<1x128xf32>
      tpu.vector_store %arg6[%c1, %c0_20], %22 {strides = array<i32>} : memref<8x128xf32, #tpu.memory_space<vmem>>, vector<1x128xf32>,
    } else {
    }
    return
  }
  func.func @transform_0(%arg0: i32, %arg1: i32) -> (i32, i32) {
    %c0_i32 = arith.constant 0 : i32
    return %arg0, %arg1 : i32, i32
  }
  func.func @transform_1(%arg0: i32, %arg1: i32) -> (i32, i32) {
    %c0_i32 = arith.constant 0 : i32
    %c0_i32_0 = arith.constant 0 : i32
    return %arg1, %c0_i32 : i32, i32
  }
  func.func @transform_2(%arg0: i32, %arg1: i32) -> (i32, i32) {
    %c0_i32 = arith.constant 0 : i32
    %c0_i32_0 = arith.constant 0 : i32
    %c0_i32_1 = arith.constant 0 : i32
    return %c0_i32, %c0_i32_0 : i32, i32
  }
  func.func @transform_3(%arg0: i32, %arg1: i32) -> (i32, i32) {
    %c0_i32 = arith.constant 0 : i32
    %c0_i32_0 = arith.constant 0 : i32
    return %arg0, %c0_i32 : i32, i32
  }
  func.func @transform_4(%arg0: i32, %arg1: i32) -> (i32, i32) {
    %c0_i32 = arith.constant 0 : i32
    %c0_i32_0 = arith.constant 0 : i32
    return %arg0, %c0_i32 : i32, i32
  }
}

module attributes {stable_mosaic.version = 11 : i64} {
  func.func @_affine_leaky_kernel(%arg0: i32, %arg1: memref<6x192xf32, #tpu.memory_space<vmem>>, %arg2: memref<1x192xf32, #tpu.memory_space<vmem>>, %arg3: memref<1x192xf32, #tpu.memory_space<vmem>>, %arg4: memref<6x192xf32, #tpu.memory_space<vmem>>) attributes {dimension_semantics = [#tpu.dimension_semantics<parallel>], iteration_bounds = array<i64: 1>, scalar_prefetch = 0 : i64, scratch_operands = 0 : i64, tpu.core_type = #tpu.core_type<tc>, window_params = [{transform_indices = @transform_0, window_bounds = array<i64: 6, 192>}, {pipeline_mode = #tpu.pipeline_mode<synchronous>, transform_indices = @transform_1, window_bounds = array<i64: 1, 192>}, {pipeline_mode = #tpu.pipeline_mode<synchronous>, transform_indices = @transform_2, window_bounds = array<i64: 1, 192>}, {transform_indices = @transform_3, window_bounds = array<i64: 6, 192>}]} {
    %c0 = arith.constant 0 : index
    %c0_0 = arith.constant 0 : index
    %0 = vector.load %arg1[%c0, %c0_0] : memref<6x192xf32, #tpu.memory_space<vmem>>, vector<6x192xf32>
    %c0_1 = arith.constant 0 : index
    %c0_2 = arith.constant 0 : index
    %1 = vector.load %arg2[%c0_1, %c0_2] : memref<1x192xf32, #tpu.memory_space<vmem>>, vector<1x192xf32>
    %2 = vector.broadcast %1 : vector<1x192xf32> to vector<6x192xf32>
    %3 = arith.mulf %0, %2 : vector<6x192xf32>
    %c0_3 = arith.constant 0 : index
    %c0_4 = arith.constant 0 : index
    %4 = vector.load %arg3[%c0_3, %c0_4] : memref<1x192xf32, #tpu.memory_space<vmem>>, vector<1x192xf32>
    %5 = vector.broadcast %4 : vector<1x192xf32> to vector<6x192xf32>
    %6 = arith.addf %3, %5 : vector<6x192xf32>
    %cst = arith.constant 0.000000e+00 : f32
    %7 = vector.broadcast %cst : f32 to vector<6x192xf32>
    %8 = arith.cmpf oge, %6, %7 : vector<6x192xf32>
    %cst_5 = arith.constant 2.000000e-01 : f32
    %9 = vector.broadcast %cst_5 : f32 to vector<6x192xf32>
    %10 = arith.mulf %9, %6 : vector<6x192xf32>
    %11 = arith.select %8, %6, %10 : vector<6x192xi1>, vector<6x192xf32>
    %c0_6 = arith.constant 0 : index
    %c0_7 = arith.constant 0 : index
    %12 = vector.load %arg4[%c0_6, %c0_7] : memref<6x192xf32, #tpu.memory_space<vmem>>, vector<6x192xf32>
    tpu.vector_store %arg4[%c0_6, %c0_7], %11 {strides = array<i32>} : memref<6x192xf32, #tpu.memory_space<vmem>>, vector<6x192xf32>,
    return
  }
  func.func @transform_0(%arg0: i32) -> (i32, i32) {
    %c0_i32 = arith.constant 0 : i32
    %c0_i32_0 = arith.constant 0 : i32
    return %arg0, %c0_i32 : i32, i32
  }
  func.func @transform_1(%arg0: i32) -> (i32, i32) {
    %c0_i32 = arith.constant 0 : i32
    %c0_i32_0 = arith.constant 0 : i32
    %c0_i32_1 = arith.constant 0 : i32
    return %c0_i32, %c0_i32_0 : i32, i32
  }
  func.func @transform_2(%arg0: i32) -> (i32, i32) {
    %c0_i32 = arith.constant 0 : i32
    %c0_i32_0 = arith.constant 0 : i32
    %c0_i32_1 = arith.constant 0 : i32
    return %c0_i32, %c0_i32_0 : i32, i32
  }
  func.func @transform_3(%arg0: i32) -> (i32, i32) {
    %c0_i32 = arith.constant 0 : i32
    %c0_i32_0 = arith.constant 0 : i32
    return %arg0, %c0_i32 : i32, i32
  }
}

module attributes {stable_mosaic.version = 11 : i64} {
  func.func @_conv_mm_kernel(%arg0: i32, %arg1: i32, %arg2: memref<8x512xbf16, #tpu.memory_space<vmem>>, %arg3: memref<512x128xbf16, #tpu.memory_space<vmem>>, %arg4: memref<1x128xf32, #tpu.memory_space<vmem>>, %arg5: memref<8x128xf32, #tpu.memory_space<vmem>>, %arg6: memref<8x128xf32, #tpu.memory_space<vmem>>, %arg7: memref<8x128xf32, #tpu.memory_space<vmem>>) attributes {dimension_semantics = [#tpu.dimension_semantics<parallel>, #tpu.dimension_semantics<arbitrary>], iteration_bounds = array<i64: 1, 2>, scalar_prefetch = 0 : i64, scratch_operands = 1 : i64, tpu.core_type = #tpu.core_type<tc>, window_params = [{transform_indices = @transform_0, window_bounds = array<i64: 8, 512>}, {transform_indices = @transform_1, window_bounds = array<i64: 512, 128>}, {pipeline_mode = #tpu.pipeline_mode<synchronous>, transform_indices = @transform_2, window_bounds = array<i64: 1, 128>}, {transform_indices = @transform_3, window_bounds = array<i64: 8, 128>}, {transform_indices = @transform_4, window_bounds = array<i64: 8, 128>}]} {
    %c0_i32 = arith.constant 0 : i32
    %0 = arith.cmpi eq, %arg1, %c0_i32 : i32
    %1 = arith.extui %0 : i1 to i32
    %c0_i32_0 = arith.constant 0 : i32
    %2 = arith.cmpi ne, %1, %c0_i32_0 : i32
    scf.if %2 {
      %cst_9 = arith.constant 0.000000e+00 : f32
      %12 = vector.broadcast %cst_9 : f32 to vector<8x128xf32>
      %c0_10 = arith.constant 0 : index
      %c0_11 = arith.constant 0 : index
      %13 = vector.load %arg7[%c0_10, %c0_11] : memref<8x128xf32, #tpu.memory_space<vmem>>, vector<8x128xf32>
      tpu.vector_store %arg7[%c0_10, %c0_11], %12 {strides = array<i32>} : memref<8x128xf32, #tpu.memory_space<vmem>>, vector<8x128xf32>,
    } else {
    }
    %c0 = arith.constant 0 : index
    %c0_1 = arith.constant 0 : index
    %3 = vector.load %arg7[%c0, %c0_1] : memref<8x128xf32, #tpu.memory_space<vmem>>, vector<8x128xf32>
    %c0_2 = arith.constant 0 : index
    %c0_3 = arith.constant 0 : index
    %4 = vector.load %arg2[%c0_2, %c0_3] : memref<8x512xbf16, #tpu.memory_space<vmem>>, vector<8x512xbf16>
    %c0_4 = arith.constant 0 : index
    %c0_5 = arith.constant 0 : index
    %5 = vector.load %arg3[%c0_4, %c0_5] : memref<512x128xbf16, #tpu.memory_space<vmem>>, vector<512x128xbf16>
    %cst = arith.constant dense<0.000000e+00> : vector<8x128xf32>
    %6 = tpu.matmul %4, %5, %cst {dimension_numbers = #tpu.dot_dimension_numbers<[1], [0], [0], [1], [0, 0, 1, 1], [], []>} : vector<8x512xbf16>, vector<512x128xbf16>, vector<8x128xf32> -> vector<8x128xf32>
    %7 = arith.addf %3, %6 : vector<8x128xf32>
    %c0_6 = arith.constant 0 : index
    %c0_7 = arith.constant 0 : index
    %8 = vector.load %arg7[%c0_6, %c0_7] : memref<8x128xf32, #tpu.memory_space<vmem>>, vector<8x128xf32>
    tpu.vector_store %arg7[%c0_6, %c0_7], %7 {strides = array<i32>} : memref<8x128xf32, #tpu.memory_space<vmem>>, vector<8x128xf32>,
    %c1_i32 = arith.constant 1 : i32
    %9 = arith.cmpi eq, %arg1, %c1_i32 : i32
    %10 = arith.extui %9 : i1 to i32
    %c0_i32_8 = arith.constant 0 : i32
    %11 = arith.cmpi ne, %10, %c0_i32_8 : i32
    scf.if %11 {
      %c0_9 = arith.constant 0 : index
      %c0_10 = arith.constant 0 : index
      %12 = vector.load %arg7[%c0_9, %c0_10] : memref<8x128xf32, #tpu.memory_space<vmem>>, vector<8x128xf32>
      %c0_11 = arith.constant 0 : index
      %c0_12 = arith.constant 0 : index
      %13 = vector.load %arg4[%c0_11, %c0_12] : memref<1x128xf32, #tpu.memory_space<vmem>>, vector<1x128xf32>
      %14 = vector.broadcast %13 : vector<1x128xf32> to vector<8x128xf32>
      %15 = arith.addf %12, %14 : vector<8x128xf32>
      %c0_13 = arith.constant 0 : index
      %c0_14 = arith.constant 0 : index
      %16 = vector.load %arg5[%c0_13, %c0_14] : memref<8x128xf32, #tpu.memory_space<vmem>>, vector<8x128xf32>
      tpu.vector_store %arg5[%c0_13, %c0_14], %15 {strides = array<i32>} : memref<8x128xf32, #tpu.memory_space<vmem>>, vector<8x128xf32>,
      %cst_15 = arith.constant dense<0.000000e+00> : vector<128xf32>
      %17 = vector.multi_reduction <add>, %15, %cst_15 [0] : vector<8x128xf32> to vector<128xf32>
      %18 = vector.shape_cast %17 : vector<128xf32> to vector<1x128xf32>
      %c0_16 = arith.constant 0 : index
      %c0_17 = arith.constant 0 : index
      %19 = vector.load %arg6[%c0_16, %c0_17] : memref<8x128xf32, #tpu.memory_space<vmem>>, vector<1x128xf32>
      tpu.vector_store %arg6[%c0_16, %c0_17], %18 {strides = array<i32>} : memref<8x128xf32, #tpu.memory_space<vmem>>, vector<1x128xf32>,
      %20 = arith.mulf %15, %15 : vector<8x128xf32>
      %cst_18 = arith.constant dense<0.000000e+00> : vector<128xf32>
      %21 = vector.multi_reduction <add>, %20, %cst_18 [0] : vector<8x128xf32> to vector<128xf32>
      %22 = vector.shape_cast %21 : vector<128xf32> to vector<1x128xf32>
      %c1 = arith.constant 1 : index
      %c0_19 = arith.constant 0 : index
      %23 = vector.load %arg6[%c1, %c0_19] : memref<8x128xf32, #tpu.memory_space<vmem>>, vector<1x128xf32>
      tpu.vector_store %arg6[%c1, %c0_19], %22 {strides = array<i32>} : memref<8x128xf32, #tpu.memory_space<vmem>>, vector<1x128xf32>,
    } else {
    }
    return
  }
  func.func @transform_0(%arg0: i32, %arg1: i32) -> (i32, i32) {
    %c0_i32 = arith.constant 0 : i32
    return %arg0, %arg1 : i32, i32
  }
  func.func @transform_1(%arg0: i32, %arg1: i32) -> (i32, i32) {
    %c0_i32 = arith.constant 0 : i32
    %c0_i32_0 = arith.constant 0 : i32
    return %arg1, %c0_i32 : i32, i32
  }
  func.func @transform_2(%arg0: i32, %arg1: i32) -> (i32, i32) {
    %c0_i32 = arith.constant 0 : i32
    %c0_i32_0 = arith.constant 0 : i32
    %c0_i32_1 = arith.constant 0 : i32
    return %c0_i32, %c0_i32_0 : i32, i32
  }
  func.func @transform_3(%arg0: i32, %arg1: i32) -> (i32, i32) {
    %c0_i32 = arith.constant 0 : i32
    %c0_i32_0 = arith.constant 0 : i32
    return %arg0, %c0_i32 : i32, i32
  }
  func.func @transform_4(%arg0: i32, %arg1: i32) -> (i32, i32) {
    %c0_i32 = arith.constant 0 : i32
    %c0_i32_0 = arith.constant 0 : i32
    return %arg0, %c0_i32 : i32, i32
  }
}

</mosaic_0001>

<bundles_post_ra>
// kernel: nlayer_discriminator.18
= control target key start
LH: loop header
LB: loop body
LE: loop exit
PB: predicated region body
PF: predicated region fallthrough
CT: control target
= control target key end

     0   :  { %10 = vsyncpa [#allocation4], 0  ;;  %s1811_s0 = inlined_call_operand.vmem [shape: bf16[512,128], index: 0, kind: input, shape index: {}]   ;;  %s1812_s1 = inlined_call_operand.vmem [shape: bf16[128,128], index: 1, kind: input, shape index: {}]   ;;  %s1813_s2 = inlined_call_operand.vmem [shape: f32[1,128], index: 2, kind: input, shape index: {}]   ;;  %s1814_s3 = inlined_call_operand.vmem [shape: f32[512,128], index: 3, kind: output, shape index: {0}]   ;;  %s1815_s4 = inlined_call_operand.hbm [shape: f32[16,128], index: 4, kind: output, shape index: {1}]  }
   0x1   :  { %12 = vsyncpa [#allocation4 + $0x1], 0  ;;  %s1432_s15 = smov 0   ;;  %s1434_s16 = smov 0  }
   0x2   :  { %s1436_s17 = smov 0   ;;  %s1438_s18 = smov 0  }
   0x3   :  { %s1440_s19 = smov 0   ;;  %s1442_s20 = smov 0  }
   0x4 LB: > { %s1112_s21 = sadd.s32 4294967295, %s1405_s20   ;;  %s1113_s22 = sadd.s32 4294967294, %s1405_s20   ;;  %s1405_s20 = sphi %s1442_s20, %s18_s20   ;;  %s1401_s19 = sphi %s1440_s19, %s1822_s19   ;;  %s1397_s18 = sphi %s1438_s18, %s1821_s18   ;;  %s1393_s17 = sphi %s1436_s17, %s1820_s17   ;;  %s1389_s16 = sphi %s1434_s16, %s1819_s16   ;;  %s1385_s15 = sphi %s1432_s15, %s1818_s15  }
   0x5   : > { %s30_s23 = sadd.s32 1, %s1401_s19  ;;  %s138_s24 = sadd.s32 1, %s1393_s17 }
   0x6   : > { %p32_p0 = scmp.ge.s32.totalorder %s30_s23, 2  ;;  %p148_p1 = scmp.ne.s32.totalorder %s1393_s17, %s1389_s16 }
   0x7   : > { %p149_p2 = scmp.eq.s32.totalorder %s1112_s21, 1  ;;  %p154_p3 = scmp.ne.s32.totalorder %s1389_s16, %s1385_s15 }
   0x8   : > { %s1824_s23 = smov (%p32_p0, %s30_s23), 0  ;;  %p155_p5 = scmp.eq.s32.totalorder %s1113_s22, 1 }
   0x9   : > { %p1472_p4 = por %p149_p2, %p148_p1  ;;  %s135_s26 = ssub.s32 %s1401_s19, %s1824_s23 }
   0xa   : > { %p1117_p6 = scmp.ge.s32.totalorder %s1405_s20, 1  ;;  %p136_p7 = scmp.eq.s32.totalorder %s135_s26, 0 }
   0xb   : > { %p1479_p8 = por %p155_p5, %p154_p3  ;;  %p197_p9 = scmp.lt.s32.totalorder %s1405_s20, 3 }
   0xc   : > { %s1485_s28 = scalar_select %p136_p7, %s1393_s17, %s138_s24  }
   0xd   : > { %p198_p10 = pnand %p1117_p6, %p197_p9 }
   0xe   : > { %s1119_s11 = sshll.u32 (!%p198_p10), %s1397_s18, 5  ;;  %s1220_s22 = sshll.u32 (!%p198_p10), %s1397_s18, 3 }
   0xf   : > { %201 = sbr.rel (%p198_p10) target bundleno = 306 (0x132), region = 32  ;;  %p237_p11 = scmp.lt.s32.totalorder (!%p198_p10), %s1119_s11, 63 }
  0x10   : > { %s997_s29 = scalar_lea.hbm (!%p198_p10), %s1815_s4, %s1220_s22  ;;  %s1347_s12 = scalar_lea.hbm (!%p198_p10), %s1815_s4, 16 }
  0x11   : > { %s1001_s6 = sshll.u32 (!%p198_p10), %s997_s29, 4  ;;  %s1002_s6 = int_to_ptr.hbm [resolvable:$true] %s1001_s6 }
  0x14   : > { %v1246_v0 = vld [vmem:[%s1812_s1 + $0x38] sm:$0xff]  ;;  %v1245_v1 = vld [vmem:[%s1812_s1 + $0x30] sm:$0xff]  ;;  %v1244_v2 = vld [vmem:[%s1812_s1 + $0x28] sm:$0xff]  ;;  %s1826_s11 = smov (!%p237_p11, %s1119_s11), 63 }
  0x15   : > { %517 = vmatpush.bf16.msra.mxu0 %v1246_v0  ;;  %1247 = vmatpush.bf16.msra.mxu1 %v1246_v0  ;;  %v1243_v3 = vld [vmem:[%s1812_s1 + $0x20] sm:$0xff]  ;;  %v1242_v4 = vld [vmem:[%s1812_s1 + $0x18] sm:$0xff]  ;;  %v1241_v5 = vld [vmem:[%s1812_s1 + $0x10] sm:$0xff]  ;;  %s1120_s26 = sshll.u32 %s1826_s11, 2  ;;  %s1122_s10 = sshll.u32 %s1826_s11, 3 }
  0x16   : > { %1248 = vmatpush.bf16.msra.mxu2 %v1246_v0  ;;  %1249 = vmatpush.bf16.msra.mxu3 %v1246_v0  ;;  %v1240_v6 = vld [vmem:[%s1812_s1 + $0x8] sm:$0xff]  ;;  %v1239_v7 = vld [vmem:[%s1812_s1] sm:$0xff]  ;;  %s1518_s7 = scalar_lea.vmem %s1811_s0, %s1120_s26  ;;  %s1547_s14 = scalar_lea.vmem %s1814_s3, %s1122_s10 }
  0x17   : > { %v1223_v8 = vld [vmem:[%s1518_s7] sm:$0xff]  ;;  %v1224_v12 = vld [vmem:[%s1518_s7 + $0x8] sm:$0xff]  ;;  %v1225_v16 = vld [vmem:[%s1518_s7 + $0x10] sm:$0xff]  ;;  %s233_s11 = sand.u32 1, %s1389_s16  }
  0x18   : > { %v1227_v9 = vld [vmem:[%s1518_s7 + $0x20] sm:$0xff]  ;;  %v1228_v13 = vld [vmem:[%s1518_s7 + $0x28] sm:$0xff]  ;;  %v1229_v17 = vld [vmem:[%s1518_s7 + $0x30] sm:$0xff]  ;;  %s1118_s21 = sshll.u32 %s233_s11, 3  ;;  %s983_s18 = scalar_lea.sflag [#allocation4], %s233_s11 }
  0x19   : > { %518 = vmatpush.bf16.msra.mxu0 %v1245_v1  ;;  %1250 = vmatpush.bf16.msra.mxu1 %v1245_v1  ;;  %v1231_v10 = vld [vmem:[%s1518_s7 + $0x40] sm:$0xff]  ;;  %v1232_v14 = vld [vmem:[%s1518_s7 + $0x48] sm:$0xff]  ;;  %v1233_v18 = vld [vmem:[%s1518_s7 + $0x50] sm:$0xff]  ;;  %s235_s30 = scalar_lea.vmem [#allocation3], %s1118_s21 }
  0x1a   : > { %1251 = vmatpush.bf16.msra.mxu2 %v1245_v1  ;;  %1252 = vmatpush.bf16.msra.mxu3 %v1245_v1  ;;  %v1235_v11 = vld [vmem:[%s1518_s7 + $0x60] sm:$0xff]  ;;  %v1236_v15 = vld [vmem:[%s1518_s7 + $0x68] sm:$0xff]  ;;  %v1237_v19 = vld [vmem:[%s1518_s7 + $0x70] sm:$0xff]  ;;  %s999_s5 = sshll.u32 %s235_s30, 4  ;;  %s1000_s5 = int_to_ptr.vmem [resolvable:$true] %s999_s5 }
  0x1b   : > { %v1226_v20 = vld [vmem:[%s1518_s7 + $0x18] sm:$0xff]  ;;  %v1539_v24 = vld [vmem:[%s1813_s2] ss:$0 sm:$0xff] }
  0x1c   : > { %v1230_v21 = vld [vmem:[%s1518_s7 + $0x38] sm:$0xff] }
  0x1d   : > { %519 = vmatpush.bf16.msra.mxu0 %v1244_v2  ;;  %1253 = vmatpush.bf16.msra.mxu1 %v1244_v2  ;;  %v1234_v22 = vld [vmem:[%s1518_s7 + $0x58] sm:$0xff] }
  0x1e   : > { %1254 = vmatpush.bf16.msra.mxu2 %v1244_v2  ;;  %1255 = vmatpush.bf16.msra.mxu3 %v1244_v2  ;;  %v1238_v23 = vld [vmem:[%s1518_s7 + $0x78] sm:$0xff]  ;;  %s1341_s7 = sshra.s32 %s1002_s6, 4  ;;  %s1342_s7 = int_to_ptr.hbm [resolvable:$true] %s1341_s7 }
  0x1f   : > { %s1343_s8 = scalar_lea.hbm %s1342_s7, 8  ;;  %p1348_p1 = scmp.lt.s32.totalorder %s1342_s7, %s1815_s4 }
  0x20   : > { %p1344_p12 = scmp.ne.s32.totalorder %s1342_s7, %s1343_s8  ;;  %p1349_p2 = scmp.lt.s32.totalorder %s1347_s12, %s1343_s8 }
  0x21   : > { %520 = vmatpush.bf16.msra.mxu0 %v1243_v3  ;;  %1256 = vmatpush.bf16.msra.mxu1 %v1243_v3 }
  0x22   : > { %1257 = vmatpush.bf16.msra.mxu2 %v1243_v3  ;;  %1258 = vmatpush.bf16.msra.mxu3 %v1243_v3  ;;  %p1345_p13 = pnand %p1344_p12, %p1472_p4  ;;  %p1350_p3 = por %p1349_p2, %p1348_p1 }
  0x24   : > { %p1346_p0 = pneg %p1345_p13 }
  0x25   : > { %521 = vmatpush.bf16.msra.mxu0 %v1242_v4  ;;  %1259 = vmatpush.bf16.msra.mxu1 %v1242_v4 }
  0x26   : > { %1260 = vmatpush.bf16.msra.mxu2 %v1242_v4  ;;  %1261 = vmatpush.bf16.msra.mxu3 %v1242_v4  ;;  %p1351_p5 = pnand %p1350_p3, %p1346_p0 }
  0x29   : > { %522 = vmatpush.bf16.msra.mxu0 %v1241_v5  ;;  %1262 = vmatpush.bf16.msra.mxu1 %v1241_v5 }
  0x2a   : > { %1263 = vmatpush.bf16.msra.mxu2 %v1241_v5  ;;  %1264 = vmatpush.bf16.msra.mxu3 %v1241_v5 }
  0x2d   : > { %523 = vmatpush.bf16.msra.mxu0 %v1240_v6  ;;  %1265 = vmatpush.bf16.msra.mxu1 %v1240_v6 }
  0x2e   : > { %1266 = vmatpush.bf16.msra.mxu2 %v1240_v6  ;;  %1267 = vmatpush.bf16.msra.mxu3 %v1240_v6 }
  0x31   : > { %524 = vmatpush.bf16.msra.mxu0 %v1239_v7  ;;  %1268 = vmatpush.bf16.msra.mxu1 %v1239_v7 }
  0x32   : > { %1269 = vmatpush.bf16.msra.mxu2 %v1239_v7  ;;  %1270 = vmatpush.bf16.msra.mxu3 %v1239_v7 }
  0x34   : > { %525 = vmatmul.bf16.vlgmr.msra.gmra.mxu0 %v1223_v8  ;;  %545 = vmatmul.bf16.vlgmr.msra.gmra.mxu1 %v1227_v9 }
  0x35   : > { %565 = vmatmul.bf16.vlgmr.msra.gmra.mxu2 %v1231_v10  ;;  %585 = vmatmul.bf16.vlgmr.msra.gmra.mxu3 %v1235_v11 }
  0x44   : > { %530 = vmatmul.bf16.gmra.mxu0 %v1224_v12  ;;  %550 = vmatmul.bf16.gmra.mxu1 %v1228_v13 }
  0x45   : > { %570 = vmatmul.bf16.gmra.mxu2 %v1232_v14  ;;  %590 = vmatmul.bf16.gmra.mxu3 %v1236_v15 }
  0x54   : > { %535 = vmatmul.bf16.gmra.mxu0 %v1225_v16  ;;  %555 = vmatmul.bf16.gmra.mxu1 %v1229_v17 }
  0x55   : > { %575 = vmatmul.bf16.gmra.mxu2 %v1233_v18  ;;  %595 = vmatmul.bf16.gmra.mxu3 %v1237_v19 }
  0x64   : > { %540 = vmatmul.bf16.gmra.mxu0 %v1226_v20  ;;  %560 = vmatmul.bf16.gmra.mxu1 %v1230_v21 }
  0x65   : > { %580 = vmatmul.bf16.gmra.mxu2 %v1234_v22  ;;  %600 = vmatmul.bf16.gmra.mxu3 %v1238_v23 }
  0xb1   : > { %v526_v25 = vpop.f32.mrf.mxu0  ;;  %v546_v26 = vpop.f32.mrf.mxu1 }
  0xb2   : > { %v709_v27 = vadd.f32 %v1539_v24, %v526_v25  ;;  %v717_v28 = vadd.f32 %v1539_v24, %v546_v26 }
  0xb4   : > { %vm741_vm0 = vcmp.ge.f32.partialorder %v709_v27, 0.0  ;;  %v773_v29 = vmul.f32 0.2, %v709_v27  ;;  %vm749_vm1 = vcmp.ge.f32.partialorder %v717_v28, 0.0  ;;  %v781_v30 = vmul.f32 0.2, %v717_v28 }
  0xb6   : > { %v1549_v31 = vsel %vm741_vm0, %v709_v27, %v773_v29  ;;  %v1551_v32 = vsel %vm749_vm1, %v717_v28, %v781_v30 }
  0xb7   : > { %837 = vst [vmem:[%s1547_s14] sm:$0xff] %v1549_v31 }
  0xb8   : > { %845 = vst [vmem:[%s1547_s14 + $0x40] sm:$0xff] %v1551_v32  ;;  %v566_v33 = vpop.f32.mrf.mxu2  ;;  %v586_v34 = vpop.f32.mrf.mxu3 }
  0xb9   : > { %v528_v35 = vpop.f32.mrf.mxu0  ;;  %v548_v36 = vpop.f32.mrf.mxu1  ;;  %v725_v37 = vadd.f32 %v1539_v24, %v566_v33  ;;  %v733_v38 = vadd.f32 %v1539_v24, %v586_v34 }
  0xba   : > { %v710_v39 = vadd.f32 %v1539_v24, %v528_v35  ;;  %v718_v40 = vadd.f32 %v1539_v24, %v548_v36 }
  0xbb   : > { %vm757_vm2 = vcmp.ge.f32.partialorder %v725_v37, 0.0  ;;  %v789_v41 = vmul.f32 0.2, %v725_v37  ;;  %vm765_vm3 = vcmp.ge.f32.partialorder %v733_v38, 0.0  ;;  %v797_v42 = vmul.f32 0.2, %v733_v38 }
  0xbc   : > { %vm742_vm4 = vcmp.ge.f32.partialorder %v710_v39, 0.0  ;;  %v774_v43 = vmul.f32 0.2, %v710_v39  ;;  %vm750_vm5 = vcmp.ge.f32.partialorder %v718_v40, 0.0  ;;  %v782_v44 = vmul.f32 0.2, %v718_v40 }
  0xbd   : > { %v1561_v45 = vsel %vm757_vm2, %v725_v37, %v789_v41  ;;  %v1569_v48 = vsel %vm765_vm3, %v733_v38, %v797_v42 }
  0xbe   : > { %v1563_v46 = vsel %vm742_vm4, %v710_v39, %v774_v43  ;;  %v1565_v47 = vsel %vm750_vm5, %v718_v40, %v782_v44  ;;  %853 = vst [vmem:[%s1547_s14 + $0x80] sm:$0xff] %v1561_v45 }
  0xbf   : > { %838 = vst [vmem:[%s1547_s14 + $0x8] sm:$0xff] %v1563_v46 }
  0xc0   : > { %846 = vst [vmem:[%s1547_s14 + $0x48] sm:$0xff] %v1565_v47  ;;  %v568_v49 = vpop.f32.mrf.mxu2  ;;  %v588_v50 = vpop.f32.mrf.mxu3 }
  0xc1   : > { %v531_v51 = vpop.f32.mrf.mxu0  ;;  %v551_v52 = vpop.f32.mrf.mxu1  ;;  %v726_v53 = vadd.f32 %v1539_v24, %v568_v49  ;;  %861 = vst [vmem:[%s1547_s14 + $0xc0] sm:$0xff] %v1569_v48  ;;  %v734_v54 = vadd.f32 %v1539_v24, %v588_v50  ;;  %v908_v50 = vmul.f32 %v1563_v46, %v1563_v46 }
  0xc2   : > { %v711_v55 = vadd.f32 %v1539_v24, %v531_v51  ;;  %v719_v56 = vadd.f32 %v1539_v24, %v551_v52 }
  0xc3   : > { %vm758_vm6 = vcmp.ge.f32.partialorder %v726_v53, 0.0  ;;  %v790_v57 = vmul.f32 0.2, %v726_v53  ;;  %vm766_vm7 = vcmp.ge.f32.partialorder %v734_v54, 0.0  ;;  %v798_v58 = vmul.f32 0.2, %v734_v54 }
  0xc4   : > { %vm743_vm8 = vcmp.ge.f32.partialorder %v711_v55, 0.0  ;;  %v775_v59 = vmul.f32 0.2, %v711_v55  ;;  %vm751_vm9 = vcmp.ge.f32.partialorder %v719_v56, 0.0  ;;  %v783_v60 = vmul.f32 0.2, %v719_v56 }
  0xc5   : > { %v1581_v61 = vsel %vm758_vm6, %v726_v53, %v790_v57  ;;  %v1589_v0 = vsel %vm766_vm7, %v734_v54, %v798_v58  ;;  %v907_v54 = vmul.f32 %v1549_v31, %v1549_v31 }
  0xc6   : > { %v1583_v62 = vsel %vm743_vm8, %v711_v55, %v775_v59  ;;  %v1585_v63 = vsel %vm751_vm9, %v719_v56, %v783_v60  ;;  %854 = vst [vmem:[%s1547_s14 + $0x88] sm:$0xff] %v1581_v61  ;;  %v869_v55 = vadd.f32 %v1563_v46, %v1549_v31 }
  0xc7   : > { %839 = vst [vmem:[%s1547_s14 + $0x10] sm:$0xff] %v1583_v62  ;;  %v939_v59 = vadd.f32 %v908_v50, %v907_v54  ;;  %v909_v60 = vmul.f32 %v1583_v62, %v1583_v62 }
  0xc8   : > { %847 = vst [vmem:[%s1547_s14 + $0x50] sm:$0xff] %v1585_v63  ;;  %v571_v1 = vpop.f32.mrf.mxu2  ;;  %v591_v2 = vpop.f32.mrf.mxu3 }
  0xc9   : > { %v533_v3 = vpop.f32.mrf.mxu0  ;;  %v553_v4 = vpop.f32.mrf.mxu1  ;;  %v727_v5 = vadd.f32 %v1539_v24, %v571_v1  ;;  %862 = vst [vmem:[%s1547_s14 + $0xc8] sm:$0xff] %v1589_v0  ;;  %v735_v6 = vadd.f32 %v1539_v24, %v591_v2 }
  0xca   : > { %v712_v7 = vadd.f32 %v1539_v24, %v533_v3  ;;  %v720_v8 = vadd.f32 %v1539_v24, %v553_v4 }
  0xcb   : > { %vm759_vm10 = vcmp.ge.f32.partialorder %v727_v5, 0.0  ;;  %v791_v9 = vmul.f32 0.2, %v727_v5  ;;  %vm767_vm11 = vcmp.ge.f32.partialorder %v735_v6, 0.0  ;;  %v799_v10 = vmul.f32 0.2, %v735_v6 }
  0xcc   : > { %vm744_vm12 = vcmp.ge.f32.partialorder %v712_v7, 0.0  ;;  %v776_v11 = vmul.f32 0.2, %v712_v7  ;;  %vm752_vm13 = vcmp.ge.f32.partialorder %v720_v8, 0.0  ;;  %v784_v12 = vmul.f32 0.2, %v720_v8 }
  0xcd   : > { %v1601_v13 = vsel %vm759_vm10, %v727_v5, %v791_v9  ;;  %v1609_v16 = vsel %vm767_vm11, %v735_v6, %v799_v10  ;;  %v870_v10 = vadd.f32 %v869_v55, %v1583_v62 }
  0xce   : > { %v1603_v14 = vsel %vm744_vm12, %v712_v7, %v776_v11  ;;  %v1605_v15 = vsel %vm752_vm13, %v720_v8, %v784_v12  ;;  %855 = vst [vmem:[%s1547_s14 + $0x90] sm:$0xff] %v1601_v13  ;;  %v940_v11 = vadd.f32 %v939_v59, %v909_v60 }
  0xcf   : > { %840 = vst [vmem:[%s1547_s14 + $0x18] sm:$0xff] %v1603_v14  ;;  %v910_v5 = vmul.f32 %v1603_v14, %v1603_v14 }
  0xd0   : > { %848 = vst [vmem:[%s1547_s14 + $0x58] sm:$0xff] %v1605_v15  ;;  %v573_v17 = vpop.f32.mrf.mxu2  ;;  %v593_v18 = vpop.f32.mrf.mxu3 }
  0xd1   : > { %v536_v19 = vpop.f32.mrf.mxu0  ;;  %v556_v20 = vpop.f32.mrf.mxu1  ;;  %v728_v21 = vadd.f32 %v1539_v24, %v573_v17  ;;  %863 = vst [vmem:[%s1547_s14 + $0xd0] sm:$0xff] %v1609_v16  ;;  %v736_v22 = vadd.f32 %v1539_v24, %v593_v18 }
  0xd2   : > { %v713_v23 = vadd.f32 %v1539_v24, %v536_v19  ;;  %v721_v25 = vadd.f32 %v1539_v24, %v556_v20 }
  0xd3   : > { %vm760_vm14 = vcmp.ge.f32.partialorder %v728_v21, 0.0  ;;  %v792_v26 = vmul.f32 0.2, %v728_v21  ;;  %vm768_vm15 = vcmp.ge.f32.partialorder %v736_v22, 0.0  ;;  %v800_v27 = vmul.f32 0.2, %v736_v22 }
  0xd4   : > { %vm745_vm0 = vcmp.ge.f32.partialorder %v713_v23, 0.0  ;;  %v777_v28 = vmul.f32 0.2, %v713_v23  ;;  %vm753_vm1 = vcmp.ge.f32.partialorder %v721_v25, 0.0  ;;  %v785_v29 = vmul.f32 0.2, %v721_v25 }
  0xd5   : > { %v1621_v30 = vsel %vm760_vm14, %v728_v21, %v792_v26  ;;  %v1629_v35 = vsel %vm768_vm15, %v736_v22, %v800_v27  ;;  %v871_v22 = vadd.f32 %v870_v10, %v1603_v14 }
  0xd6   : > { %v1623_v33 = vsel %vm745_vm0, %v713_v23, %v777_v28  ;;  %v1625_v34 = vsel %vm753_vm1, %v721_v25, %v785_v29  ;;  %856 = vst [vmem:[%s1547_s14 + $0x98] sm:$0xff] %v1621_v30  ;;  %v941_v23 = vadd.f32 %v940_v11, %v910_v5 }
  0xd7   : > { %841 = vst [vmem:[%s1547_s14 + $0x20] sm:$0xff] %v1623_v33  ;;  %v911_v18 = vmul.f32 %v1623_v33, %v1623_v33  ;;  %v872_v27 = vadd.f32 %v871_v22, %v1623_v33 }
  0xd8   : > { %849 = vst [vmem:[%s1547_s14 + $0x60] sm:$0xff] %v1625_v34  ;;  %v576_v36 = vpop.f32.mrf.mxu2  ;;  %v596_v37 = vpop.f32.mrf.mxu3 }
  0xd9   : > { %v538_v38 = vpop.f32.mrf.mxu0  ;;  %v558_v39 = vpop.f32.mrf.mxu1  ;;  %v729_v40 = vadd.f32 %v1539_v24, %v576_v36  ;;  %864 = vst [vmem:[%s1547_s14 + $0xd8] sm:$0xff] %v1629_v35  ;;  %v737_v57 = vadd.f32 %v1539_v24, %v596_v37  ;;  %v942_v14 = vadd.f32 %v941_v23, %v911_v18 }
  0xda   : > { %v714_v41 = vadd.f32 %v1539_v24, %v538_v38  ;;  %v722_v42 = vadd.f32 %v1539_v24, %v558_v39 }
  0xdb   : > { %vm761_vm2 = vcmp.ge.f32.partialorder %v729_v40, 0.0  ;;  %v793_v43 = vmul.f32 0.2, %v729_v40  ;;  %v801_v6 = vmul.f32 0.2, %v737_v57  ;;  %vm769_vm6 = vcmp.ge.f32.partialorder %v737_v57, 0.0 }
  0xdc   : > { %vm746_vm3 = vcmp.ge.f32.partialorder %v714_v41, 0.0  ;;  %v778_v44 = vmul.f32 0.2, %v714_v41  ;;  %vm754_vm4 = vcmp.ge.f32.partialorder %v722_v42, 0.0  ;;  %v786_v49 = vmul.f32 0.2, %v722_v42 }
  0xdd   : > { %v1642_v51 = vsel %vm761_vm2, %v729_v40, %v793_v43  ;;  %v1673_v21 = vsel %vm769_vm6, %v737_v57, %v801_v6 }
  0xde   : > { %v810_v52 = vsel %vm746_vm3, %v714_v41, %v778_v44  ;;  %v1644_v53 = vsel %vm754_vm4, %v722_v42, %v786_v49  ;;  %857 = vst [vmem:[%s1547_s14 + $0xa0] sm:$0xff] %v1642_v51 }
  0xdf   : > { %842 = vst [vmem:[%s1547_s14 + $0x28] sm:$0xff] %v810_v52  ;;  %v912_v28 = vmul.f32 %v810_v52, %v810_v52  ;;  %v873_v40 = vadd.f32 %v872_v27, %v810_v52 }
  0xe0   : > { %850 = vst [vmem:[%s1547_s14 + $0x68] sm:$0xff] %v1644_v53  ;;  %v578_v56 = vpop.f32.mrf.mxu2  ;;  %v598_v58 = vpop.f32.mrf.mxu3 }
  0xe1   : > { %v541_v1 = vpop.f32.mrf.mxu0  ;;  %v561_v2 = vpop.f32.mrf.mxu1  ;;  %v730_v3 = vadd.f32 %v1539_v24, %v578_v56  ;;  %v738_v4 = vadd.f32 %v1539_v24, %v598_v58  ;;  %865 = vst [vmem:[%s1547_s14 + $0xe0] sm:$0xff] %v1673_v21  ;;  %v943_v44 = vadd.f32 %v942_v14, %v912_v28  ;;  %v915_v58 = vmul.f32 %v1551_v32, %v1551_v32 }
  0xe2   : > { %v715_v31 = vadd.f32 %v1539_v24, %v541_v1  ;;  %v723_v46 = vadd.f32 %v1539_v24, %v561_v2 }
  0xe3   : > { %vm762_vm5 = vcmp.ge.f32.partialorder %v730_v3, 0.0  ;;  %v794_v7 = vmul.f32 0.2, %v730_v3  ;;  %vm770_vm7 = vcmp.ge.f32.partialorder %v738_v4, 0.0  ;;  %v802_v17 = vmul.f32 0.2, %v738_v4 }
  0xe4   : > { %vm747_vm8 = vcmp.ge.f32.partialorder %v715_v31, 0.0  ;;  %v779_v8 = vmul.f32 0.2, %v715_v31  ;;  %vm755_vm9 = vcmp.ge.f32.partialorder %v723_v46, 0.0  ;;  %v787_v9 = vmul.f32 0.2, %v723_v46 }
  0xe5   : > { %v1665_v12 = vsel %vm762_vm5, %v730_v3, %v794_v7  ;;  %v1678_v62 = vsel %vm770_vm7, %v738_v4, %v802_v17 }
  0xe6   : > { %v811_v19 = vsel %vm747_vm8, %v715_v31, %v779_v8  ;;  %v1669_v20 = vsel %vm755_vm9, %v723_v46, %v787_v9  ;;  %858 = vst [vmem:[%s1547_s14 + $0xa8] sm:$0xff] %v1665_v12  ;;  %v916_v31 = vmul.f32 %v1565_v47, %v1565_v47 }
  0xe7   : > { %843 = vst [vmem:[%s1547_s14 + $0x30] sm:$0xff] %v811_v19  ;;  %v913_v41 = vmul.f32 %v811_v19, %v811_v19  ;;  %v874_v49 = vadd.f32 %v873_v40, %v811_v19 }
  0xe8   : > { %851 = vst [vmem:[%s1547_s14 + $0x70] sm:$0xff] %v1669_v20  ;;  %v581_v25 = vpop.f32.mrf.mxu2  ;;  %v601_v26 = vpop.f32.mrf.mxu3 }
  0xe9   : > { %v543_v29 = vpop.f32.mrf.mxu0  ;;  %v563_v36 = vpop.f32.mrf.mxu1  ;;  %v731_v37 = vadd.f32 %v1539_v24, %v581_v25  ;;  %866 = vst [vmem:[%s1547_s14 + $0xe8] sm:$0xff] %v1678_v62  ;;  %v944_v56 = vadd.f32 %v943_v44, %v913_v41  ;;  %v739_v60 = vadd.f32 %v1539_v24, %v601_v26  ;;  %v920_v26 = vmul.f32 %v1644_v53, %v1644_v53 }
  0xea   : > { %v716_v38 = vadd.f32 %v1539_v24, %v543_v29  ;;  %v724_v39 = vadd.f32 %v1539_v24, %v563_v36  ;;  %v921_v29 = vmul.f32 %v1669_v20, %v1669_v20  ;;  %v924_v41 = vmul.f32 %v1581_v61, %v1581_v61 }
  0xeb   : > { %vm763_vm10 = vcmp.ge.f32.partialorder %v731_v37, 0.0  ;;  %v795_v33 = vmul.f32 0.2, %v731_v37  ;;  %v803_v46 = vmul.f32 0.2, %v739_v60  ;;  %vm771_vm14 = vcmp.ge.f32.partialorder %v739_v60, 0.0 }
  0xec   : > { %vm748_vm11 = vcmp.ge.f32.partialorder %v716_v38, 0.0  ;;  %v780_v42 = vmul.f32 0.2, %v716_v38  ;;  %vm756_vm12 = vcmp.ge.f32.partialorder %v724_v39, 0.0  ;;  %v788_v43 = vmul.f32 0.2, %v724_v39 }
  0xed   : > { %v1690_v50 = vsel %vm763_vm10, %v731_v37, %v795_v33  ;;  %v1708_v17 = vsel %vm771_vm14, %v739_v60, %v803_v46  ;;  %v926_v44 = vmul.f32 %v1621_v30, %v1621_v30 }
  0xee   : > { %v812_v54 = vsel %vm748_vm11, %v716_v38, %v780_v42  ;;  %v820_v55 = vsel %vm756_vm12, %v724_v39, %v788_v43  ;;  %859 = vst [vmem:[%s1547_s14 + $0xb0] sm:$0xff] %v1690_v50  ;;  %v923_v39 = vmul.f32 %v1561_v45, %v1561_v45  ;;  %v925_v42 = vmul.f32 %v1601_v13, %v1601_v13 }
  0xef   : > { %844 = vst [vmem:[%s1547_s14 + $0x38] sm:$0xff] %v812_v54  ;;  %v875_v57 = vadd.f32 %v874_v49, %v812_v54  ;;  %v914_v52 = vmul.f32 %v812_v54, %v812_v54  ;;  %v922_v14 = vmul.f32 %v820_v55, %v820_v55 }
  0xf0   : > { %852 = vst [vmem:[%s1547_s14 + $0x78] sm:$0xff] %v820_v55  ;;  %v583_v59 = vpop.f32.mrf.mxu2  ;;  %v603_v1 = vpop.f32.mrf.mxu3 }
  0xf1   : > { %v876_v2 = vadd.f32 %v875_v57, %v1551_v32  ;;  %v945_v3 = vadd.f32 %v944_v56, %v914_v52  ;;  %v732_v4 = vadd.f32 %v1539_v24, %v583_v59  ;;  %v740_v5 = vadd.f32 %v1539_v24, %v603_v1  ;;  %867 = vst [vmem:[%s1547_s14 + $0xf0] sm:$0xff] %v1708_v17 }
  0xf2   : > { %v917_v32 = vmul.f32 %v1585_v63, %v1585_v63  ;;  %v928_v57 = vmul.f32 %v1665_v12, %v1665_v12  ;;  %v929_v59 = vmul.f32 %v1690_v50, %v1690_v50 }
  0xf3   : > { %v877_v6 = vadd.f32 %v876_v2, %v1565_v47  ;;  %v946_v7 = vadd.f32 %v945_v3, %v915_v58  ;;  %vm764_vm13 = vcmp.ge.f32.partialorder %v732_v4, 0.0  ;;  %v796_v8 = vmul.f32 0.2, %v732_v4 }
  0xf4   : > { %vm772_vm15 = vcmp.ge.f32.partialorder %v740_v5, 0.0  ;;  %v804_v9 = vmul.f32 0.2, %v740_v5  ;;  %v918_v47 = vmul.f32 %v1605_v15, %v1605_v15  ;;  %v931_v2 = vmul.f32 %v1569_v48, %v1569_v48 }
  0xf5   : > { %v878_v10 = vadd.f32 %v877_v6, %v1585_v63  ;;  %v947_v24 = vadd.f32 %v946_v7, %v916_v31  ;;  %v828_v11 = vsel %vm764_vm13, %v732_v4, %v796_v8  ;;  %v919_v63 = vmul.f32 %v1625_v34, %v1625_v34 }
  0xf6   : > { %860 = vst [vmem:[%s1547_s14 + $0xb8] sm:$0xff] %v828_v11  ;;  %v1711_v18 = vsel %vm772_vm15, %v740_v5, %v804_v9  ;;  %v930_v1 = vmul.f32 %v828_v11, %v828_v11  ;;  %v932_v4 = vmul.f32 %v1589_v0, %v1589_v0  ;;  %v933_v31 = vmul.f32 %v1609_v16, %v1609_v16 }
  0xf7   : > { %v948_v19 = vadd.f32 %v947_v24, %v917_v32  ;;  %v879_v22 = vadd.f32 %v878_v10, %v1605_v15  ;;  %868 = vst [vmem:[%s1547_s14 + $0xf8] sm:$0xff] %v1711_v18  ;;  %v934_v6 = vmul.f32 %v1629_v35, %v1629_v35  ;;  %v935_v8 = vmul.f32 %v1673_v21, %v1673_v21 }
  0xf8   : > { %v936_v10 = vmul.f32 %v1678_v62, %v1678_v62 }
  0xf9   : > { %v880_v23 = vadd.f32 %v879_v22, %v1625_v34  ;;  %v949_v25 = vadd.f32 %v948_v19, %v918_v47 }
  0xfb   : > { %v881_v27 = vadd.f32 %v880_v23, %v1644_v53  ;;  %v950_v28 = vadd.f32 %v949_v25, %v919_v63 }
  0xfd   : > { %v882_v15 = vadd.f32 %v881_v27, %v1669_v20  ;;  %v951_v36 = vadd.f32 %v950_v28, %v920_v26 }
  0xff   : > { %v883_v37 = vadd.f32 %v882_v15, %v820_v55  ;;  %v952_v38 = vadd.f32 %v951_v36, %v921_v29 }
 0x101   : > { %v884_v34 = vadd.f32 %v883_v37, %v1561_v45  ;;  %v953_v40 = vadd.f32 %v952_v38, %v922_v14  ;;  %v927_v45 = vmul.f32 %v1642_v51, %v1642_v51 }
 0x103   : > { %v885_v53 = vadd.f32 %v884_v34, %v1581_v61  ;;  %v954_v33 = vadd.f32 %v953_v40, %v923_v39 }
 0x105   : > { %v955_v20 = vadd.f32 %v954_v33, %v924_v41  ;;  %v886_v43 = vadd.f32 %v885_v53, %v1601_v13 }
 0x107   : > { %v887_v49 = vadd.f32 %v886_v43, %v1621_v30  ;;  %v956_v54 = vadd.f32 %v955_v20, %v925_v42 }
 0x109   : > { %v888_v55 = vadd.f32 %v887_v49, %v1642_v51  ;;  %v957_v56 = vadd.f32 %v956_v54, %v926_v44 }
 0x10b   : > { %v889_v61 = vadd.f32 %v888_v55, %v1665_v12  ;;  %v958_v52 = vadd.f32 %v957_v56, %v927_v45 }
 0x10d   : > { %v959_v58 = vadd.f32 %v958_v52, %v928_v57  ;;  %v890_v13 = vadd.f32 %v889_v61, %v1690_v50 }
 0x10f   : > { %v960_v30 = vadd.f32 %v959_v58, %v929_v59  ;;  %v891_v60 = vadd.f32 %v890_v13, %v828_v11 }
 0x111   : > { %v892_v51 = vadd.f32 %v891_v60, %v1569_v48  ;;  %v961_v3 = vadd.f32 %v960_v30, %v930_v1 }
 0x113   : > { %v893_v12 = vadd.f32 %v892_v51, %v1589_v0  ;;  %v962_v5 = vadd.f32 %v961_v3, %v931_v2 }
 0x115   : > { %v963_v46 = vadd.f32 %v962_v5, %v932_v4  ;;  %v894_v50 = vadd.f32 %v893_v12, %v1609_v16 }
 0x117   : > { %v895_v7 = vadd.f32 %v894_v50, %v1629_v35  ;;  %v964_v48 = vadd.f32 %v963_v46, %v933_v31  ;;  %v937_v35 = vmul.f32 %v1708_v17, %v1708_v17 }
 0x119   : > { %v896_v32 = vadd.f32 %v895_v7, %v1673_v21  ;;  %v965_v0 = vadd.f32 %v964_v48, %v934_v6  ;;  %v938_v21 = vmul.f32 %v1711_v18, %v1711_v18 }
 0x11b   : > { %v897_v9 = vadd.f32 %v896_v32, %v1678_v62  ;;  %v966_v16 = vadd.f32 %v965_v0, %v935_v8 }
 0x11d   : > { %v967_v24 = vadd.f32 %v966_v16, %v936_v10  ;;  %v898_v11 = vadd.f32 %v897_v9, %v1708_v17 }
 0x11f   : > { %v968_v47 = vadd.f32 %v967_v24, %v937_v35  ;;  %v899_v19 = vadd.f32 %v898_v11, %v1711_v18 }
 0x121   : > { %v900_v22 = vrot.slane %v899_v19, 4  ;;  %v969_v63 = vadd.f32 %v968_v47, %v938_v21 }
 0x123   : > { %v901_v23 = vadd.f32 %v900_v22, %v899_v19  ;;  %v970_v25 = vrot.slane %v969_v63, 4 }
 0x125   : > { %v902_v62 = vrot.slane %v901_v23, 2  ;;  %v971_v26 = vadd.f32 %v970_v25, %v969_v63 }
 0x127   : > { %v903_v27 = vadd.f32 %v902_v62, %v901_v23  ;;  %v972_v28 = vrot.slane %v971_v26, 2 }
 0x129   : > { %v904_v17 = vrot.slane %v903_v27, 1  ;;  %v973_v29 = vadd.f32 %v972_v28, %v971_v26 }
 0x12b   : > { %v905_v18 = vadd.f32 %v904_v17, %v903_v27  ;;  %v974_v15 = vrot.slane %v973_v29, 1 }
 0x12d   : > { %906 = vst [vmem:[%s235_s30] sm:$0x1] %v905_v18  ;;  %v975_v36 = vadd.f32 %v974_v15, %v973_v29 }
 0x12f   : > { %976 = vst [vmem:[%s235_s30 + $0x1] sm:$0x1] %v975_v36 }
 0x130   : > { %1354 = shalt.err (!%p1351_p5)
}
 0x131   : > { %1271 = dma.vmem_to_hbm [thread:$0]  (%p1472_p4), %s1000_s5, 128, %s1002_s6, %s983_s18  }
 0x132 PF: > { %p1277_p6 = scmp.ge.s32.totalorder %s1405_s20, 2  ;;  %s1021_s11 = sand.u32 1, %s1385_s15  }
 0x133   : > { %s1022_s21 = scalar_lea.sflag [#allocation4], %s1021_s11 }
 0x134   : > { %p1274_p7 = pnand %p1277_p6, %p1479_p8 }
 0x136   : > { %p1275_p9 = pneg %p1274_p7 }
 0x138   : > { %1380 = dma.done.wait (%p1275_p9), %s1022_s21, 128  }
 0x139   : > { %1382 = vsyncadd (%p1275_p9), %s1022_s21, 4294967168  ;;  %s18_s20 = sadd.s32 1, %s1405_s20   ;;  %s1818_s15 = smov %s1389_s16 }
 0x13a   : > { %p15_p10 = scmp.ge.s32.totalorder %s18_s20, 4   ;;  %s1819_s16 = smov %s1393_s17 }
 0x13b   : > { %s1820_s17 = smov %s1485_s28  ;;  %s1821_s18 = smov %s1401_s19 }
 0x13c   : > { %s1822_s19 = smov %s1824_s23  ;;  %17 = sbr.rel (!%p15_p10) target bundleno = 4 (0x4), region = 90 }
 0x141   :  { %1028 = vsyncpa [#allocation4], 1 }
 0x142   :  { %1030 = vsyncpa [#allocation4 + $0x1], 1 }

// kernel: tile.53
= control target key start
LH: loop header
LB: loop body
LE: loop exit
PB: predicated region body
PF: predicated region fallthrough
CT: control target
= control target key end

     0   :  { %s22_s0 = inlined_call_operand.vmem [shape: f32[16], index: 0, kind: input, shape index: {}]   ;;  %s23_s1 = inlined_call_operand.vmem [shape: f32[8,16], index: 1, kind: output, shape index: {}]  }
   0x1   :  { %v4_v0 = vld [vmem:[%s22_s0] ss:$0 sm:$0xff] }
   0x2   :  { %5 = vst [vmem:[%s23_s1] sm:$0xff] %v4_v0 }

// kernel: tile.58
= control target key start
LH: loop header
LB: loop body
LE: loop exit
PB: predicated region body
PF: predicated region fallthrough
CT: control target
= control target key end

     0   :  { %s67_s10 = smov 112   ;;  %s68_s11 = smov 80   ;;  %vm3_vm0 = vcmask 130048   ;;  %vm9_vm1 = vcmask 1048448   ;;  %vm15_vm2 = vcmask 917248   ;;  %vm21_vm3 = vcmask 786048   ;;  %s111_s0 = inlined_call_operand.vmem [shape: f32[8,16], index: 0, kind: input, shape index: {}]   ;;  %s112_s1 = inlined_call_operand.vmem [shape: f32[1,128], index: 1, kind: output, shape index: {}]  }
   0x1   :  { %v53_v0 = vld [vmem:[%s111_s0 + $0x7] sm:$0x1]   ;;  %v55_v1 = vld [vmem:[%s111_s0 + $0x5] sm:$0x1]   ;;  %v57_v2 = vld [vmem:[%s111_s0 + $0x3] sm:$0x1]  }
   0x2   :  { %7 = vrot.lane.b32.xlu0 %v53_v0, %s67_s10  ;;  %19 = vrot.lane.b32.xlu1 %v55_v1, %s68_s11  ;;  %s69_s14 = smov 48   ;;  %v54_v3 = vld [vmem:[%s111_s0 + $0x6] sm:$0x1]   ;;  %v56_v4 = vld [vmem:[%s111_s0 + $0x4] sm:$0x1]   ;;  %s70_s21 = smov 96  }
   0x3   :  { %31 = vrot.lane.b32.xlu2 %v57_v2, %s69_s14  ;;  %v58_v5 = vld [vmem:[%s111_s0 + $0x2] sm:$0x1]   ;;  %s71_s22 = smov 64   ;;  %s72_s23 = smov 32   ;;  %v59_v6 = vld [vmem:[%s111_s0 + $0x1] sm:$0x1]  }
   0x4   :  { %s73_s26 = smov 16   ;;  %v2_v7 = vld [vmem:[%s111_s0] sm:$0x1]   ;;  %vm27_vm4 = vcmask 654848   ;;  %vm33_vm5 = vcmask 523648   ;;  %vm39_vm6 = vcmask 392448  }
   0x5   :  { %4 = vst.msk [vmem:[#allocation0] sm:$0x1] %vm3_vm0, %v2_v7   ;;  %vm45_vm7 = vcmask 261248  }
   0xa   :  { %13 = vrot.lane.b32.xlu0 %v54_v3, %s70_s21  ;;  %25 = vrot.lane.b32.xlu1 %v56_v4, %s71_s22 }
   0xb   :  { %37 = vrot.lane.b32.xlu2 %v58_v5, %s72_s23 }
  0x12   :  { %43 = vrot.lane.b32.xlu0 %v59_v6, %s73_s26 }
  0x5d   :  { %v32_v8 = vpop.permute.xlu2 %31  }
  0x65   :  { %v38_v9 = vpop.permute.xlu2 %37  }
  0x74   :  { %v8_v10 = vpop.permute.xlu0 %7   ;;  %v20_v11 = vpop.permute.xlu1 %19  }
  0x75   :  { %10 = vst.msk [vmem:[#allocation0] sm:$0x1] %vm9_vm1, %v8_v10  }
  0x7c   :  { %v14_v12 = vpop.permute.xlu0 %13   ;;  %v26_v13 = vpop.permute.xlu1 %25  }
  0x7d   :  { %16 = vst.msk [vmem:[#allocation0] sm:$0x1] %vm15_vm2, %v14_v12  }
  0x7e   :  { %22 = vst.msk [vmem:[#allocation0] sm:$0x1] %vm21_vm3, %v20_v11  }
  0x7f   :  { %28 = vst.msk [vmem:[#allocation0] sm:$0x1] %vm27_vm4, %v26_v13  }
  0x80   :  { %34 = vst.msk [vmem:[#allocation0] sm:$0x1] %vm33_vm5, %v32_v8  }
  0x81   :  { %40 = vst.msk [vmem:[#allocation0] sm:$0x1] %vm39_vm6, %v38_v9  }
  0x84   :  { %v44_v14 = vpop.permute.xlu0 %43  }
  0x85   :  { %46 = vst.msk [vmem:[#allocation0] sm:$0x1] %vm45_vm7, %v44_v14  }
  0x8c   :  { %v49_v15 = vld [vmem:[#allocation0] sm:$0x1] }
  0x8d   :  { %52 = vst [vmem:[%s112_s1] sm:$0x1] %v49_v15 }

// kernel: nlayer_discriminator.20
= control target key start
LH: loop header
LB: loop body
LE: loop exit
PB: predicated region body
PF: predicated region fallthrough
CT: control target
= control target key end

     0   :  { %s80_s0 = inlined_call_operand.vmem [shape: f32[16,128], index: 0, kind: input, shape index: {}]   ;;  %s81_s1 = inlined_call_operand.vmem [shape: f32[1,128], index: 1, kind: input, shape index: {}]   ;;  %s82_s2 = inlined_call_operand.vmem [shape: f32[1,128], index: 2, kind: input, shape index: {}]   ;;  %s83_s3 = inlined_call_operand.vmem [shape: f32[16,128], index: 3, kind: output, shape index: {}]  }
   0x1   :  { %v14_v0 = vld [vmem:[%s80_s0] sm:$0xff]  ;;  %v15_v3 = vld [vmem:[%s80_s0 + $0x8] sm:$0xff] }
   0x2   :  { %v40_v1 = vld [vmem:[%s81_s1] ss:$0 sm:$0xff] }
   0x3   :  { %v41_v2 = vld [vmem:[%s82_s2] ss:$0 sm:$0xff]  ;;  %v20_v4 = vmul.f32 %v40_v1, %v14_v0  ;;  %v21_v5 = vmul.f32 %v40_v1, %v15_v3 }
   0x5   :  { %v26_v6 = vadd.f32 %v41_v2, %v20_v4  ;;  %v27_v7 = vadd.f32 %v41_v2, %v21_v5 }
   0x7   :  { %vm28_vm0 = vcmp.ge.f32.partialorder %v26_v6, 0.0  ;;  %v30_v8 = vmul.f32 0.1, %v26_v6  ;;  %vm29_vm1 = vcmp.ge.f32.partialorder %v27_v7, 0.0  ;;  %v31_v9 = vmul.f32 0.1, %v27_v7 }
   0x9   :  { %v32_v10 = vsel %vm28_vm0, %v26_v6, %v30_v8  ;;  %v33_v11 = vsel %vm29_vm1, %v27_v7, %v31_v9 }
   0xa   :  { %34 = vst [vmem:[%s83_s3] sm:$0xff] %v32_v10 }
   0xb   :  { %35 = vst [vmem:[%s83_s3 + $0x8] sm:$0xff] %v33_v11 }

// kernel: nlayer_discriminator.19
= control target key start
LH: loop header
LB: loop body
LE: loop exit
PB: predicated region body
PF: predicated region fallthrough
CT: control target
= control target key end

     0   :  { %s625_s1 = inlined_call_operand.vmem [shape: bf16[128,128], index: 1, kind: input, shape index: {}]   ;;  %s626_s2 = inlined_call_operand.vmem [shape: f32[1,128], index: 2, kind: input, shape index: {}]   ;;  %s627_s0 = inlined_call_operand.vmem [shape: bf16[128,128], index: 0, kind: input, shape index: {}]   ;;  %s628_s3 = inlined_call_operand.vmem [shape: f32[128,128], index: 3, kind: output, shape index: {0}]   ;;  %s629_s4 = inlined_call_operand.vmem [shape: f32[8,128], index: 4, kind: output, shape index: {1}]  }
   0x1   :  { %v463_v0 = vld [vmem:[%s625_s1 + $0x38] sm:$0xff]  ;;  %v462_v1 = vld [vmem:[%s625_s1 + $0x30] sm:$0xff]  ;;  %v461_v2 = vld [vmem:[%s625_s1 + $0x28] sm:$0xff] }
   0x2   :  { %180 = vmatpush.bf16.msra.mxu0 %v463_v0  ;;  %464 = vmatpush.bf16.msra.mxu1 %v463_v0  ;;  %v460_v3 = vld [vmem:[%s625_s1 + $0x20] sm:$0xff]  ;;  %v459_v4 = vld [vmem:[%s625_s1 + $0x18] sm:$0xff]  ;;  %v458_v5 = vld [vmem:[%s625_s1 + $0x10] sm:$0xff] }
   0x3   :  { %465 = vmatpush.bf16.msra.mxu2 %v463_v0  ;;  %466 = vmatpush.bf16.msra.mxu3 %v463_v0  ;;  %v457_v6 = vld [vmem:[%s625_s1 + $0x8] sm:$0xff]  ;;  %v456_v7 = vld [vmem:[%s625_s1] sm:$0xff]  ;;  %v450_v9 = vld [vmem:[%s627_s0 + $0x10] sm:$0xff] }
   0x4   :  { %v448_v8 = vld [vmem:[%s627_s0] sm:$0xff]  ;;  %v454_v11 = vld [vmem:[%s627_s0 + $0x30] sm:$0xff]  ;;  %v449_v12 = vld [vmem:[%s627_s0 + $0x8] sm:$0xff] }
   0x5   :  { %v452_v10 = vld [vmem:[%s627_s0 + $0x20] sm:$0xff]  ;;  %v451_v13 = vld [vmem:[%s627_s0 + $0x18] sm:$0xff]  ;;  %v453_v14 = vld [vmem:[%s627_s0 + $0x28] sm:$0xff] }
   0x6   :  { %181 = vmatpush.bf16.msra.mxu0 %v462_v1  ;;  %467 = vmatpush.bf16.msra.mxu1 %v462_v1  ;;  %v455_v15 = vld [vmem:[%s627_s0 + $0x38] sm:$0xff]  ;;  %v488_v16 = vld [vmem:[%s626_s2] ss:$0 sm:$0xff] }
   0x7   :  { %468 = vmatpush.bf16.msra.mxu2 %v462_v1  ;;  %469 = vmatpush.bf16.msra.mxu3 %v462_v1 }
   0xa   :  { %182 = vmatpush.bf16.msra.mxu0 %v461_v2  ;;  %470 = vmatpush.bf16.msra.mxu1 %v461_v2 }
   0xb   :  { %471 = vmatpush.bf16.msra.mxu2 %v461_v2  ;;  %472 = vmatpush.bf16.msra.mxu3 %v461_v2 }
   0xe   :  { %183 = vmatpush.bf16.msra.mxu0 %v460_v3  ;;  %473 = vmatpush.bf16.msra.mxu1 %v460_v3 }
   0xf   :  { %474 = vmatpush.bf16.msra.mxu2 %v460_v3  ;;  %475 = vmatpush.bf16.msra.mxu3 %v460_v3 }
  0x12   :  { %184 = vmatpush.bf16.msra.mxu0 %v459_v4  ;;  %476 = vmatpush.bf16.msra.mxu1 %v459_v4 }
  0x13   :  { %477 = vmatpush.bf16.msra.mxu2 %v459_v4  ;;  %478 = vmatpush.bf16.msra.mxu3 %v459_v4 }
  0x16   :  { %185 = vmatpush.bf16.msra.mxu0 %v458_v5  ;;  %479 = vmatpush.bf16.msra.mxu1 %v458_v5 }
  0x17   :  { %480 = vmatpush.bf16.msra.mxu2 %v458_v5  ;;  %481 = vmatpush.bf16.msra.mxu3 %v458_v5 }
  0x1a   :  { %186 = vmatpush.bf16.msra.mxu0 %v457_v6  ;;  %482 = vmatpush.bf16.msra.mxu1 %v457_v6 }
  0x1b   :  { %483 = vmatpush.bf16.msra.mxu2 %v457_v6  ;;  %484 = vmatpush.bf16.msra.mxu3 %v457_v6 }
  0x1e   :  { %187 = vmatpush.bf16.msra.mxu0 %v456_v7  ;;  %485 = vmatpush.bf16.msra.mxu1 %v456_v7 }
  0x1f   :  { %486 = vmatpush.bf16.msra.mxu2 %v456_v7  ;;  %487 = vmatpush.bf16.msra.mxu3 %v456_v7 }
  0x21   :  { %188 = vmatmul.bf16.vlgmr.msra.gmra.mxu0 %v448_v8  ;;  %198 = vmatmul.bf16.vlgmr.msra.gmra.mxu1 %v450_v9 }
  0x22   :  { %208 = vmatmul.bf16.vlgmr.msra.gmra.mxu2 %v452_v10  ;;  %218 = vmatmul.bf16.vlgmr.msra.gmra.mxu3 %v454_v11 }
  0x31   :  { %193 = vmatmul.bf16.gmra.mxu0 %v449_v12  ;;  %203 = vmatmul.bf16.gmra.mxu1 %v451_v13 }
  0x32   :  { %213 = vmatmul.bf16.gmra.mxu2 %v453_v14  ;;  %223 = vmatmul.bf16.gmra.mxu3 %v455_v15 }
  0x9e   :  { %v189_v17 = vpop.f32.mrf.mxu0  ;;  %v199_v18 = vpop.f32.mrf.mxu1 }
  0x9f   :  { %v284_v19 = vadd.f32 %v488_v16, %v189_v17  ;;  %v288_v20 = vadd.f32 %v488_v16, %v199_v18 }
  0xa1   :  { %300 = vst [vmem:[%s628_s3] sm:$0xff] %v284_v19  ;;  %v338_v38 = vmul.f32 %v284_v19, %v284_v19  ;;  %v342_v54 = vmul.f32 %v288_v20, %v288_v20 }
  0xa2   :  { %304 = vst [vmem:[%s628_s3 + $0x20] sm:$0xff] %v288_v20 }
  0xa5   :  { %v209_v21 = vpop.f32.mrf.mxu2  ;;  %v219_v22 = vpop.f32.mrf.mxu3 }
  0xa6   :  { %v191_v23 = vpop.f32.mrf.mxu0  ;;  %v201_v24 = vpop.f32.mrf.mxu1  ;;  %v292_v25 = vadd.f32 %v488_v16, %v209_v21  ;;  %v571_v28 = vadd.f32 %v488_v16, %v219_v22 }
  0xa7   :  { %v285_v26 = vadd.f32 %v488_v16, %v191_v23  ;;  %v289_v27 = vadd.f32 %v488_v16, %v201_v24 }
  0xa8   :  { %308 = vst [vmem:[%s628_s3 + $0x40] sm:$0xff] %v292_v25  ;;  %v346_v6 = vmul.f32 %v292_v25, %v292_v25  ;;  %v350_v18 = vmul.f32 %v571_v28, %v571_v28 }
  0xa9   :  { %301 = vst [vmem:[%s628_s3 + $0x8] sm:$0xff] %v285_v26  ;;  %v339_v37 = vmul.f32 %v285_v26, %v285_v26  ;;  %v316_v39 = vadd.f32 %v285_v26, %v284_v19  ;;  %v343_v57 = vmul.f32 %v289_v27, %v289_v27 }
  0xaa   :  { %305 = vst [vmem:[%s628_s3 + $0x28] sm:$0xff] %v289_v27 }
  0xab   :  { %312 = vst [vmem:[%s628_s3 + $0x60] sm:$0xff] %v571_v28  ;;  %v354_v43 = vadd.f32 %v339_v37, %v338_v38 }
  0xad   :  { %v211_v29 = vpop.f32.mrf.mxu2  ;;  %v221_v30 = vpop.f32.mrf.mxu3 }
  0xae   :  { %v194_v31 = vpop.f32.mrf.mxu0  ;;  %v204_v32 = vpop.f32.mrf.mxu1  ;;  %v293_v33 = vadd.f32 %v488_v16, %v211_v29  ;;  %v297_v36 = vadd.f32 %v488_v16, %v221_v30 }
  0xaf   :  { %v286_v34 = vadd.f32 %v488_v16, %v194_v31  ;;  %v290_v35 = vadd.f32 %v488_v16, %v204_v32 }
  0xb0   :  { %309 = vst [vmem:[%s628_s3 + $0x48] sm:$0xff] %v293_v33  ;;  %v347_v9 = vmul.f32 %v293_v33, %v293_v33  ;;  %v351_v21 = vmul.f32 %v297_v36, %v297_v36 }
  0xb1   :  { %302 = vst [vmem:[%s628_s3 + $0x10] sm:$0xff] %v286_v34  ;;  %v340_v40 = vmul.f32 %v286_v34, %v286_v34  ;;  %v317_v47 = vadd.f32 %v316_v39, %v286_v34  ;;  %v344_v0 = vmul.f32 %v290_v35, %v290_v35 }
  0xb2   :  { %306 = vst [vmem:[%s628_s3 + $0x30] sm:$0xff] %v290_v35 }
  0xb3   :  { %313 = vst [vmem:[%s628_s3 + $0x68] sm:$0xff] %v297_v36  ;;  %v355_v51 = vadd.f32 %v354_v43, %v340_v40 }
  0xb5   :  { %v214_v41 = vpop.f32.mrf.mxu2  ;;  %v224_v42 = vpop.f32.mrf.mxu3 }
  0xb6   :  { %v196_v44 = vpop.f32.mrf.mxu0  ;;  %v206_v45 = vpop.f32.mrf.mxu1  ;;  %v294_v46 = vadd.f32 %v488_v16, %v214_v41  ;;  %v298_v50 = vadd.f32 %v488_v16, %v224_v42 }
  0xb7   :  { %v287_v48 = vadd.f32 %v488_v16, %v196_v44  ;;  %v291_v49 = vadd.f32 %v488_v16, %v206_v45 }
  0xb8   :  { %310 = vst [vmem:[%s628_s3 + $0x50] sm:$0xff] %v294_v46  ;;  %v348_v13 = vmul.f32 %v294_v46, %v294_v46 }
  0xb9   :  { %303 = vst [vmem:[%s628_s3 + $0x18] sm:$0xff] %v287_v48  ;;  %v318_v52 = vadd.f32 %v317_v47, %v287_v48  ;;  %v341_v53 = vmul.f32 %v287_v48, %v287_v48  ;;  %v345_v4 = vmul.f32 %v291_v49, %v291_v49 }
  0xba   :  { %307 = vst [vmem:[%s628_s3 + $0x38] sm:$0xff] %v291_v49 }
  0xbb   :  { %v319_v55 = vadd.f32 %v318_v52, %v288_v20  ;;  %v356_v56 = vadd.f32 %v355_v51, %v341_v53  ;;  %314 = vst [vmem:[%s628_s3 + $0x70] sm:$0xff] %v298_v50 }
  0xbd   :  { %v357_v58 = vadd.f32 %v356_v56, %v342_v54  ;;  %v320_v59 = vadd.f32 %v319_v55, %v289_v27  ;;  %v216_v60 = vpop.f32.mrf.mxu2  ;;  %v226_v61 = vpop.f32.mrf.mxu3 }
  0xbe   :  { %v295_v62 = vadd.f32 %v488_v16, %v216_v60  ;;  %v299_v63 = vadd.f32 %v488_v16, %v226_v61 }
  0xbf   :  { %v321_v1 = vadd.f32 %v320_v59, %v290_v35  ;;  %v358_v2 = vadd.f32 %v357_v58, %v343_v57 }
  0xc0   :  { %311 = vst [vmem:[%s628_s3 + $0x58] sm:$0xff] %v295_v62  ;;  %v349_v17 = vmul.f32 %v295_v62, %v295_v62  ;;  %v353_v30 = vmul.f32 %v299_v63, %v299_v63 }
  0xc1   :  { %v322_v3 = vadd.f32 %v321_v1, %v291_v49  ;;  %v359_v5 = vadd.f32 %v358_v2, %v344_v0  ;;  %315 = vst [vmem:[%s628_s3 + $0x78] sm:$0xff] %v299_v63 }
  0xc3   :  { %v323_v7 = vadd.f32 %v322_v3, %v292_v25  ;;  %v360_v8 = vadd.f32 %v359_v5, %v345_v4  ;;  %v352_v25 = vmul.f32 %v298_v50, %v298_v50 }
  0xc5   :  { %v361_v10 = vadd.f32 %v360_v8, %v346_v6  ;;  %v324_v11 = vadd.f32 %v323_v7, %v293_v33 }
  0xc7   :  { %v325_v12 = vadd.f32 %v324_v11, %v294_v46  ;;  %v362_v14 = vadd.f32 %v361_v10, %v347_v9 }
  0xc9   :  { %v363_v15 = vadd.f32 %v362_v14, %v348_v13  ;;  %v326_v16 = vadd.f32 %v325_v12, %v295_v62 }
  0xcb   :  { %v327_v19 = vadd.f32 %v326_v16, %v571_v28  ;;  %v364_v20 = vadd.f32 %v363_v15, %v349_v17 }
  0xcd   :  { %v365_v22 = vadd.f32 %v364_v20, %v350_v18  ;;  %v328_v23 = vadd.f32 %v327_v19, %v297_v36 }
  0xcf   :  { %v329_v24 = vadd.f32 %v328_v23, %v298_v50  ;;  %v366_v26 = vadd.f32 %v365_v22, %v351_v21 }
  0xd1   :  { %v367_v27 = vadd.f32 %v366_v26, %v352_v25  ;;  %v330_v29 = vadd.f32 %v329_v24, %v299_v63 }
  0xd3   :  { %v331_v31 = vrot.slane %v330_v29, 4  ;;  %v368_v32 = vadd.f32 %v367_v27, %v353_v30 }
  0xd5   :  { %v332_v33 = vadd.f32 %v331_v31, %v330_v29  ;;  %v369_v34 = vrot.slane %v368_v32, 4 }
  0xd7   :  { %v333_v35 = vrot.slane %v332_v33, 2  ;;  %v370_v37 = vadd.f32 %v369_v34, %v368_v32 }
  0xd9   :  { %v334_v38 = vadd.f32 %v333_v35, %v332_v33  ;;  %v371_v39 = vrot.slane %v370_v37, 2 }
  0xdb   :  { %v335_v40 = vrot.slane %v334_v38, 1  ;;  %v372_v28 = vadd.f32 %v371_v39, %v370_v37 }
  0xdd   :  { %v336_v41 = vadd.f32 %v335_v40, %v334_v38  ;;  %v373_v42 = vrot.slane %v372_v28, 1 }
  0xdf   :  { %337 = vst [vmem:[%s629_s4] sm:$0x1] %v336_v41  ;;  %v374_v36 = vadd.f32 %v373_v42, %v372_v28 }
  0xe1   :  { %375 = vst [vmem:[%s629_s4 + $0x1] sm:$0x1] %v374_v36 }

// kernel: nlayer_discriminator.21
= control target key start
LH: loop header
LB: loop body
LE: loop exit
PB: predicated region body
PF: predicated region fallthrough
CT: control target
= control target key end

     0   :  { %s980_s1 = inlined_call_operand.vmem [shape: bf16[256,128], index: 1, kind: input, shape index: {}]   ;;  %s981_s0 = inlined_call_operand.vmem [shape: bf16[128,256], index: 0, kind: input, shape index: {}]   ;;  %s982_s2 = inlined_call_operand.vmem [shape: f32[1,128], index: 2, kind: input, shape index: {}]   ;;  %s983_s3 = inlined_call_operand.vmem [shape: f32[128,128], index: 3, kind: output, shape index: {0}]   ;;  %s984_s4 = inlined_call_operand.vmem [shape: f32[8,128], index: 4, kind: output, shape index: {1}]  }
   0x1   :  { %v680_v0 = vld [vmem:[%s980_s1 + $0x38] sm:$0xff]  ;;  %v679_v2 = vld [vmem:[%s980_s1 + $0x30] sm:$0xff]  ;;  %v678_v4 = vld [vmem:[%s980_s1 + $0x28] sm:$0xff] }
   0x2   :  { %v688_v1 = vld [vmem:[%s980_s1 + $0x78] sm:$0xff]  ;;  %276 = vmatpush.bf16.msra.mxu0 %v680_v0  ;;  %v687_v3 = vld [vmem:[%s980_s1 + $0x70] sm:$0xff]  ;;  %689 = vmatpush.bf16.msra.mxu2 %v680_v0  ;;  %v686_v5 = vld [vmem:[%s980_s1 + $0x68] sm:$0xff] }
   0x3   :  { %325 = vmatpush.bf16.msra.mxu1 %v688_v1  ;;  %697 = vmatpush.bf16.msra.mxu3 %v688_v1  ;;  %v677_v6 = vld [vmem:[%s980_s1 + $0x20] sm:$0xff]  ;;  %v676_v8 = vld [vmem:[%s980_s1 + $0x18] sm:$0xff]  ;;  %v675_v10 = vld [vmem:[%s980_s1 + $0x10] sm:$0xff] }
   0x4   :  { %v685_v7 = vld [vmem:[%s980_s1 + $0x60] sm:$0xff]  ;;  %v684_v9 = vld [vmem:[%s980_s1 + $0x58] sm:$0xff]  ;;  %v683_v11 = vld [vmem:[%s980_s1 + $0x50] sm:$0xff] }
   0x5   :  { %v674_v12 = vld [vmem:[%s980_s1 + $0x8] sm:$0xff]  ;;  %v673_v14 = vld [vmem:[%s980_s1] sm:$0xff]  ;;  %v539_v28 = vld [vmem:[%s981_s0 + $0x10] sm:$0xf] }
   0x6   :  { %277 = vmatpush.bf16.msra.mxu0 %v679_v2  ;;  %690 = vmatpush.bf16.msra.mxu2 %v679_v2  ;;  %v682_v13 = vld [vmem:[%s980_s1 + $0x48] sm:$0xff]  ;;  %v681_v15 = vld [vmem:[%s980_s1 + $0x40] sm:$0xff]  ;;  %v660_v29 = vld [vmem:[%s981_s0 + $0x14] sm:$0xf0] }
   0x7   :  { %326 = vmatpush.bf16.msra.mxu1 %v687_v3  ;;  %698 = vmatpush.bf16.msra.mxu3 %v687_v3  ;;  %v531_v16 = vld [vmem:[%s981_s0] sm:$0xf]  ;;  %v658_v17 = vld [vmem:[%s981_s0 + $0x4] sm:$0xf0]  ;;  %v657_v18 = vld [vmem:[%s981_s0 + $0x4] sm:$0xf]  ;;  %v540_v36 = vor.u32 %v660_v29, %v539_v28 }
   0x8   :  { %v533_v19 = vld [vmem:[%s981_s0 + $0x8] sm:$0xf0]  ;;  %v563_v20 = vld [vmem:[%s981_s0 + $0x40] sm:$0xf]  ;;  %v666_v21 = vld [vmem:[%s981_s0 + $0x44] sm:$0xf0]  ;;  %v532_v24 = vor.u32 %v658_v17, %v531_v16 }
   0x9   :  { %v665_v22 = vld [vmem:[%s981_s0 + $0x44] sm:$0xf]  ;;  %v565_v23 = vld [vmem:[%s981_s0 + $0x48] sm:$0xf0]  ;;  %v536_v25 = vor.u32 %v657_v18, %v533_v19  ;;  %v564_v26 = vor.u32 %v666_v21, %v563_v20  ;;  %v659_v30 = vld [vmem:[%s981_s0 + $0x14] sm:$0xf] }
   0xa   :  { %278 = vmatpush.bf16.msra.mxu0 %v678_v4  ;;  %691 = vmatpush.bf16.msra.mxu2 %v678_v4  ;;  %v568_v27 = vor.u32 %v665_v22, %v565_v23  ;;  %v541_v31 = vld [vmem:[%s981_s0 + $0x18] sm:$0xf0]  ;;  %v571_v32 = vld [vmem:[%s981_s0 + $0x50] sm:$0xf]  ;;  %v668_v33 = vld [vmem:[%s981_s0 + $0x54] sm:$0xf0] }
   0xb   :  { %327 = vmatpush.bf16.msra.mxu1 %v686_v5  ;;  %699 = vmatpush.bf16.msra.mxu3 %v686_v5  ;;  %v667_v34 = vld [vmem:[%s981_s0 + $0x54] sm:$0xf]  ;;  %v573_v35 = vld [vmem:[%s981_s0 + $0x58] sm:$0xf0]  ;;  %v544_v37 = vor.u32 %v659_v30, %v541_v31  ;;  %v572_v38 = vor.u32 %v668_v33, %v571_v32  ;;  %v547_v40 = vld [vmem:[%s981_s0 + $0x20] sm:$0xf] }
   0xc   :  { %v576_v39 = vor.u32 %v667_v34, %v573_v35  ;;  %v662_v41 = vld [vmem:[%s981_s0 + $0x24] sm:$0xf0]  ;;  %v661_v42 = vld [vmem:[%s981_s0 + $0x24] sm:$0xf]  ;;  %v549_v43 = vld [vmem:[%s981_s0 + $0x28] sm:$0xf0] }
   0xd   :  { %v579_v44 = vld [vmem:[%s981_s0 + $0x60] sm:$0xf]  ;;  %v670_v45 = vld [vmem:[%s981_s0 + $0x64] sm:$0xf0]  ;;  %v669_v46 = vld [vmem:[%s981_s0 + $0x64] sm:$0xf]  ;;  %v548_v48 = vor.u32 %v662_v41, %v547_v40  ;;  %v552_v49 = vor.u32 %v661_v42, %v549_v43 }
   0xe   :  { %279 = vmatpush.bf16.msra.mxu0 %v677_v6  ;;  %692 = vmatpush.bf16.msra.mxu2 %v677_v6  ;;  %v581_v47 = vld [vmem:[%s981_s0 + $0x68] sm:$0xf0]  ;;  %v580_v50 = vor.u32 %v670_v45, %v579_v44  ;;  %v555_v52 = vld [vmem:[%s981_s0 + $0x30] sm:$0xf]  ;;  %v664_v53 = vld [vmem:[%s981_s0 + $0x34] sm:$0xf0] }
   0xf   :  { %328 = vmatpush.bf16.msra.mxu1 %v685_v7  ;;  %700 = vmatpush.bf16.msra.mxu3 %v685_v7  ;;  %v584_v51 = vor.u32 %v669_v46, %v581_v47  ;;  %v663_v54 = vld [vmem:[%s981_s0 + $0x34] sm:$0xf]  ;;  %v557_v55 = vld [vmem:[%s981_s0 + $0x38] sm:$0xf0]  ;;  %v587_v56 = vld [vmem:[%s981_s0 + $0x70] sm:$0xf]  ;;  %v556_v60 = vor.u32 %v664_v53, %v555_v52 }
  0x10   :  { %v672_v57 = vld [vmem:[%s981_s0 + $0x74] sm:$0xf0]  ;;  %v671_v58 = vld [vmem:[%s981_s0 + $0x74] sm:$0xf]  ;;  %v589_v59 = vld [vmem:[%s981_s0 + $0x78] sm:$0xf0]  ;;  %v560_v61 = vor.u32 %v663_v54, %v557_v55 }
  0x11   :  { %v588_v62 = vor.u32 %v672_v57, %v587_v56  ;;  %v592_v63 = vor.u32 %v671_v58, %v589_v59  ;;  %v878_v0 = vld [vmem:[%s982_s2] ss:$0 sm:$0xff] }
  0x12   :  { %280 = vmatpush.bf16.msra.mxu0 %v676_v8  ;;  %693 = vmatpush.bf16.msra.mxu2 %v676_v8 }
  0x13   :  { %329 = vmatpush.bf16.msra.mxu1 %v684_v9  ;;  %701 = vmatpush.bf16.msra.mxu3 %v684_v9 }
  0x16   :  { %281 = vmatpush.bf16.msra.mxu0 %v675_v10  ;;  %694 = vmatpush.bf16.msra.mxu2 %v675_v10 }
  0x17   :  { %330 = vmatpush.bf16.msra.mxu1 %v683_v11  ;;  %702 = vmatpush.bf16.msra.mxu3 %v683_v11 }
  0x1a   :  { %282 = vmatpush.bf16.msra.mxu0 %v674_v12  ;;  %695 = vmatpush.bf16.msra.mxu2 %v674_v12 }
  0x1b   :  { %331 = vmatpush.bf16.msra.mxu1 %v682_v13  ;;  %703 = vmatpush.bf16.msra.mxu3 %v682_v13 }
  0x1e   :  { %283 = vmatpush.bf16.msra.mxu0 %v673_v14  ;;  %696 = vmatpush.bf16.msra.mxu2 %v673_v14 }
  0x1f   :  { %332 = vmatpush.bf16.msra.mxu1 %v681_v15  ;;  %704 = vmatpush.bf16.msra.mxu3 %v681_v15 }
  0x21   :  { %284 = vmatmul.bf16.vlgmr.msra.gmra.mxu0 %v532_v24  ;;  %304 = vmatmul.bf16.vlgmr.msra.gmra.mxu2 %v564_v26 }
  0x22   :  { %333 = vmatmul.bf16.vlgmr.msra.gmra.mxu1 %v536_v25  ;;  %353 = vmatmul.bf16.vlgmr.msra.gmra.mxu3 %v568_v27 }
  0x31   :  { %289 = vmatmul.bf16.gmra.mxu0 %v540_v36  ;;  %309 = vmatmul.bf16.gmra.mxu2 %v572_v38 }
  0x32   :  { %338 = vmatmul.bf16.gmra.mxu1 %v544_v37  ;;  %358 = vmatmul.bf16.gmra.mxu3 %v576_v39 }
  0x41   :  { %294 = vmatmul.bf16.gmra.mxu0 %v548_v48  ;;  %314 = vmatmul.bf16.gmra.mxu2 %v580_v50 }
  0x42   :  { %343 = vmatmul.bf16.gmra.mxu1 %v552_v49  ;;  %363 = vmatmul.bf16.gmra.mxu3 %v584_v51 }
  0x51   :  { %299 = vmatmul.bf16.gmra.mxu0 %v556_v60  ;;  %319 = vmatmul.bf16.gmra.mxu2 %v588_v62 }
  0x52   :  { %348 = vmatmul.bf16.gmra.mxu1 %v560_v61  ;;  %368 = vmatmul.bf16.gmra.mxu3 %v592_v63 }
  0x9e   :  { %v285_v1 = vpop.f32.mrf.mxu0 }
  0x9f   :  { %v334_v2 = vpop.f32.mrf.mxu1 }
  0xa0   :  { %v335_v3 = vadd.f32 %v334_v2, %v285_v1 }
  0xa2   :  { %v429_v4 = vadd.f32 %v878_v0, %v335_v3 }
  0xa4   :  { %445 = vst [vmem:[%s983_s3] sm:$0xff] %v429_v4  ;;  %v305_v5 = vpop.f32.mrf.mxu2  ;;  %v483_v51 = vmul.f32 %v429_v4, %v429_v4 }
  0xa5   :  { %v354_v6 = vpop.f32.mrf.mxu3 }
  0xa6   :  { %v287_v7 = vpop.f32.mrf.mxu0  ;;  %v355_v9 = vadd.f32 %v354_v6, %v305_v5 }
  0xa7   :  { %v336_v8 = vpop.f32.mrf.mxu1 }
  0xa8   :  { %v337_v10 = vadd.f32 %v336_v8, %v287_v7  ;;  %v885_v11 = vadd.f32 %v878_v0, %v355_v9 }
  0xaa   :  { %v430_v12 = vadd.f32 %v878_v0, %v337_v10  ;;  %453 = vst [vmem:[%s983_s3 + $0x40] sm:$0xff] %v885_v11 }
  0xac   :  { %446 = vst [vmem:[%s983_s3 + $0x8] sm:$0xff] %v430_v12  ;;  %v307_v13 = vpop.f32.mrf.mxu2  ;;  %v484_v45 = vmul.f32 %v430_v12, %v430_v12  ;;  %v461_v52 = vadd.f32 %v430_v12, %v429_v4 }
  0xad   :  { %v356_v14 = vpop.f32.mrf.mxu3 }
  0xae   :  { %v290_v15 = vpop.f32.mrf.mxu0  ;;  %v357_v17 = vadd.f32 %v356_v14, %v307_v13  ;;  %v499_v56 = vadd.f32 %v484_v45, %v483_v51 }
  0xaf   :  { %v339_v16 = vpop.f32.mrf.mxu1 }
  0xb0   :  { %v340_v18 = vadd.f32 %v339_v16, %v290_v15  ;;  %v896_v19 = vadd.f32 %v878_v0, %v357_v17 }
  0xb2   :  { %v431_v20 = vadd.f32 %v878_v0, %v340_v18  ;;  %454 = vst [vmem:[%s983_s3 + $0x48] sm:$0xff] %v896_v19 }
  0xb4   :  { %447 = vst [vmem:[%s983_s3 + $0x10] sm:$0xff] %v431_v20  ;;  %v310_v21 = vpop.f32.mrf.mxu2  ;;  %v485_v53 = vmul.f32 %v431_v20, %v431_v20  ;;  %v462_v57 = vadd.f32 %v461_v52, %v431_v20 }
  0xb5   :  { %v359_v22 = vpop.f32.mrf.mxu3 }
  0xb6   :  { %v292_v23 = vpop.f32.mrf.mxu0  ;;  %v360_v25 = vadd.f32 %v359_v22, %v310_v21  ;;  %v500_v60 = vadd.f32 %v499_v56, %v485_v53  ;;  %v491_v21 = vmul.f32 %v885_v11, %v885_v11 }
  0xb7   :  { %v341_v24 = vpop.f32.mrf.mxu1 }
  0xb8   :  { %v342_v26 = vadd.f32 %v341_v24, %v292_v23  ;;  %v907_v27 = vadd.f32 %v878_v0, %v360_v25 }
  0xba   :  { %v432_v28 = vadd.f32 %v878_v0, %v342_v26  ;;  %455 = vst [vmem:[%s983_s3 + $0x50] sm:$0xff] %v907_v27 }
  0xbc   :  { %448 = vst [vmem:[%s983_s3 + $0x18] sm:$0xff] %v432_v28  ;;  %v312_v29 = vpop.f32.mrf.mxu2  ;;  %v486_v58 = vmul.f32 %v432_v28, %v432_v28  ;;  %v463_v61 = vadd.f32 %v462_v57, %v432_v28  ;;  %v492_v28 = vmul.f32 %v896_v19, %v896_v19 }
  0xbd   :  { %v361_v30 = vpop.f32.mrf.mxu3 }
  0xbe   :  { %v295_v31 = vpop.f32.mrf.mxu0  ;;  %v362_v33 = vadd.f32 %v361_v30, %v312_v29  ;;  %v501_v63 = vadd.f32 %v500_v60, %v486_v58 }
  0xbf   :  { %v344_v32 = vpop.f32.mrf.mxu1 }
  0xc0   :  { %v345_v34 = vadd.f32 %v344_v32, %v295_v31  ;;  %v918_v35 = vadd.f32 %v878_v0, %v362_v33  ;;  %v493_v32 = vmul.f32 %v907_v27, %v907_v27 }
  0xc2   :  { %v433_v36 = vadd.f32 %v878_v0, %v345_v34  ;;  %456 = vst [vmem:[%s983_s3 + $0x58] sm:$0xff] %v918_v35 }
  0xc4   :  { %449 = vst [vmem:[%s983_s3 + $0x20] sm:$0xff] %v433_v36  ;;  %v315_v37 = vpop.f32.mrf.mxu2  ;;  %v487_v62 = vmul.f32 %v433_v36, %v433_v36  ;;  %v464_v1 = vadd.f32 %v463_v61, %v433_v36 }
  0xc5   :  { %v364_v38 = vpop.f32.mrf.mxu3 }
  0xc6   :  { %v297_v39 = vpop.f32.mrf.mxu0  ;;  %v365_v41 = vadd.f32 %v364_v38, %v315_v37  ;;  %v502_v8 = vadd.f32 %v501_v63, %v487_v62 }
  0xc7   :  { %v346_v40 = vpop.f32.mrf.mxu1 }
  0xc8   :  { %v347_v42 = vadd.f32 %v346_v40, %v297_v39  ;;  %v929_v43 = vadd.f32 %v878_v0, %v365_v41 }
  0xca   :  { %v434_v44 = vadd.f32 %v878_v0, %v347_v42  ;;  %457 = vst [vmem:[%s983_s3 + $0x60] sm:$0xff] %v929_v43 }
  0xcc   :  { %450 = vst [vmem:[%s983_s3 + $0x28] sm:$0xff] %v434_v44  ;;  %v317_v46 = vpop.f32.mrf.mxu2  ;;  %v488_v2 = vmul.f32 %v434_v44, %v434_v44  ;;  %v465_v9 = vadd.f32 %v464_v1, %v434_v44 }
  0xcd   :  { %v366_v47 = vpop.f32.mrf.mxu3 }
  0xce   :  { %v300_v48 = vpop.f32.mrf.mxu0  ;;  %v367_v50 = vadd.f32 %v366_v47, %v317_v46  ;;  %v503_v14 = vadd.f32 %v502_v8, %v488_v2 }
  0xcf   :  { %v349_v49 = vpop.f32.mrf.mxu1 }
  0xd0   :  { %v350_v54 = vadd.f32 %v349_v49, %v300_v48  ;;  %v442_v55 = vadd.f32 %v878_v0, %v367_v50 }
  0xd2   :  { %v435_v59 = vadd.f32 %v878_v0, %v350_v54  ;;  %458 = vst [vmem:[%s983_s3 + $0x68] sm:$0xff] %v442_v55  ;;  %v496_v39 = vmul.f32 %v442_v55, %v442_v55 }
  0xd4   :  { %451 = vst [vmem:[%s983_s3 + $0x30] sm:$0xff] %v435_v59  ;;  %v320_v3 = vpop.f32.mrf.mxu2  ;;  %v489_v10 = vmul.f32 %v435_v59, %v435_v59  ;;  %v466_v15 = vadd.f32 %v465_v9, %v435_v59 }
  0xd5   :  { %v369_v4 = vpop.f32.mrf.mxu3 }
  0xd6   :  { %v302_v5 = vpop.f32.mrf.mxu0  ;;  %v370_v7 = vadd.f32 %v369_v4, %v320_v3  ;;  %v504_v17 = vadd.f32 %v503_v14, %v489_v10 }
  0xd7   :  { %v351_v6 = vpop.f32.mrf.mxu1 }
  0xd8   :  { %v352_v12 = vadd.f32 %v351_v6, %v302_v5  ;;  %v443_v13 = vadd.f32 %v878_v0, %v370_v7 }
  0xda   :  { %v436_v16 = vadd.f32 %v878_v0, %v352_v12  ;;  %459 = vst [vmem:[%s983_s3 + $0x70] sm:$0xff] %v443_v13  ;;  %v497_v42 = vmul.f32 %v443_v13, %v443_v13 }
  0xdc   :  { %452 = vst [vmem:[%s983_s3 + $0x38] sm:$0xff] %v436_v16  ;;  %v467_v18 = vadd.f32 %v466_v15, %v436_v16  ;;  %v490_v20 = vmul.f32 %v436_v16, %v436_v16  ;;  %v322_v24 = vpop.f32.mrf.mxu2 }
  0xdd   :  { %v371_v25 = vpop.f32.mrf.mxu3 }
  0xde   :  { %v468_v22 = vadd.f32 %v467_v18, %v885_v11  ;;  %v505_v23 = vadd.f32 %v504_v17, %v490_v20  ;;  %v372_v26 = vadd.f32 %v371_v25, %v322_v24  ;;  %v494_v11 = vmul.f32 %v918_v35, %v918_v35 }
  0xe0   :  { %v469_v29 = vadd.f32 %v468_v22, %v896_v19  ;;  %v506_v30 = vadd.f32 %v505_v23, %v491_v21  ;;  %v444_v31 = vadd.f32 %v878_v0, %v372_v26  ;;  %v495_v19 = vmul.f32 %v929_v43, %v929_v43 }
  0xe2   :  { %v470_v33 = vadd.f32 %v469_v29, %v907_v27  ;;  %v507_v34 = vadd.f32 %v506_v30, %v492_v28  ;;  %460 = vst [vmem:[%s983_s3 + $0x78] sm:$0xff] %v444_v31  ;;  %v498_v47 = vmul.f32 %v444_v31, %v444_v31 }
  0xe4   :  { %v508_v36 = vadd.f32 %v507_v34, %v493_v32  ;;  %v471_v37 = vadd.f32 %v470_v33, %v918_v35 }
  0xe6   :  { %v472_v0 = vadd.f32 %v471_v37, %v929_v43  ;;  %v509_v38 = vadd.f32 %v508_v36, %v494_v11 }
  0xe8   :  { %v473_v40 = vadd.f32 %v472_v0, %v442_v55  ;;  %v510_v27 = vadd.f32 %v509_v38, %v495_v19 }
  0xea   :  { %v474_v41 = vadd.f32 %v473_v40, %v443_v13  ;;  %v511_v44 = vadd.f32 %v510_v27, %v496_v39 }
  0xec   :  { %v512_v45 = vadd.f32 %v511_v44, %v497_v42  ;;  %v475_v46 = vadd.f32 %v474_v41, %v444_v31 }
  0xee   :  { %v476_v48 = vrot.slane %v475_v46, 4  ;;  %v513_v49 = vadd.f32 %v512_v45, %v498_v47 }
  0xf0   :  { %v477_v50 = vadd.f32 %v476_v48, %v475_v46  ;;  %v514_v51 = vrot.slane %v513_v49, 4 }
  0xf2   :  { %v478_v35 = vrot.slane %v477_v50, 2  ;;  %v515_v52 = vadd.f32 %v514_v51, %v513_v49 }
  0xf4   :  { %v479_v53 = vadd.f32 %v478_v35, %v477_v50  ;;  %v516_v54 = vrot.slane %v515_v52, 2 }
  0xf6   :  { %v480_v56 = vrot.slane %v479_v53, 1  ;;  %v517_v43 = vadd.f32 %v516_v54, %v515_v52 }
  0xf8   :  { %v481_v57 = vadd.f32 %v480_v56, %v479_v53  ;;  %v518_v58 = vrot.slane %v517_v43, 1 }
  0xfa   :  { %482 = vst [vmem:[%s984_s4] sm:$0x1] %v481_v57  ;;  %v519_v55 = vadd.f32 %v518_v58, %v517_v43 }
  0xfc   :  { %520 = vst [vmem:[%s984_s4 + $0x1] sm:$0x1] %v519_v55 }

// kernel: nlayer_discriminator.22
= control target key start
LH: loop header
LB: loop body
LE: loop exit
PB: predicated region body
PF: predicated region fallthrough
CT: control target
= control target key end

     0   :  { %10 = vsyncpa [#allocation4], 0  ;;  %s1684_s0 = inlined_call_operand.vmem [shape: bf16[512,128], index: 0, kind: input, shape index: {}]   ;;  %s1685_s1 = inlined_call_operand.vmem [shape: bf16[128,128], index: 1, kind: input, shape index: {}]   ;;  %s1686_s2 = inlined_call_operand.vmem [shape: f32[1,128], index: 2, kind: input, shape index: {}]   ;;  %s1687_s3 = inlined_call_operand.vmem [shape: f32[512,128], index: 3, kind: output, shape index: {0}]   ;;  %s1688_s4 = inlined_call_operand.hbm [shape: f32[16,128], index: 4, kind: output, shape index: {1}]  }
   0x1   :  { %12 = vsyncpa [#allocation4 + $0x1], 0  ;;  %s1336_s15 = smov 0   ;;  %s1338_s16 = smov 0  }
   0x2   :  { %s1340_s17 = smov 0   ;;  %s1342_s18 = smov 0  }
   0x3   :  { %s1344_s19 = smov 0   ;;  %s1346_s20 = smov 0  }
   0x4 LB: > { %s1016_s21 = sadd.s32 4294967295, %s1309_s20   ;;  %s1017_s22 = sadd.s32 4294967294, %s1309_s20   ;;  %s1309_s20 = sphi %s1346_s20, %s18_s20   ;;  %s1305_s19 = sphi %s1344_s19, %s1695_s19   ;;  %s1301_s18 = sphi %s1342_s18, %s1694_s18   ;;  %s1297_s17 = sphi %s1340_s17, %s1693_s17   ;;  %s1293_s16 = sphi %s1338_s16, %s1692_s16   ;;  %s1289_s15 = sphi %s1336_s15, %s1691_s15  }
   0x5   : > { %s30_s23 = sadd.s32 1, %s1305_s19  ;;  %s138_s24 = sadd.s32 1, %s1297_s17 }
   0x6   : > { %p32_p0 = scmp.ge.s32.totalorder %s30_s23, 2  ;;  %p148_p1 = scmp.ne.s32.totalorder %s1297_s17, %s1293_s16 }
   0x7   : > { %p149_p2 = scmp.eq.s32.totalorder %s1016_s21, 1  ;;  %p154_p3 = scmp.ne.s32.totalorder %s1293_s16, %s1289_s15 }
   0x8   : > { %s1697_s23 = smov (%p32_p0, %s30_s23), 0  ;;  %p155_p5 = scmp.eq.s32.totalorder %s1017_s22, 1 }
   0x9   : > { %p1376_p4 = por %p149_p2, %p148_p1  ;;  %s135_s26 = ssub.s32 %s1305_s19, %s1697_s23 }
   0xa   : > { %p1021_p6 = scmp.ge.s32.totalorder %s1309_s20, 1  ;;  %p136_p7 = scmp.eq.s32.totalorder %s135_s26, 0 }
   0xb   : > { %p1383_p8 = por %p155_p5, %p154_p3  ;;  %p197_p9 = scmp.lt.s32.totalorder %s1309_s20, 3 }
   0xc   : > { %s1389_s28 = scalar_select %p136_p7, %s1297_s17, %s138_s24  }
   0xd   : > { %p198_p10 = pnand %p1021_p6, %p197_p9 }
   0xe   : > { %s1023_s11 = sshll.u32 (!%p198_p10), %s1301_s18, 5  ;;  %s1124_s22 = sshll.u32 (!%p198_p10), %s1301_s18, 3 }
   0xf   : > { %201 = sbr.rel (%p198_p10) target bundleno = 303 (0x12f), region = 32  ;;  %p237_p11 = scmp.lt.s32.totalorder (!%p198_p10), %s1023_s11, 63 }
  0x10   : > { %s901_s29 = scalar_lea.hbm (!%p198_p10), %s1688_s4, %s1124_s22  ;;  %s1251_s12 = scalar_lea.hbm (!%p198_p10), %s1688_s4, 16 }
  0x11   : > { %s905_s6 = sshll.u32 (!%p198_p10), %s901_s29, 4  ;;  %s906_s6 = int_to_ptr.hbm [resolvable:$true] %s905_s6 }
  0x14   : > { %v1150_v0 = vld [vmem:[%s1685_s1 + $0x38] sm:$0xff]  ;;  %v1149_v1 = vld [vmem:[%s1685_s1 + $0x30] sm:$0xff]  ;;  %v1148_v2 = vld [vmem:[%s1685_s1 + $0x28] sm:$0xff]  ;;  %s1699_s11 = smov (!%p237_p11, %s1023_s11), 63 }
  0x15   : > { %517 = vmatpush.bf16.msra.mxu0 %v1150_v0  ;;  %1151 = vmatpush.bf16.msra.mxu1 %v1150_v0  ;;  %v1147_v3 = vld [vmem:[%s1685_s1 + $0x20] sm:$0xff]  ;;  %v1146_v4 = vld [vmem:[%s1685_s1 + $0x18] sm:$0xff]  ;;  %v1145_v5 = vld [vmem:[%s1685_s1 + $0x10] sm:$0xff]  ;;  %s1024_s26 = sshll.u32 %s1699_s11, 2  ;;  %s1026_s8 = sshll.u32 %s1699_s11, 3 }
  0x16   : > { %1152 = vmatpush.bf16.msra.mxu2 %v1150_v0  ;;  %1153 = vmatpush.bf16.msra.mxu3 %v1150_v0  ;;  %v1144_v6 = vld [vmem:[%s1685_s1 + $0x8] sm:$0xff]  ;;  %v1143_v7 = vld [vmem:[%s1685_s1] sm:$0xff]  ;;  %s1422_s7 = scalar_lea.vmem %s1684_s0, %s1024_s26  ;;  %s1449_s14 = scalar_lea.vmem %s1687_s3, %s1026_s8 }
  0x17   : > { %v1127_v8 = vld [vmem:[%s1422_s7] sm:$0xff]  ;;  %v1128_v12 = vld [vmem:[%s1422_s7 + $0x8] sm:$0xff]  ;;  %v1129_v16 = vld [vmem:[%s1422_s7 + $0x10] sm:$0xff]  ;;  %s233_s11 = sand.u32 1, %s1293_s16  }
  0x18   : > { %v1131_v9 = vld [vmem:[%s1422_s7 + $0x20] sm:$0xff]  ;;  %v1132_v13 = vld [vmem:[%s1422_s7 + $0x28] sm:$0xff]  ;;  %v1133_v17 = vld [vmem:[%s1422_s7 + $0x30] sm:$0xff]  ;;  %s1022_s21 = sshll.u32 %s233_s11, 3  ;;  %s887_s18 = scalar_lea.sflag [#allocation4], %s233_s11 }
  0x19   : > { %518 = vmatpush.bf16.msra.mxu0 %v1149_v1  ;;  %1154 = vmatpush.bf16.msra.mxu1 %v1149_v1  ;;  %v1135_v10 = vld [vmem:[%s1422_s7 + $0x40] sm:$0xff]  ;;  %v1136_v14 = vld [vmem:[%s1422_s7 + $0x48] sm:$0xff]  ;;  %v1137_v18 = vld [vmem:[%s1422_s7 + $0x50] sm:$0xff]  ;;  %s235_s30 = scalar_lea.vmem [#allocation3], %s1022_s21 }
  0x1a   : > { %1155 = vmatpush.bf16.msra.mxu2 %v1149_v1  ;;  %1156 = vmatpush.bf16.msra.mxu3 %v1149_v1  ;;  %v1139_v11 = vld [vmem:[%s1422_s7 + $0x60] sm:$0xff]  ;;  %v1140_v15 = vld [vmem:[%s1422_s7 + $0x68] sm:$0xff]  ;;  %v1141_v19 = vld [vmem:[%s1422_s7 + $0x70] sm:$0xff]  ;;  %s903_s5 = sshll.u32 %s235_s30, 4  ;;  %s904_s5 = int_to_ptr.vmem [resolvable:$true] %s903_s5 }
  0x1b   : > { %v1130_v20 = vld [vmem:[%s1422_s7 + $0x18] sm:$0xff]  ;;  %v1444_v24 = vld [vmem:[%s1686_s2] ss:$0 sm:$0xff] }
  0x1c   : > { %v1134_v21 = vld [vmem:[%s1422_s7 + $0x38] sm:$0xff] }
  0x1d   : > { %519 = vmatpush.bf16.msra.mxu0 %v1148_v2  ;;  %1157 = vmatpush.bf16.msra.mxu1 %v1148_v2  ;;  %v1138_v22 = vld [vmem:[%s1422_s7 + $0x58] sm:$0xff] }
  0x1e   : > { %1158 = vmatpush.bf16.msra.mxu2 %v1148_v2  ;;  %1159 = vmatpush.bf16.msra.mxu3 %v1148_v2  ;;  %v1142_v23 = vld [vmem:[%s1422_s7 + $0x78] sm:$0xff]  ;;  %s1245_s7 = sshra.s32 %s906_s6, 4  ;;  %s1246_s7 = int_to_ptr.hbm [resolvable:$true] %s1245_s7 }
  0x1f   : > { %s1247_s8 = scalar_lea.hbm %s1246_s7, 8  ;;  %p1252_p1 = scmp.lt.s32.totalorder %s1246_s7, %s1688_s4 }
  0x20   : > { %p1248_p12 = scmp.ne.s32.totalorder %s1246_s7, %s1247_s8  ;;  %p1253_p2 = scmp.lt.s32.totalorder %s1251_s12, %s1247_s8 }
  0x21   : > { %520 = vmatpush.bf16.msra.mxu0 %v1147_v3  ;;  %1160 = vmatpush.bf16.msra.mxu1 %v1147_v3 }
  0x22   : > { %1161 = vmatpush.bf16.msra.mxu2 %v1147_v3  ;;  %1162 = vmatpush.bf16.msra.mxu3 %v1147_v3  ;;  %p1249_p13 = pnand %p1248_p12, %p1376_p4  ;;  %p1254_p3 = por %p1253_p2, %p1252_p1 }
  0x24   : > { %p1250_p0 = pneg %p1249_p13 }
  0x25   : > { %521 = vmatpush.bf16.msra.mxu0 %v1146_v4  ;;  %1163 = vmatpush.bf16.msra.mxu1 %v1146_v4 }
  0x26   : > { %1164 = vmatpush.bf16.msra.mxu2 %v1146_v4  ;;  %1165 = vmatpush.bf16.msra.mxu3 %v1146_v4  ;;  %p1255_p5 = pnand %p1254_p3, %p1250_p0 }
  0x29   : > { %522 = vmatpush.bf16.msra.mxu0 %v1145_v5  ;;  %1166 = vmatpush.bf16.msra.mxu1 %v1145_v5 }
  0x2a   : > { %1167 = vmatpush.bf16.msra.mxu2 %v1145_v5  ;;  %1168 = vmatpush.bf16.msra.mxu3 %v1145_v5 }
  0x2d   : > { %523 = vmatpush.bf16.msra.mxu0 %v1144_v6  ;;  %1169 = vmatpush.bf16.msra.mxu1 %v1144_v6 }
  0x2e   : > { %1170 = vmatpush.bf16.msra.mxu2 %v1144_v6  ;;  %1171 = vmatpush.bf16.msra.mxu3 %v1144_v6 }
  0x31   : > { %524 = vmatpush.bf16.msra.mxu0 %v1143_v7  ;;  %1172 = vmatpush.bf16.msra.mxu1 %v1143_v7 }
  0x32   : > { %1173 = vmatpush.bf16.msra.mxu2 %v1143_v7  ;;  %1174 = vmatpush.bf16.msra.mxu3 %v1143_v7 }
  0x34   : > { %525 = vmatmul.bf16.vlgmr.msra.gmra.mxu0 %v1127_v8  ;;  %545 = vmatmul.bf16.vlgmr.msra.gmra.mxu1 %v1131_v9 }
  0x35   : > { %565 = vmatmul.bf16.vlgmr.msra.gmra.mxu2 %v1135_v10  ;;  %585 = vmatmul.bf16.vlgmr.msra.gmra.mxu3 %v1139_v11 }
  0x44   : > { %530 = vmatmul.bf16.gmra.mxu0 %v1128_v12  ;;  %550 = vmatmul.bf16.gmra.mxu1 %v1132_v13 }
  0x45   : > { %570 = vmatmul.bf16.gmra.mxu2 %v1136_v14  ;;  %590 = vmatmul.bf16.gmra.mxu3 %v1140_v15 }
  0x54   : > { %535 = vmatmul.bf16.gmra.mxu0 %v1129_v16  ;;  %555 = vmatmul.bf16.gmra.mxu1 %v1133_v17 }
  0x55   : > { %575 = vmatmul.bf16.gmra.mxu2 %v1137_v18  ;;  %595 = vmatmul.bf16.gmra.mxu3 %v1141_v19 }
  0x64   : > { %540 = vmatmul.bf16.gmra.mxu0 %v1130_v20  ;;  %560 = vmatmul.bf16.gmra.mxu1 %v1134_v21 }
  0x65   : > { %580 = vmatmul.bf16.gmra.mxu2 %v1138_v22  ;;  %600 = vmatmul.bf16.gmra.mxu3 %v1142_v23 }
  0xb1   : > { %v526_v25 = vpop.f32.mrf.mxu0  ;;  %v546_v26 = vpop.f32.mrf.mxu1 }
  0xb2   : > { %v1452_v27 = vadd.f32 %v1444_v24, %v526_v25  ;;  %v1455_v28 = vadd.f32 %v1444_v24, %v546_v26 }
  0xb4   : > { %741 = vst [vmem:[%s1449_s14] sm:$0xff] %v1452_v27  ;;  %v811_v5 = vmul.f32 %v1452_v27, %v1452_v27 }
  0xb5   : > { %749 = vst [vmem:[%s1449_s14 + $0x40] sm:$0xff] %v1455_v28 }
  0xb8   : > { %v566_v29 = vpop.f32.mrf.mxu2  ;;  %v586_v35 = vpop.f32.mrf.mxu3 }
  0xb9   : > { %v528_v30 = vpop.f32.mrf.mxu0  ;;  %v548_v31 = vpop.f32.mrf.mxu1  ;;  %v1462_v32 = vadd.f32 %v1444_v24, %v566_v29  ;;  %v1474_v36 = vadd.f32 %v1444_v24, %v586_v35 }
  0xba   : > { %v710_v33 = vadd.f32 %v1444_v24, %v528_v30  ;;  %v1466_v34 = vadd.f32 %v1444_v24, %v548_v31 }
  0xbb   : > { %757 = vst [vmem:[%s1449_s14 + $0x80] sm:$0xff] %v1462_v32 }
  0xbc   : > { %742 = vst [vmem:[%s1449_s14 + $0x8] sm:$0xff] %v710_v33  ;;  %v812_v4 = vmul.f32 %v710_v33, %v710_v33  ;;  %v773_v6 = vadd.f32 %v710_v33, %v1452_v27 }
  0xbd   : > { %750 = vst [vmem:[%s1449_s14 + $0x48] sm:$0xff] %v1466_v34 }
  0xbe   : > { %765 = vst [vmem:[%s1449_s14 + $0xc0] sm:$0xff] %v1474_v36  ;;  %v843_v9 = vadd.f32 %v812_v4, %v811_v5 }
  0xc0   : > { %v568_v37 = vpop.f32.mrf.mxu2  ;;  %v588_v43 = vpop.f32.mrf.mxu3 }
  0xc1   : > { %v531_v38 = vpop.f32.mrf.mxu0  ;;  %v551_v39 = vpop.f32.mrf.mxu1  ;;  %v1479_v40 = vadd.f32 %v1444_v24, %v568_v37  ;;  %v1488_v44 = vadd.f32 %v1444_v24, %v588_v43 }
  0xc2   : > { %v711_v41 = vadd.f32 %v1444_v24, %v531_v38  ;;  %v1483_v42 = vadd.f32 %v1444_v24, %v551_v39 }
  0xc3   : > { %758 = vst [vmem:[%s1449_s14 + $0x88] sm:$0xff] %v1479_v40 }
  0xc4   : > { %743 = vst [vmem:[%s1449_s14 + $0x10] sm:$0xff] %v711_v41  ;;  %v813_v7 = vmul.f32 %v711_v41, %v711_v41  ;;  %v774_v10 = vadd.f32 %v773_v6, %v711_v41 }
  0xc5   : > { %751 = vst [vmem:[%s1449_s14 + $0x50] sm:$0xff] %v1483_v42 }
  0xc6   : > { %766 = vst [vmem:[%s1449_s14 + $0xc8] sm:$0xff] %v1488_v44  ;;  %v844_v20 = vadd.f32 %v843_v9, %v813_v7 }
  0xc8   : > { %v571_v45 = vpop.f32.mrf.mxu2  ;;  %v591_v51 = vpop.f32.mrf.mxu3 }
  0xc9   : > { %v533_v46 = vpop.f32.mrf.mxu0  ;;  %v553_v47 = vpop.f32.mrf.mxu1  ;;  %v1496_v48 = vadd.f32 %v1444_v24, %v571_v45  ;;  %v1515_v58 = vadd.f32 %v1444_v24, %v591_v51  ;;  %v819_v51 = vmul.f32 %v1455_v28, %v1455_v28 }
  0xca   : > { %v712_v49 = vadd.f32 %v1444_v24, %v533_v46  ;;  %v1500_v50 = vadd.f32 %v1444_v24, %v553_v47 }
  0xcb   : > { %759 = vst [vmem:[%s1449_s14 + $0x90] sm:$0xff] %v1496_v48 }
  0xcc   : > { %744 = vst [vmem:[%s1449_s14 + $0x18] sm:$0xff] %v712_v49  ;;  %v814_v14 = vmul.f32 %v712_v49, %v712_v49  ;;  %v775_v21 = vadd.f32 %v774_v10, %v712_v49 }
  0xcd   : > { %752 = vst [vmem:[%s1449_s14 + $0x58] sm:$0xff] %v1500_v50 }
  0xce   : > { %767 = vst [vmem:[%s1449_s14 + $0xd0] sm:$0xff] %v1515_v58  ;;  %v845_v23 = vadd.f32 %v844_v20, %v814_v14 }
  0xd0   : > { %v573_v52 = vpop.f32.mrf.mxu2  ;;  %v593_v59 = vpop.f32.mrf.mxu3 }
  0xd1   : > { %v536_v53 = vpop.f32.mrf.mxu0  ;;  %v556_v54 = vpop.f32.mrf.mxu1  ;;  %v1508_v55 = vadd.f32 %v1444_v24, %v573_v52  ;;  %v1520_v60 = vadd.f32 %v1444_v24, %v593_v59 }
  0xd2   : > { %v713_v56 = vadd.f32 %v1444_v24, %v536_v53  ;;  %v1512_v57 = vadd.f32 %v1444_v24, %v556_v54  ;;  %v820_v54 = vmul.f32 %v1466_v34, %v1466_v34 }
  0xd3   : > { %760 = vst [vmem:[%s1449_s14 + $0x98] sm:$0xff] %v1508_v55 }
  0xd4   : > { %745 = vst [vmem:[%s1449_s14 + $0x20] sm:$0xff] %v713_v56  ;;  %v815_v22 = vmul.f32 %v713_v56, %v713_v56  ;;  %v776_v25 = vadd.f32 %v775_v21, %v713_v56  ;;  %v827_v21 = vmul.f32 %v1462_v32, %v1462_v32 }
  0xd5   : > { %753 = vst [vmem:[%s1449_s14 + $0x60] sm:$0xff] %v1512_v57 }
  0xd6   : > { %768 = vst [vmem:[%s1449_s14 + $0xd8] sm:$0xff] %v1520_v60  ;;  %v846_v27 = vadd.f32 %v845_v23, %v815_v22 }
  0xd8   : > { %v576_v61 = vpop.f32.mrf.mxu2  ;;  %v596_v3 = vpop.f32.mrf.mxu3 }
  0xd9   : > { %v538_v62 = vpop.f32.mrf.mxu0  ;;  %v558_v63 = vpop.f32.mrf.mxu1  ;;  %v1530_v0 = vadd.f32 %v1444_v24, %v576_v61  ;;  %v1550_v17 = vadd.f32 %v1444_v24, %v596_v3 }
  0xda   : > { %v714_v1 = vadd.f32 %v1444_v24, %v538_v62  ;;  %v1534_v2 = vadd.f32 %v1444_v24, %v558_v63  ;;  %v821_v63 = vmul.f32 %v1483_v42, %v1483_v42 }
  0xdb   : > { %761 = vst [vmem:[%s1449_s14 + $0xa0] sm:$0xff] %v1530_v0 }
  0xdc   : > { %746 = vst [vmem:[%s1449_s14 + $0x28] sm:$0xff] %v714_v1  ;;  %v816_v26 = vmul.f32 %v714_v1, %v714_v1  ;;  %v777_v29 = vadd.f32 %v776_v25, %v714_v1 }
  0xdd   : > { %754 = vst [vmem:[%s1449_s14 + $0x68] sm:$0xff] %v1534_v2 }
  0xde   : > { %769 = vst [vmem:[%s1449_s14 + $0xe0] sm:$0xff] %v1550_v17  ;;  %v847_v38 = vadd.f32 %v846_v27, %v816_v26 }
  0xe0   : > { %v578_v8 = vpop.f32.mrf.mxu2  ;;  %v598_v18 = vpop.f32.mrf.mxu3 }
  0xe1   : > { %v541_v11 = vpop.f32.mrf.mxu0  ;;  %v561_v12 = vpop.f32.mrf.mxu1  ;;  %v1545_v13 = vadd.f32 %v1444_v24, %v578_v8  ;;  %v1555_v19 = vadd.f32 %v1444_v24, %v598_v18 }
  0xe2   : > { %v715_v15 = vadd.f32 %v1444_v24, %v541_v11  ;;  %v723_v16 = vadd.f32 %v1444_v24, %v561_v12 }
  0xe3   : > { %762 = vst [vmem:[%s1449_s14 + $0xa8] sm:$0xff] %v1545_v13 }
  0xe4   : > { %747 = vst [vmem:[%s1449_s14 + $0x30] sm:$0xff] %v715_v15  ;;  %v817_v30 = vmul.f32 %v715_v15, %v715_v15  ;;  %v778_v39 = vadd.f32 %v777_v29, %v715_v15  ;;  %v825_v14 = vmul.f32 %v723_v16, %v723_v16  ;;  %v830_v29 = vmul.f32 %v1508_v55, %v1508_v55 }
  0xe5   : > { %755 = vst [vmem:[%s1449_s14 + $0x70] sm:$0xff] %v723_v16 }
  0xe6   : > { %770 = vst [vmem:[%s1449_s14 + $0xe8] sm:$0xff] %v1555_v19  ;;  %v848_v46 = vadd.f32 %v847_v38, %v817_v30  ;;  %v832_v38 = vmul.f32 %v1545_v13, %v1545_v13 }
  0xe8   : > { %v581_v31 = vpop.f32.mrf.mxu2  ;;  %v601_v45 = vpop.f32.mrf.mxu3 }
  0xe9   : > { %v543_v33 = vpop.f32.mrf.mxu0  ;;  %v563_v35 = vpop.f32.mrf.mxu1  ;;  %v1564_v37 = vadd.f32 %v1444_v24, %v581_v31 }
  0xea   : > { %v716_v41 = vadd.f32 %v1444_v24, %v543_v33  ;;  %v724_v43 = vadd.f32 %v1444_v24, %v563_v35 }
  0xeb   : > { %763 = vst [vmem:[%s1449_s14 + $0xb0] sm:$0xff] %v1564_v37 }
  0xec   : > { %748 = vst [vmem:[%s1449_s14 + $0x38] sm:$0xff] %v716_v41  ;;  %v779_v47 = vadd.f32 %v778_v39, %v716_v41  ;;  %v818_v49 = vmul.f32 %v716_v41, %v716_v41  ;;  %v826_v20 = vmul.f32 %v724_v43, %v724_v43 }
  0xed   : > { %756 = vst [vmem:[%s1449_s14 + $0x78] sm:$0xff] %v724_v43 }
  0xee   : > { %v780_v52 = vadd.f32 %v779_v47, %v1455_v28  ;;  %v849_v53 = vadd.f32 %v848_v46, %v818_v49  ;;  %v1583_v28 = vadd.f32 %v1444_v24, %v601_v45  ;;  %v835_v47 = vmul.f32 %v1474_v36, %v1474_v36 }
  0xf0   : > { %v781_v56 = vadd.f32 %v780_v52, %v1466_v34  ;;  %v850_v59 = vadd.f32 %v849_v53, %v819_v51  ;;  %v583_v61 = vpop.f32.mrf.mxu2  ;;  %v603_v4 = vpop.f32.mrf.mxu3  ;;  %v822_v34 = vmul.f32 %v1500_v50, %v1500_v50  ;;  %771 = vst [vmem:[%s1449_s14 + $0xf0] sm:$0xff] %v1583_v28  ;;  %v836_v51 = vmul.f32 %v1488_v44, %v1488_v44 }
  0xf1   : > { %v732_v62 = vadd.f32 %v1444_v24, %v583_v61  ;;  %v1587_v5 = vadd.f32 %v1444_v24, %v603_v4  ;;  %v824_v24 = vmul.f32 %v1534_v2, %v1534_v2  ;;  %v837_v53 = vmul.f32 %v1515_v58, %v1515_v58 }
  0xf2   : > { %v782_v1 = vadd.f32 %v781_v56, %v1483_v42  ;;  %v851_v3 = vadd.f32 %v850_v59, %v820_v54  ;;  %v823_v42 = vmul.f32 %v1512_v57, %v1512_v57  ;;  %v838_v56 = vmul.f32 %v1520_v60, %v1520_v60 }
  0xf3   : > { %764 = vst [vmem:[%s1449_s14 + $0xb8] sm:$0xff] %v732_v62  ;;  %v834_v46 = vmul.f32 %v732_v62, %v732_v62  ;;  %v839_v61 = vmul.f32 %v1550_v17, %v1550_v17 }
  0xf4   : > { %v852_v6 = vadd.f32 %v851_v3, %v821_v63  ;;  %v783_v7 = vadd.f32 %v782_v1, %v1500_v50  ;;  %772 = vst [vmem:[%s1449_s14 + $0xf8] sm:$0xff] %v1587_v5  ;;  %v840_v1 = vmul.f32 %v1555_v19, %v1555_v19 }
  0xf6   : > { %v784_v8 = vadd.f32 %v783_v7, %v1512_v57  ;;  %v853_v9 = vadd.f32 %v852_v6, %v822_v34  ;;  %v828_v57 = vmul.f32 %v1479_v40, %v1479_v40 }
  0xf8   : > { %v785_v10 = vadd.f32 %v784_v8, %v1534_v2  ;;  %v854_v11 = vadd.f32 %v853_v9, %v823_v42  ;;  %v829_v2 = vmul.f32 %v1496_v48, %v1496_v48 }
  0xfa   : > { %v786_v12 = vadd.f32 %v785_v10, %v723_v16  ;;  %v855_v15 = vadd.f32 %v854_v11, %v824_v24 }
  0xfc   : > { %v856_v50 = vadd.f32 %v855_v15, %v825_v14  ;;  %v787_v18 = vadd.f32 %v786_v12, %v724_v43  ;;  %v833_v43 = vmul.f32 %v1564_v37, %v1564_v37 }
  0xfe   : > { %v788_v22 = vadd.f32 %v787_v18, %v1462_v32  ;;  %v857_v23 = vadd.f32 %v856_v50, %v826_v20  ;;  %v831_v32 = vmul.f32 %v1530_v0, %v1530_v0 }
 0x100   : > { %v789_v25 = vadd.f32 %v788_v22, %v1479_v40  ;;  %v858_v26 = vadd.f32 %v857_v23, %v827_v21 }
 0x102   : > { %v859_v16 = vadd.f32 %v858_v26, %v828_v57  ;;  %v790_v27 = vadd.f32 %v789_v25, %v1496_v48 }
 0x104   : > { %v791_v30 = vadd.f32 %v790_v27, %v1508_v55  ;;  %v860_v31 = vadd.f32 %v859_v16, %v829_v2 }
 0x106   : > { %v792_v33 = vadd.f32 %v791_v30, %v1530_v0  ;;  %v861_v35 = vadd.f32 %v860_v31, %v830_v29 }
 0x108   : > { %v793_v40 = vadd.f32 %v792_v33, %v1545_v13  ;;  %v862_v39 = vadd.f32 %v861_v35, %v831_v32 }
 0x10a   : > { %v863_v41 = vadd.f32 %v862_v39, %v832_v38  ;;  %v794_v48 = vadd.f32 %v793_v40, %v1564_v37 }
 0x10c   : > { %v864_v55 = vadd.f32 %v863_v41, %v833_v43  ;;  %v795_v45 = vadd.f32 %v794_v48, %v732_v62 }
 0x10e   : > { %v796_v0 = vadd.f32 %v795_v45, %v1474_v36  ;;  %v865_v49 = vadd.f32 %v864_v55, %v834_v46 }
 0x110   : > { %v797_v13 = vadd.f32 %v796_v0, %v1488_v44  ;;  %v866_v52 = vadd.f32 %v865_v49, %v835_v47 }
 0x112   : > { %v867_v54 = vadd.f32 %v866_v52, %v836_v51  ;;  %v798_v37 = vadd.f32 %v797_v13, %v1515_v58 }
 0x114   : > { %v799_v59 = vadd.f32 %v798_v37, %v1520_v60  ;;  %v868_v36 = vadd.f32 %v867_v54, %v837_v53  ;;  %v841_v60 = vmul.f32 %v1583_v28, %v1583_v28 }
 0x116   : > { %v800_v62 = vadd.f32 %v799_v59, %v1550_v17  ;;  %v869_v44 = vadd.f32 %v868_v36, %v838_v56  ;;  %v842_v17 = vmul.f32 %v1587_v5, %v1587_v5 }
 0x118   : > { %v801_v63 = vadd.f32 %v800_v62, %v1555_v19  ;;  %v870_v58 = vadd.f32 %v869_v44, %v839_v61 }
 0x11a   : > { %v871_v3 = vadd.f32 %v870_v58, %v840_v1  ;;  %v802_v4 = vadd.f32 %v801_v63, %v1583_v28 }
 0x11c   : > { %v872_v34 = vadd.f32 %v871_v3, %v841_v60  ;;  %v803_v6 = vadd.f32 %v802_v4, %v1587_v5 }
 0x11e   : > { %v804_v7 = vrot.slane %v803_v6, 4  ;;  %v873_v42 = vadd.f32 %v872_v34, %v842_v17 }
 0x120   : > { %v805_v8 = vadd.f32 %v804_v7, %v803_v6  ;;  %v874_v9 = vrot.slane %v873_v42, 4 }
 0x122   : > { %v806_v19 = vrot.slane %v805_v8, 2  ;;  %v875_v24 = vadd.f32 %v874_v9, %v873_v42 }
 0x124   : > { %v807_v10 = vadd.f32 %v806_v19, %v805_v8  ;;  %v876_v11 = vrot.slane %v875_v24, 2 }
 0x126   : > { %v808_v28 = vrot.slane %v807_v10, 1  ;;  %v877_v12 = vadd.f32 %v876_v11, %v875_v24 }
 0x128   : > { %v809_v5 = vadd.f32 %v808_v28, %v807_v10  ;;  %v878_v14 = vrot.slane %v877_v12, 1 }
 0x12a   : > { %810 = vst [vmem:[%s235_s30] sm:$0x1] %v809_v5  ;;  %v879_v15 = vadd.f32 %v878_v14, %v877_v12 }
 0x12c   : > { %880 = vst [vmem:[%s235_s30 + $0x1] sm:$0x1] %v879_v15 }
 0x12d   : > { %1258 = shalt.err (!%p1255_p5)
}
 0x12e   : > { %1175 = dma.vmem_to_hbm [thread:$0]  (%p1376_p4), %s904_s5, 128, %s906_s6, %s887_s18  }
 0x12f PF: > { %p1181_p6 = scmp.ge.s32.totalorder %s1309_s20, 2  ;;  %s925_s11 = sand.u32 1, %s1289_s15  }
 0x130   : > { %s926_s21 = scalar_lea.sflag [#allocation4], %s925_s11 }
 0x131   : > { %p1178_p7 = pnand %p1181_p6, %p1383_p8 }
 0x133   : > { %p1179_p9 = pneg %p1178_p7 }
 0x135   : > { %1284 = dma.done.wait (%p1179_p9), %s926_s21, 128  }
 0x136   : > { %1286 = vsyncadd (%p1179_p9), %s926_s21, 4294967168  ;;  %s18_s20 = sadd.s32 1, %s1309_s20   ;;  %s1691_s15 = smov %s1293_s16 }
 0x137   : > { %p15_p10 = scmp.ge.s32.totalorder %s18_s20, 4   ;;  %s1692_s16 = smov %s1297_s17 }
 0x138   : > { %s1693_s17 = smov %s1389_s28  ;;  %s1694_s18 = smov %s1305_s19 }
 0x139   : > { %s1695_s19 = smov %s1697_s23  ;;  %17 = sbr.rel (!%p15_p10) target bundleno = 4 (0x4), region = 90 }
 0x13e   :  { %932 = vsyncpa [#allocation4], 1 }
 0x13f   :  { %934 = vsyncpa [#allocation4 + $0x1], 1 }

// kernel: nlayer_discriminator.23
= control target key start
LH: loop header
LB: loop body
LE: loop exit
PB: predicated region body
PF: predicated region fallthrough
CT: control target
= control target key end

     0   :  { %s74_s0 = inlined_call_operand.vmem [shape: f32[16,512], index: 0, kind: input, shape index: {}]   ;;  %s75_s1 = inlined_call_operand.vmem [shape: f32[16,256], index: 1, kind: output, shape index: {}]  }
   0x1   :  { %v8_v0 = vld [vmem:[%s74_s0] sm:$0xff]  ;;  %v10_v1 = vld [vmem:[%s74_s0 + $0x10] sm:$0xff]  ;;  %v9_v2 = vld [vmem:[%s74_s0 + $0x8] sm:$0xff] }
   0x2   :  { %v16_v3 = vmax.f32 %v8_v0, %v10_v1  ;;  %v11_v4 = vld [vmem:[%s74_s0 + $0x18] sm:$0xff]  ;;  %v12_v5 = vld [vmem:[%s74_s0 + $0x20] sm:$0xff]  ;;  %v14_v6 = vld [vmem:[%s74_s0 + $0x30] sm:$0xff] }
   0x3   :  { %v17_v7 = vmax.f32 %v9_v2, %v11_v4  ;;  %v18_v8 = vmax.f32 %v12_v5, %v14_v6  ;;  %v13_v9 = vld [vmem:[%s74_s0 + $0x28] sm:$0xff]  ;;  %v15_v10 = vld [vmem:[%s74_s0 + $0x38] sm:$0xff] }
   0x4   :  { %20 = vst [vmem:[%s75_s1] sm:$0xff] %v16_v3  ;;  %v19_v11 = vmax.f32 %v13_v9, %v15_v10 }
   0x5   :  { %21 = vst [vmem:[%s75_s1 + $0x8] sm:$0xff] %v17_v7 }
   0x6   :  { %22 = vst [vmem:[%s75_s1 + $0x10] sm:$0xff] %v18_v8 }
   0x7   :  { %23 = vst [vmem:[%s75_s1 + $0x18] sm:$0xff] %v19_v11 }

// kernel: nlayer_discriminator.25
= control target key start
LH: loop header
LB: loop body
LE: loop exit
PB: predicated region body
PF: predicated region fallthrough
CT: control target
= control target key end

     0   :  { %s98_s0 = inlined_call_operand.vmem [shape: f32[16,128], index: 0, kind: input, shape index: {}]   ;;  %s99_s1 = inlined_call_operand.vmem [shape: f32[1,128], index: 1, kind: input, shape index: {}]   ;;  %s100_s2 = inlined_call_operand.vmem [shape: f32[1,128], index: 2, kind: input, shape index: {}]   ;;  %s101_s3 = inlined_call_operand.vmem [shape: f32[16,128], index: 3, kind: input, shape index: {}]   ;;  %s102_s4 = inlined_call_operand.vmem [shape: f32[16,128], index: 4, kind: output, shape index: {}]  }
   0x1   :  { %v17_v0 = vld [vmem:[%s98_s0] sm:$0xff]  ;;  %v18_v4 = vld [vmem:[%s98_s0 + $0x8] sm:$0xff] }
   0x2   :  { %v47_v1 = vld [vmem:[%s99_s1] ss:$0 sm:$0xff]  ;;  %v32_v8 = vld [vmem:[%s101_s3 + $0x8] sm:$0xff] }
   0x3   :  { %v48_v2 = vld [vmem:[%s100_s2] ss:$0 sm:$0xff]  ;;  %v23_v3 = vmul.f32 %v47_v1, %v17_v0  ;;  %v24_v6 = vmul.f32 %v47_v1, %v18_v4 }
   0x4   :  { %v31_v5 = vld [vmem:[%s101_s3] sm:$0xff] }
   0x5   :  { %v29_v7 = vadd.f32 %v48_v2, %v23_v3  ;;  %v30_v9 = vadd.f32 %v48_v2, %v24_v6 }
   0x7   :  { %v33_v10 = vadd.f32 %v31_v5, %v29_v7  ;;  %v34_v11 = vadd.f32 %v32_v8, %v30_v9 }
   0x9   :  { %vm35_vm0 = vcmp.ge.f32.partialorder %v33_v10, 0.0  ;;  %v37_v12 = vmul.f32 0.1, %v33_v10  ;;  %vm36_vm1 = vcmp.ge.f32.partialorder %v34_v11, 0.0  ;;  %v38_v13 = vmul.f32 0.1, %v34_v11 }
   0xb   :  { %v39_v14 = vsel %vm35_vm0, %v33_v10, %v37_v12  ;;  %v40_v15 = vsel %vm36_vm1, %v34_v11, %v38_v13 }
   0xc   :  { %41 = vst [vmem:[%s102_s4] sm:$0xff] %v39_v14 }
   0xd   :  { %42 = vst [vmem:[%s102_s4 + $0x8] sm:$0xff] %v40_v15 }

// kernel: nlayer_discriminator.24
= control target key start
LH: loop header
LB: loop body
LE: loop exit
PB: predicated region body
PF: predicated region fallthrough
CT: control target
= control target key end

     0   :  { %s126_s10 = smov 112   ;;  %vm104_vm0 = vcmask 130048   ;;  %s265_s0 = inlined_call_operand.vmem [shape: f32[128,32], index: 0, kind: input, shape index: {}]   ;;  %s266_s1 = inlined_call_operand.vmem [shape: f32[128,16], index: 1, kind: output, shape index: {}]  }
   0x1   :  { %v8_v0 = vld [vmem:[%s265_s0] sm:$0xff]  ;;  %v10_v1 = vld [vmem:[%s265_s0 + $0x10] sm:$0xff]  ;;  %v9_v3 = vld [vmem:[%s265_s0 + $0x8] sm:$0xff] }
   0x2   :  { %40 = vrot.lane.b32.xlu0 %v8_v0, %s126_s10  ;;  %44 = vrot.lane.b32.xlu1 %v10_v1, %s126_s10  ;;  %v12_v2 = vld [vmem:[%s265_s0 + $0x20] sm:$0xff]  ;;  %v11_v4 = vld [vmem:[%s265_s0 + $0x18] sm:$0xff] }
   0x3   :  { %48 = vrot.lane.b32.xlu2 %v12_v2, %s126_s10  ;;  %v13_v5 = vld [vmem:[%s265_s0 + $0x28] sm:$0xff]  ;;  %v14_v6 = vld [vmem:[%s265_s0 + $0x30] sm:$0xff]  ;;  %v15_v7 = vld [vmem:[%s265_s0 + $0x38] sm:$0xff] }
   0x4   :  { %v16_v8 = vld [vmem:[%s265_s0 + $0x40] sm:$0xff]  ;;  %v17_v9 = vld [vmem:[%s265_s0 + $0x48] sm:$0xff]  ;;  %v18_v10 = vld [vmem:[%s265_s0 + $0x50] sm:$0xff] }
   0x5   :  { %v19_v11 = vld [vmem:[%s265_s0 + $0x58] sm:$0xff]  ;;  %v20_v12 = vld [vmem:[%s265_s0 + $0x60] sm:$0xff]  ;;  %v21_v13 = vld [vmem:[%s265_s0 + $0x68] sm:$0xff] }
   0x6   :  { %v22_v14 = vld [vmem:[%s265_s0 + $0x70] sm:$0xff]  ;;  %v23_v15 = vld [vmem:[%s265_s0 + $0x78] sm:$0xff] }
   0xa   :  { %42 = vrot.lane.b32.xlu0 %v9_v3, %s126_s10  ;;  %46 = vrot.lane.b32.xlu1 %v11_v4, %s126_s10 }
   0xb   :  { %50 = vrot.lane.b32.xlu2 %v13_v5, %s126_s10 }
  0x12   :  { %52 = vrot.lane.b32.xlu0 %v14_v6, %s126_s10  ;;  %54 = vrot.lane.b32.xlu1 %v15_v7, %s126_s10 }
  0x13   :  { %56 = vrot.lane.b32.xlu2 %v16_v8, %s126_s10 }
  0x1a   :  { %58 = vrot.lane.b32.xlu0 %v17_v9, %s126_s10  ;;  %60 = vrot.lane.b32.xlu1 %v18_v10, %s126_s10 }
  0x1b   :  { %62 = vrot.lane.b32.xlu2 %v19_v11, %s126_s10 }
  0x22   :  { %64 = vrot.lane.b32.xlu0 %v20_v12, %s126_s10  ;;  %66 = vrot.lane.b32.xlu1 %v21_v13, %s126_s10 }
  0x23   :  { %68 = vrot.lane.b32.xlu2 %v22_v14, %s126_s10 }
  0x2a   :  { %70 = vrot.lane.b32.xlu0 %v23_v15, %s126_s10 }
  0x5d   :  { %v49_v16 = vpop.permute.xlu2 %48 }
  0x5e   :  { %v92_v17 = vmax.f32 %v12_v2, %v49_v16 }
  0x60   :  { %109 = vst.msk [vmem:[%s266_s1 + $0x20] sm:$0xff] %vm104_vm0, %v92_v17 }
  0x65   :  { %v51_v18 = vpop.permute.xlu2 %50 }
  0x66   :  { %v93_v19 = vmax.f32 %v13_v5, %v51_v18 }
  0x68   :  { %110 = vst.msk [vmem:[%s266_s1 + $0x28] sm:$0xff] %vm104_vm0, %v93_v19 }
  0x6d   :  { %v57_v20 = vpop.permute.xlu2 %56 }
  0x6e   :  { %v96_v21 = vmax.f32 %v16_v8, %v57_v20 }
  0x70   :  { %113 = vst.msk [vmem:[%s266_s1 + $0x40] sm:$0xff] %vm104_vm0, %v96_v21 }
  0x74   :  { %v41_v22 = vpop.permute.xlu0 %40  ;;  %v45_v23 = vpop.permute.xlu1 %44 }
  0x75   :  { %v88_v24 = vmax.f32 %v8_v0, %v41_v22  ;;  %v90_v25 = vmax.f32 %v10_v1, %v45_v23  ;;  %v63_v26 = vpop.permute.xlu2 %62 }
  0x76   :  { %v99_v27 = vmax.f32 %v19_v11, %v63_v26 }
  0x77   :  { %105 = vst.msk [vmem:[%s266_s1] sm:$0xff] %vm104_vm0, %v88_v24 }
  0x78   :  { %107 = vst.msk [vmem:[%s266_s1 + $0x10] sm:$0xff] %vm104_vm0, %v90_v25 }
  0x79   :  { %116 = vst.msk [vmem:[%s266_s1 + $0x58] sm:$0xff] %vm104_vm0, %v99_v27 }
  0x7c   :  { %v43_v28 = vpop.permute.xlu0 %42  ;;  %v47_v29 = vpop.permute.xlu1 %46 }
  0x7d   :  { %v89_v30 = vmax.f32 %v9_v3, %v43_v28  ;;  %v91_v31 = vmax.f32 %v11_v4, %v47_v29  ;;  %v69_v32 = vpop.permute.xlu2 %68 }
  0x7e   :  { %v102_v33 = vmax.f32 %v22_v14, %v69_v32 }
  0x7f   :  { %106 = vst.msk [vmem:[%s266_s1 + $0x8] sm:$0xff] %vm104_vm0, %v89_v30 }
  0x80   :  { %108 = vst.msk [vmem:[%s266_s1 + $0x18] sm:$0xff] %vm104_vm0, %v91_v31 }
  0x81   :  { %119 = vst.msk [vmem:[%s266_s1 + $0x70] sm:$0xff] %vm104_vm0, %v102_v33 }
  0x84   :  { %v53_v34 = vpop.permute.xlu0 %52  ;;  %v55_v35 = vpop.permute.xlu1 %54 }
  0x85   :  { %v94_v36 = vmax.f32 %v14_v6, %v53_v34  ;;  %v95_v37 = vmax.f32 %v15_v7, %v55_v35 }
  0x87   :  { %111 = vst.msk [vmem:[%s266_s1 + $0x30] sm:$0xff] %vm104_vm0, %v94_v36 }
  0x88   :  { %112 = vst.msk [vmem:[%s266_s1 + $0x38] sm:$0xff] %vm104_vm0, %v95_v37 }
  0x8c   :  { %v59_v38 = vpop.permute.xlu0 %58  ;;  %v61_v39 = vpop.permute.xlu1 %60 }
  0x8d   :  { %v97_v40 = vmax.f32 %v17_v9, %v59_v38  ;;  %v98_v41 = vmax.f32 %v18_v10, %v61_v39 }
  0x8f   :  { %114 = vst.msk [vmem:[%s266_s1 + $0x48] sm:$0xff] %vm104_vm0, %v97_v40 }
  0x90   :  { %115 = vst.msk [vmem:[%s266_s1 + $0x50] sm:$0xff] %vm104_vm0, %v98_v41 }
  0x94   :  { %v65_v42 = vpop.permute.xlu0 %64  ;;  %v67_v43 = vpop.permute.xlu1 %66 }
  0x95   :  { %v100_v44 = vmax.f32 %v20_v12, %v65_v42  ;;  %v101_v45 = vmax.f32 %v21_v13, %v67_v43 }
  0x97   :  { %117 = vst.msk [vmem:[%s266_s1 + $0x60] sm:$0xff] %vm104_vm0, %v100_v44 }
  0x98   :  { %118 = vst.msk [vmem:[%s266_s1 + $0x68] sm:$0xff] %vm104_vm0, %v101_v45 }
  0x9c   :  { %v71_v46 = vpop.permute.xlu0 %70 }
  0x9d   :  { %v103_v47 = vmax.f32 %v23_v15, %v71_v46 }
  0x9f   :  { %120 = vst.msk [vmem:[%s266_s1 + $0x78] sm:$0xff] %vm104_vm0, %v103_v47 }

// kernel: tile.73
= control target key start
LH: loop header
LB: loop body
LE: loop exit
PB: predicated region body
PF: predicated region fallthrough
CT: control target
= control target key end

     0   :  { %s22_s0 = inlined_call_operand.vmem [shape: f32[32], index: 0, kind: input, shape index: {}]   ;;  %s23_s1 = inlined_call_operand.vmem [shape: f32[4,32], index: 1, kind: output, shape index: {}]  }
   0x1   :  { %v4_v0 = vld [vmem:[%s22_s0] ss:$0 sm:$0xff] }
   0x2   :  { %5 = vst [vmem:[%s23_s1] sm:$0xf] %v4_v0 }

// kernel: tile.78
= control target key start
LH: loop header
LB: loop body
LE: loop exit
PB: predicated region body
PF: predicated region fallthrough
CT: control target
= control target key end

     0   :  { %s37_s8 = smov 32   ;;  %s38_s9 = smov 64   ;;  %vm7_vm0 = vcmask 261120   ;;  %vm13_vm1 = vcmask 1048320   ;;  %vm19_vm2 = vcmask 785920   ;;  %vm25_vm3 = vcmask 523520   ;;  %s55_s0 = inlined_call_operand.vmem [shape: f32[4,32], index: 0, kind: input, shape index: {}]   ;;  %s56_s1 = inlined_call_operand.vmem [shape: f32[1,128], index: 1, kind: output, shape index: {}]  }
   0x1   :  { %v4_v0 = vld [vmem:[%s55_s0] sm:$0xf]  ;;  %s36_s0 = smov 96  }
   0x2   :  { %5 = vst [vmem:[#allocation1] sm:$0xf] %v4_v0 }
   0x9   :  { %v10_v1 = vld [vmem:[#allocation1 + $0x3] sm:$0x1]   ;;  %v22_v2 = vld [vmem:[#allocation1 + $0x1] sm:$0x1]   ;;  %v16_v3 = vld [vmem:[#allocation1 + $0x2] sm:$0x1]  }
   0xa   :  { %11 = vrot.lane.b32.xlu0 %v10_v1, %s36_s0  ;;  %23 = vrot.lane.b32.xlu1 %v22_v2, %s37_s8  ;;  %v6_v4 = vld [vmem:[#allocation1] sm:$0x1]  }
   0xb   :  { %8 = vst.msk [vmem:[#allocation0] sm:$0x1] %vm7_vm0, %v6_v4  }
  0x12   :  { %17 = vrot.lane.b32.xlu0 %v16_v3, %s38_s9 }
  0x7c   :  { %v12_v5 = vpop.permute.xlu0 %11   ;;  %v24_v6 = vpop.permute.xlu1 %23  }
  0x7d   :  { %14 = vst.msk [vmem:[#allocation0] sm:$0x1] %vm13_vm1, %v12_v5  }
  0x84   :  { %v18_v7 = vpop.permute.xlu0 %17  }
  0x85   :  { %20 = vst.msk [vmem:[#allocation0] sm:$0x1] %vm19_vm2, %v18_v7  }
  0x86   :  { %26 = vst.msk [vmem:[#allocation0] sm:$0x1] %vm25_vm3, %v24_v6  }
  0x8d   :  { %v29_v8 = vld [vmem:[#allocation0] sm:$0x1] }
  0x8e   :  { %32 = vst [vmem:[%s56_s1] sm:$0x1] %v29_v8 }

// kernel: nlayer_discriminator.27
= control target key start
LH: loop header
LB: loop body
LE: loop exit
PB: predicated region body
PF: predicated region fallthrough
CT: control target
= control target key end

     0   :  { %s67_s0 = inlined_call_operand.vmem [shape: f32[8,128], index: 0, kind: input, shape index: {}]   ;;  %s68_s1 = inlined_call_operand.vmem [shape: f32[1,128], index: 1, kind: input, shape index: {}]   ;;  %s69_s2 = inlined_call_operand.vmem [shape: f32[1,128], index: 2, kind: input, shape index: {}]   ;;  %s70_s3 = inlined_call_operand.vmem [shape: f32[8,128], index: 3, kind: output, shape index: {}]  }
   0x1   :  { %v14_v0 = vld [vmem:[%s67_s0] sm:$0xff] }
   0x2   :  { %v33_v1 = vld [vmem:[%s68_s1] ss:$0 sm:$0xff] }
   0x3   :  { %v34_v2 = vld [vmem:[%s69_s2] ss:$0 sm:$0xff]  ;;  %v19_v3 = vmul.f32 %v33_v1, %v14_v0 }
   0x5   :  { %v24_v4 = vadd.f32 %v34_v2, %v19_v3 }
   0x7   :  { %vm25_vm0 = vcmp.ge.f32.partialorder %v24_v4, 0.0  ;;  %v26_v5 = vmul.f32 0.1, %v24_v4 }
   0x9   :  { %v27_v6 = vsel %vm25_vm0, %v24_v4, %v26_v5 }
   0xa   :  { %28 = vst [vmem:[%s70_s3] sm:$0xff] %v27_v6 }

// kernel: nlayer_discriminator.26
= control target key start
LH: loop header
LB: loop body
LE: loop exit
PB: predicated region body
PF: predicated region fallthrough
CT: control target
= control target key end

     0   :  { %s512_s1 = inlined_call_operand.vmem [shape: bf16[256,128], index: 1, kind: input, shape index: {}]   ;;  %s513_s0 = inlined_call_operand.vmem [shape: bf16[32,256], index: 0, kind: input, shape index: {}]   ;;  %s514_s2 = inlined_call_operand.vmem [shape: f32[1,128], index: 2, kind: input, shape index: {}]   ;;  %s515_s3 = inlined_call_operand.vmem [shape: f32[32,128], index: 3, kind: output, shape index: {0}]   ;;  %s516_s4 = inlined_call_operand.vmem [shape: f32[8,128], index: 4, kind: output, shape index: {1}]  }
   0x1   :  { %v368_v0 = vld [vmem:[%s512_s1 + $0x38] sm:$0xff]  ;;  %v367_v2 = vld [vmem:[%s512_s1 + $0x30] sm:$0xff]  ;;  %v366_v4 = vld [vmem:[%s512_s1 + $0x28] sm:$0xff] }
   0x2   :  { %v376_v1 = vld [vmem:[%s512_s1 + $0x78] sm:$0xff]  ;;  %180 = vmatpush.bf16.msra.mxu0 %v368_v0  ;;  %377 = vmatpush.bf16.msra.mxu2 %v368_v0  ;;  %v375_v3 = vld [vmem:[%s512_s1 + $0x70] sm:$0xff]  ;;  %v374_v5 = vld [vmem:[%s512_s1 + $0x68] sm:$0xff] }
   0x3   :  { %199 = vmatpush.bf16.msra.mxu1 %v376_v1  ;;  %385 = vmatpush.bf16.msra.mxu3 %v376_v1  ;;  %v365_v6 = vld [vmem:[%s512_s1 + $0x20] sm:$0xff]  ;;  %v364_v8 = vld [vmem:[%s512_s1 + $0x18] sm:$0xff]  ;;  %v363_v10 = vld [vmem:[%s512_s1 + $0x10] sm:$0xff] }
   0x4   :  { %v373_v7 = vld [vmem:[%s512_s1 + $0x60] sm:$0xff]  ;;  %v372_v9 = vld [vmem:[%s512_s1 + $0x58] sm:$0xff]  ;;  %v371_v11 = vld [vmem:[%s512_s1 + $0x50] sm:$0xff] }
   0x5   :  { %v362_v12 = vld [vmem:[%s512_s1 + $0x8] sm:$0xff]  ;;  %v361_v14 = vld [vmem:[%s512_s1] sm:$0xff]  ;;  %v287_v18 = vld [vmem:[%s513_s0 + $0x10] sm:$0xf] }
   0x6   :  { %181 = vmatpush.bf16.msra.mxu0 %v367_v2  ;;  %378 = vmatpush.bf16.msra.mxu2 %v367_v2  ;;  %v370_v13 = vld [vmem:[%s512_s1 + $0x48] sm:$0xff]  ;;  %v369_v15 = vld [vmem:[%s512_s1 + $0x40] sm:$0xff]  ;;  %v360_v19 = vld [vmem:[%s513_s0 + $0x14] sm:$0xf0] }
   0x7   :  { %200 = vmatpush.bf16.msra.mxu1 %v375_v3  ;;  %386 = vmatpush.bf16.msra.mxu3 %v375_v3  ;;  %v279_v16 = vld [vmem:[%s513_s0] sm:$0xf]  ;;  %v358_v17 = vld [vmem:[%s513_s0 + $0x4] sm:$0xf0]  ;;  %v357_v20 = vld [vmem:[%s513_s0 + $0x4] sm:$0xf]  ;;  %v288_v25 = vor.u32 %v360_v19, %v287_v18 }
   0x8   :  { %v281_v21 = vld [vmem:[%s513_s0 + $0x8] sm:$0xf0]  ;;  %v359_v22 = vld [vmem:[%s513_s0 + $0x14] sm:$0xf]  ;;  %v289_v23 = vld [vmem:[%s513_s0 + $0x18] sm:$0xf0]  ;;  %v280_v24 = vor.u32 %v358_v17, %v279_v16 }
   0x9   :  { %v284_v26 = vor.u32 %v357_v20, %v281_v21  ;;  %v292_v27 = vor.u32 %v359_v22, %v289_v23  ;;  %v393_v29 = vld [vmem:[%s514_s2] ss:$0 sm:$0xff] }
   0xa   :  { %182 = vmatpush.bf16.msra.mxu0 %v366_v4  ;;  %379 = vmatpush.bf16.msra.mxu2 %v366_v4 }
   0xb   :  { %201 = vmatpush.bf16.msra.mxu1 %v374_v5  ;;  %387 = vmatpush.bf16.msra.mxu3 %v374_v5 }
   0xe   :  { %183 = vmatpush.bf16.msra.mxu0 %v365_v6  ;;  %380 = vmatpush.bf16.msra.mxu2 %v365_v6 }
   0xf   :  { %202 = vmatpush.bf16.msra.mxu1 %v373_v7  ;;  %388 = vmatpush.bf16.msra.mxu3 %v373_v7 }
  0x12   :  { %184 = vmatpush.bf16.msra.mxu0 %v364_v8  ;;  %381 = vmatpush.bf16.msra.mxu2 %v364_v8 }
  0x13   :  { %203 = vmatpush.bf16.msra.mxu1 %v372_v9  ;;  %389 = vmatpush.bf16.msra.mxu3 %v372_v9 }
  0x16   :  { %185 = vmatpush.bf16.msra.mxu0 %v363_v10  ;;  %382 = vmatpush.bf16.msra.mxu2 %v363_v10 }
  0x17   :  { %204 = vmatpush.bf16.msra.mxu1 %v371_v11  ;;  %390 = vmatpush.bf16.msra.mxu3 %v371_v11 }
  0x1a   :  { %186 = vmatpush.bf16.msra.mxu0 %v362_v12  ;;  %383 = vmatpush.bf16.msra.mxu2 %v362_v12 }
  0x1b   :  { %205 = vmatpush.bf16.msra.mxu1 %v370_v13  ;;  %391 = vmatpush.bf16.msra.mxu3 %v370_v13 }
  0x1e   :  { %187 = vmatpush.bf16.msra.mxu0 %v361_v14  ;;  %384 = vmatpush.bf16.msra.mxu2 %v361_v14 }
  0x1f   :  { %206 = vmatpush.bf16.msra.mxu1 %v369_v15  ;;  %392 = vmatpush.bf16.msra.mxu3 %v369_v15 }
  0x21   :  { %188 = vmatmul.bf16.vlgmr.msra.gmra.mxu0 %v280_v24  ;;  %193 = vmatmul.bf16.vlgmr.msra.gmra.mxu2 %v288_v25 }
  0x22   :  { %207 = vmatmul.bf16.vlgmr.msra.gmra.mxu1 %v284_v26  ;;  %212 = vmatmul.bf16.vlgmr.msra.gmra.mxu3 %v292_v27 }
  0x9e   :  { %v189_v28 = vpop.f32.mrf.mxu0 }
  0x9f   :  { %v208_v30 = vpop.f32.mrf.mxu1 }
  0xa0   :  { %v209_v31 = vadd.f32 %v208_v30, %v189_v28 }
  0xa2   :  { %v237_v32 = vadd.f32 %v393_v29, %v209_v31 }
  0xa4   :  { %241 = vst [vmem:[%s515_s3] sm:$0xff] %v237_v32  ;;  %v194_v33 = vpop.f32.mrf.mxu2  ;;  %v255_v41 = vmul.f32 %v237_v32, %v237_v32 }
  0xa5   :  { %v213_v34 = vpop.f32.mrf.mxu3 }
  0xa6   :  { %v214_v35 = vadd.f32 %v213_v34, %v194_v33  ;;  %v191_v36 = vpop.f32.mrf.mxu0 }
  0xa7   :  { %v210_v37 = vpop.f32.mrf.mxu1 }
  0xa8   :  { %v239_v38 = vadd.f32 %v393_v29, %v214_v35  ;;  %v211_v39 = vadd.f32 %v210_v37, %v191_v36 }
  0xaa   :  { %243 = vst [vmem:[%s515_s3 + $0x10] sm:$0xff] %v239_v38  ;;  %v238_v40 = vadd.f32 %v393_v29, %v211_v39  ;;  %v257_v48 = vmul.f32 %v239_v38, %v239_v38 }
  0xac   :  { %242 = vst [vmem:[%s515_s3 + $0x8] sm:$0xff] %v238_v40  ;;  %v245_v42 = vadd.f32 %v238_v40, %v237_v32  ;;  %v256_v43 = vmul.f32 %v238_v40, %v238_v40  ;;  %v196_v44 = vpop.f32.mrf.mxu2 }
  0xad   :  { %v215_v45 = vpop.f32.mrf.mxu3 }
  0xae   :  { %v259_v46 = vadd.f32 %v256_v43, %v255_v41  ;;  %v216_v47 = vadd.f32 %v215_v45, %v196_v44  ;;  %v246_v50 = vadd.f32 %v245_v42, %v239_v38 }
  0xb0   :  { %v240_v49 = vadd.f32 %v393_v29, %v216_v47  ;;  %v260_v53 = vadd.f32 %v259_v46, %v257_v48 }
  0xb2   :  { %244 = vst [vmem:[%s515_s3 + $0x18] sm:$0xff] %v240_v49  ;;  %v247_v51 = vadd.f32 %v246_v50, %v240_v49  ;;  %v258_v52 = vmul.f32 %v240_v49, %v240_v49 }
  0xb4   :  { %v248_v54 = vrot.slane %v247_v51, 4  ;;  %v261_v55 = vadd.f32 %v260_v53, %v258_v52 }
  0xb6   :  { %v249_v56 = vadd.f32 %v248_v54, %v247_v51  ;;  %v262_v57 = vrot.slane %v261_v55, 4 }
  0xb8   :  { %v250_v58 = vrot.slane %v249_v56, 2  ;;  %v263_v59 = vadd.f32 %v262_v57, %v261_v55 }
  0xba   :  { %v251_v60 = vadd.f32 %v250_v58, %v249_v56  ;;  %v264_v61 = vrot.slane %v263_v59, 2 }
  0xbc   :  { %v252_v62 = vrot.slane %v251_v60, 1  ;;  %v265_v63 = vadd.f32 %v264_v61, %v263_v59 }
  0xbe   :  { %v253_v0 = vadd.f32 %v252_v62, %v251_v60  ;;  %v266_v1 = vrot.slane %v265_v63, 1 }
  0xc0   :  { %254 = vst [vmem:[%s516_s4] sm:$0x1] %v253_v0  ;;  %v267_v2 = vadd.f32 %v266_v1, %v265_v63 }
  0xc2   :  { %268 = vst [vmem:[%s516_s4 + $0x1] sm:$0x1] %v267_v2 }

// kernel: nlayer_discriminator.30
= control target key start
LH: loop header
LB: loop body
LE: loop exit
PB: predicated region body
PF: predicated region fallthrough
CT: control target
= control target key end

     0   :  { %s48_s0 = inlined_call_operand.vmem [shape: f32[8,512], index: 0, kind: input, shape index: {}]   ;;  %s49_s1 = inlined_call_operand.vmem [shape: f32[8,256], index: 1, kind: output, shape index: {}]  }
   0x1   :  { %v8_v0 = vld [vmem:[%s48_s0] sm:$0xff]  ;;  %v10_v1 = vld [vmem:[%s48_s0 + $0x10] sm:$0xff]  ;;  %v9_v2 = vld [vmem:[%s48_s0 + $0x8] sm:$0xff] }
   0x2   :  { %v12_v3 = vmax.f32 %v8_v0, %v10_v1  ;;  %v11_v4 = vld [vmem:[%s48_s0 + $0x18] sm:$0xff] }
   0x3   :  { %v13_v5 = vmax.f32 %v9_v2, %v11_v4 }
   0x4   :  { %14 = vst [vmem:[%s49_s1] sm:$0xff] %v12_v3 }
   0x5   :  { %15 = vst [vmem:[%s49_s1 + $0x8] sm:$0xff] %v13_v5 }

// kernel: nlayer_discriminator.28
= control target key start
LH: loop header
LB: loop body
LE: loop exit
PB: predicated region body
PF: predicated region fallthrough
CT: control target
= control target key end

     0   :  { %s689_s1 = inlined_call_operand.vmem [shape: bf16[384,128], index: 1, kind: input, shape index: {}]   ;;  %s690_s0 = inlined_call_operand.vmem [shape: bf16[32,384], index: 0, kind: input, shape index: {}]   ;;  %s691_s2 = inlined_call_operand.vmem [shape: f32[1,128], index: 2, kind: input, shape index: {}]   ;;  %s692_s3 = inlined_call_operand.vmem [shape: f32[32,128], index: 3, kind: output, shape index: {0}]   ;;  %s693_s4 = inlined_call_operand.vmem [shape: f32[8,128], index: 4, kind: output, shape index: {1}]  }
   0x1   :  { %v509_v0 = vld [vmem:[%s689_s1 + $0x38] sm:$0xff]  ;;  %v508_v3 = vld [vmem:[%s689_s1 + $0x30] sm:$0xff]  ;;  %v507_v6 = vld [vmem:[%s689_s1 + $0x28] sm:$0xff] }
   0x2   :  { %v517_v1 = vld [vmem:[%s689_s1 + $0x78] sm:$0xff]  ;;  %260 = vmatpush.bf16.msra.mxu0 %v509_v0  ;;  %v516_v4 = vld [vmem:[%s689_s1 + $0x70] sm:$0xff]  ;;  %526 = vmatpush.bf16.msra.mxu3 %v509_v0  ;;  %v515_v7 = vld [vmem:[%s689_s1 + $0x68] sm:$0xff] }
   0x3   :  { %v525_v2 = vld [vmem:[%s689_s1 + $0xb8] sm:$0xff]  ;;  %279 = vmatpush.bf16.msra.mxu1 %v517_v1  ;;  %v524_v5 = vld [vmem:[%s689_s1 + $0xb0] sm:$0xff]  ;;  %v523_v8 = vld [vmem:[%s689_s1 + $0xa8] sm:$0xff] }
   0x4   :  { %298 = vmatpush.bf16.msra.mxu2 %v525_v2  ;;  %v506_v9 = vld [vmem:[%s689_s1 + $0x20] sm:$0xff]  ;;  %v505_v12 = vld [vmem:[%s689_s1 + $0x18] sm:$0xff]  ;;  %v504_v15 = vld [vmem:[%s689_s1 + $0x10] sm:$0xff] }
   0x5   :  { %v514_v10 = vld [vmem:[%s689_s1 + $0x60] sm:$0xff]  ;;  %v513_v13 = vld [vmem:[%s689_s1 + $0x58] sm:$0xff]  ;;  %v512_v16 = vld [vmem:[%s689_s1 + $0x50] sm:$0xff] }
   0x6   :  { %261 = vmatpush.bf16.msra.mxu0 %v508_v3  ;;  %527 = vmatpush.bf16.msra.mxu3 %v508_v3  ;;  %v522_v11 = vld [vmem:[%s689_s1 + $0xa0] sm:$0xff]  ;;  %v521_v14 = vld [vmem:[%s689_s1 + $0x98] sm:$0xff]  ;;  %v520_v17 = vld [vmem:[%s689_s1 + $0x90] sm:$0xff] }
   0x7   :  { %280 = vmatpush.bf16.msra.mxu1 %v516_v4  ;;  %v503_v18 = vld [vmem:[%s689_s1 + $0x8] sm:$0xff]  ;;  %v502_v21 = vld [vmem:[%s689_s1] sm:$0xff]  ;;  %v380_v27 = vld [vmem:[%s690_s0 + $0xc] sm:$0xf0] }
   0x8   :  { %299 = vmatpush.bf16.msra.mxu2 %v524_v5  ;;  %v511_v19 = vld [vmem:[%s689_s1 + $0x48] sm:$0xff]  ;;  %v510_v22 = vld [vmem:[%s689_s1 + $0x40] sm:$0xff]  ;;  %v498_v29 = vld [vmem:[%s690_s0 + $0x10] sm:$0xf0] }
   0x9   :  { %v519_v20 = vld [vmem:[%s689_s1 + $0x88] sm:$0xff]  ;;  %v518_v23 = vld [vmem:[%s689_s1 + $0x80] sm:$0xff]  ;;  %v390_v30 = vld [vmem:[%s690_s0 + $0x18] sm:$0xf] }
   0xa   :  { %262 = vmatpush.bf16.msra.mxu0 %v507_v6  ;;  %528 = vmatpush.bf16.msra.mxu3 %v507_v6  ;;  %v378_v24 = vld [vmem:[%s690_s0] sm:$0xf]  ;;  %v497_v25 = vld [vmem:[%s690_s0 + $0x8] sm:$0xf0]  ;;  %v496_v26 = vld [vmem:[%s690_s0 + $0x4] sm:$0xf] }
   0xb   :  { %281 = vmatpush.bf16.msra.mxu1 %v515_v7  ;;  %v386_v28 = vld [vmem:[%s690_s0 + $0x8] sm:$0xf]  ;;  %v500_v31 = vld [vmem:[%s690_s0 + $0x20] sm:$0xf0]  ;;  %v379_v32 = vor.u32 %v497_v25, %v378_v24  ;;  %v383_v33 = vor.u32 %v496_v26, %v380_v27  ;;  %v499_v36 = vld [vmem:[%s690_s0 + $0x1c] sm:$0xf] }
   0xc   :  { %300 = vmatpush.bf16.msra.mxu2 %v523_v8  ;;  %v387_v34 = vor.u32 %v498_v29, %v386_v28  ;;  %v391_v35 = vor.u32 %v500_v31, %v390_v30  ;;  %v392_v37 = vld [vmem:[%s690_s0 + $0x24] sm:$0xf0]  ;;  %v398_v38 = vld [vmem:[%s690_s0 + $0x20] sm:$0xf]  ;;  %v501_v39 = vld [vmem:[%s690_s0 + $0x28] sm:$0xf0] }
   0xd   :  { %v395_v40 = vor.u32 %v499_v36, %v392_v37  ;;  %v399_v41 = vor.u32 %v501_v39, %v398_v38  ;;  %v534_v45 = vld [vmem:[%s691_s2] ss:$0 sm:$0xff] }
   0xe   :  { %263 = vmatpush.bf16.msra.mxu0 %v506_v9  ;;  %529 = vmatpush.bf16.msra.mxu3 %v506_v9 }
   0xf   :  { %282 = vmatpush.bf16.msra.mxu1 %v514_v10 }
  0x10   :  { %301 = vmatpush.bf16.msra.mxu2 %v522_v11 }
  0x12   :  { %264 = vmatpush.bf16.msra.mxu0 %v505_v12  ;;  %530 = vmatpush.bf16.msra.mxu3 %v505_v12 }
  0x13   :  { %283 = vmatpush.bf16.msra.mxu1 %v513_v13 }
  0x14   :  { %302 = vmatpush.bf16.msra.mxu2 %v521_v14 }
  0x16   :  { %265 = vmatpush.bf16.msra.mxu0 %v504_v15  ;;  %531 = vmatpush.bf16.msra.mxu3 %v504_v15 }
  0x17   :  { %284 = vmatpush.bf16.msra.mxu1 %v512_v16 }
  0x18   :  { %303 = vmatpush.bf16.msra.mxu2 %v520_v17 }
  0x1a   :  { %266 = vmatpush.bf16.msra.mxu0 %v503_v18  ;;  %532 = vmatpush.bf16.msra.mxu3 %v503_v18 }
  0x1b   :  { %285 = vmatpush.bf16.msra.mxu1 %v511_v19 }
  0x1c   :  { %304 = vmatpush.bf16.msra.mxu2 %v519_v20 }
  0x1e   :  { %267 = vmatpush.bf16.msra.mxu0 %v502_v21  ;;  %533 = vmatpush.bf16.msra.mxu3 %v502_v21 }
  0x1f   :  { %286 = vmatpush.bf16.msra.mxu1 %v510_v22 }
  0x20   :  { %305 = vmatpush.bf16.msra.mxu2 %v518_v23 }
  0x21   :  { %268 = vmatmul.bf16.vlgmr.msra.gmra.mxu0 %v379_v32  ;;  %273 = vmatmul.bf16.vlgmr.msra.gmra.mxu3 %v391_v35 }
  0x22   :  { %287 = vmatmul.bf16.vlgmr.msra.gmra.mxu1 %v383_v33 }
  0x23   :  { %306 = vmatmul.bf16.vlgmr.msra.gmra.mxu2 %v387_v34 }
  0x32   :  { %292 = vmatmul.bf16.gmra.mxu1 %v395_v40 }
  0x33   :  { %311 = vmatmul.bf16.gmra.mxu2 %v399_v41 }
  0x9e   :  { %v269_v43 = vpop.f32.mrf.mxu0 }
  0x9f   :  { %v288_v42 = vpop.f32.mrf.mxu1 }
  0xa0   :  { %v289_v44 = vadd.f32 %v288_v42, %v269_v43 }
  0xa4   :  { %v274_v56 = vpop.f32.mrf.mxu3 }
  0xa6   :  { %v307_v46 = vpop.f32.mrf.mxu2  ;;  %v271_v50 = vpop.f32.mrf.mxu0 }
  0xa7   :  { %v308_v47 = vadd.f32 %v307_v46, %v289_v44  ;;  %v290_v48 = vpop.f32.mrf.mxu1 }
  0xa8   :  { %v291_v51 = vadd.f32 %v290_v48, %v271_v50 }
  0xa9   :  { %v336_v49 = vadd.f32 %v534_v45, %v308_v47 }
  0xab   :  { %340 = vst [vmem:[%s692_s3] sm:$0xff] %v336_v49  ;;  %v354_v2 = vmul.f32 %v336_v49, %v336_v49 }
  0xac   :  { %v276_v62 = vpop.f32.mrf.mxu3 }
  0xae   :  { %v309_v52 = vpop.f32.mrf.mxu2 }
  0xaf   :  { %v310_v53 = vadd.f32 %v309_v52, %v291_v51  ;;  %v293_v54 = vpop.f32.mrf.mxu1 }
  0xb0   :  { %v294_v57 = vadd.f32 %v293_v54, %v274_v56 }
  0xb1   :  { %v337_v55 = vadd.f32 %v534_v45, %v310_v53 }
  0xb3   :  { %341 = vst [vmem:[%s692_s3 + $0x8] sm:$0xff] %v337_v55  ;;  %v355_v63 = vmul.f32 %v337_v55, %v337_v55  ;;  %v344_v3 = vadd.f32 %v337_v55, %v336_v49 }
  0xb5   :  { %v358_v6 = vadd.f32 %v355_v63, %v354_v2 }
  0xb6   :  { %v312_v58 = vpop.f32.mrf.mxu2 }
  0xb7   :  { %v313_v59 = vadd.f32 %v312_v58, %v294_v57  ;;  %v295_v61 = vpop.f32.mrf.mxu1 }
  0xb8   :  { %v296_v0 = vadd.f32 %v295_v61, %v276_v62 }
  0xb9   :  { %v338_v60 = vadd.f32 %v534_v45, %v313_v59 }
  0xbb   :  { %342 = vst [vmem:[%s692_s3 + $0x10] sm:$0xff] %v338_v60  ;;  %v356_v4 = vmul.f32 %v338_v60, %v338_v60  ;;  %v345_v7 = vadd.f32 %v344_v3, %v338_v60 }
  0xbd   :  { %v359_v9 = vadd.f32 %v358_v6, %v356_v4 }
  0xbe   :  { %v314_v1 = vpop.f32.mrf.mxu2 }
  0xbf   :  { %v315_v5 = vadd.f32 %v314_v1, %v296_v0 }
  0xc1   :  { %v339_v8 = vadd.f32 %v534_v45, %v315_v5 }
  0xc3   :  { %343 = vst [vmem:[%s692_s3 + $0x18] sm:$0xff] %v339_v8  ;;  %v346_v10 = vadd.f32 %v345_v7, %v339_v8  ;;  %v357_v11 = vmul.f32 %v339_v8, %v339_v8 }
  0xc5   :  { %v347_v12 = vrot.slane %v346_v10, 4  ;;  %v360_v13 = vadd.f32 %v359_v9, %v357_v11 }
  0xc7   :  { %v348_v14 = vadd.f32 %v347_v12, %v346_v10  ;;  %v361_v15 = vrot.slane %v360_v13, 4 }
  0xc9   :  { %v349_v16 = vrot.slane %v348_v14, 2  ;;  %v362_v17 = vadd.f32 %v361_v15, %v360_v13 }
  0xcb   :  { %v350_v18 = vadd.f32 %v349_v16, %v348_v14  ;;  %v363_v19 = vrot.slane %v362_v17, 2 }
  0xcd   :  { %v351_v20 = vrot.slane %v350_v18, 1  ;;  %v364_v21 = vadd.f32 %v363_v19, %v362_v17 }
  0xcf   :  { %v352_v22 = vadd.f32 %v351_v20, %v350_v18  ;;  %v365_v23 = vrot.slane %v364_v21, 1 }
  0xd1   :  { %353 = vst [vmem:[%s693_s4] sm:$0x1] %v352_v22  ;;  %v366_v24 = vadd.f32 %v365_v23, %v364_v21 }
  0xd3   :  { %367 = vst [vmem:[%s693_s4 + $0x1] sm:$0x1] %v366_v24 }

// kernel: nlayer_discriminator.31
= control target key start
LH: loop header
LB: loop body
LE: loop exit
PB: predicated region body
PF: predicated region fallthrough
CT: control target
= control target key end

     0   :  { %s42_s10 = smov 96   ;;  %vm32_vm0 = vcmask 261120   ;;  %s77_s0 = inlined_call_operand.vmem [shape: f32[32,64], index: 0, kind: input, shape index: {}]   ;;  %s78_s1 = inlined_call_operand.vmem [shape: f32[32,32], index: 1, kind: output, shape index: {}]  }
   0x1   :  { %v10_v0 = vld [vmem:[%s77_s0 + $0x10] sm:$0xff]  ;;  %v8_v1 = vld [vmem:[%s77_s0] sm:$0xff]  ;;  %v11_v2 = vld [vmem:[%s77_s0 + $0x18] sm:$0xff] }
   0x2   :  { %20 = vrot.lane.b32.xlu1 %v10_v0, %s42_s10  ;;  %16 = vrot.lane.b32.xlu0 %v8_v1, %s42_s10  ;;  %v9_v3 = vld [vmem:[%s77_s0 + $0x8] sm:$0xff] }
   0xa   :  { %22 = vrot.lane.b32.xlu1 %v11_v2, %s42_s10  ;;  %18 = vrot.lane.b32.xlu0 %v9_v3, %s42_s10 }
  0x74   :  { %v21_v4 = vpop.permute.xlu1 %20  ;;  %v17_v5 = vpop.permute.xlu0 %16 }
  0x75   :  { %v30_v6 = vmax.f32 %v10_v0, %v21_v4  ;;  %v28_v7 = vmax.f32 %v8_v1, %v17_v5 }
  0x77   :  { %35 = vst.msk [vmem:[%s78_s1 + $0x10] sm:$0xff] %vm32_vm0, %v30_v6 }
  0x78   :  { %33 = vst.msk [vmem:[%s78_s1] sm:$0xff] %vm32_vm0, %v28_v7 }
  0x7c   :  { %v23_v8 = vpop.permute.xlu1 %22  ;;  %v19_v9 = vpop.permute.xlu0 %18 }
  0x7d   :  { %v31_v10 = vmax.f32 %v11_v2, %v23_v8  ;;  %v29_v11 = vmax.f32 %v9_v3, %v19_v9 }
  0x7f   :  { %36 = vst.msk [vmem:[%s78_s1 + $0x18] sm:$0xff] %vm32_vm0, %v31_v10 }
  0x80   :  { %34 = vst.msk [vmem:[%s78_s1 + $0x8] sm:$0xff] %vm32_vm0, %v29_v11 }

// kernel: nlayer_discriminator.29
= control target key start
LH: loop header
LB: loop body
LE: loop exit
PB: predicated region body
PF: predicated region fallthrough
CT: control target
= control target key end

     0   :  { %s663_s0 = inlined_call_operand.vmem [shape: bf16[128,128], index: 0, kind: input, shape index: {}]   ;;  %s664_s1 = inlined_call_operand.vmem [shape: bf16[128,128], index: 1, kind: input, shape index: {}]   ;;  %s665_s2 = inlined_call_operand.vmem [shape: f32[1,128], index: 2, kind: input, shape index: {}]   ;;  %s666_s3 = inlined_call_operand.vmem [shape: f32[128,128], index: 3, kind: output, shape index: {0}]   ;;  %s667_s4 = inlined_call_operand.hbm [shape: f32[8,128], index: 4, kind: output, shape index: {1}]  }
   0x1   :  { %v476_v0 = vld [vmem:[%s664_s1 + $0x38] sm:$0xff]  ;;  %v475_v1 = vld [vmem:[%s664_s1 + $0x30] sm:$0xff] }
   0x2   :  { %181 = vmatpush.bf16.msra.mxu0 %v476_v0  ;;  %477 = vmatpush.bf16.msra.mxu1 %v476_v0 }
   0x3   :  { %478 = vmatpush.bf16.msra.mxu2 %v476_v0  ;;  %479 = vmatpush.bf16.msra.mxu3 %v476_v0 }
   0x4   :  { %10 = vsyncpa [#allocation4], 0  ;;  %v474_v2 = vld [vmem:[%s664_s1 + $0x28] sm:$0xff]  ;;  %v473_v3 = vld [vmem:[%s664_s1 + $0x20] sm:$0xff]  ;;  %s386_s26 = sshll.u32 %s667_s4, 4  ;;  %s387_s26 = int_to_ptr.hbm [resolvable:$true] %s386_s26 }
   0x5   :  { %v472_v4 = vld [vmem:[%s664_s1 + $0x18] sm:$0xff]  ;;  %v471_v5 = vld [vmem:[%s664_s1 + $0x10] sm:$0xff]  ;;  %v470_v6 = vld [vmem:[%s664_s1 + $0x8] sm:$0xff] }
   0x6   :  { %182 = vmatpush.bf16.msra.mxu0 %v475_v1  ;;  %480 = vmatpush.bf16.msra.mxu1 %v475_v1  ;;  %v469_v7 = vld [vmem:[%s664_s1] sm:$0xff]  ;;  %v463_v9 = vld [vmem:[%s663_s0 + $0x10] sm:$0xff]  ;;  %v462_v12 = vld [vmem:[%s663_s0 + $0x8] sm:$0xff] }
   0x7   :  { %481 = vmatpush.bf16.msra.mxu2 %v475_v1  ;;  %482 = vmatpush.bf16.msra.mxu3 %v475_v1  ;;  %v461_v8 = vld [vmem:[%s663_s0] sm:$0xff]  ;;  %v467_v11 = vld [vmem:[%s663_s0 + $0x30] sm:$0xff]  ;;  %v464_v13 = vld [vmem:[%s663_s0 + $0x18] sm:$0xff] }
   0x8   :  { %v465_v10 = vld [vmem:[%s663_s0 + $0x20] sm:$0xff]  ;;  %v466_v14 = vld [vmem:[%s663_s0 + $0x28] sm:$0xff]  ;;  %v468_v15 = vld [vmem:[%s663_s0 + $0x38] sm:$0xff] }
   0x9   :  { %v502_v16 = vld [vmem:[%s665_s2] ss:$0 sm:$0xff] }
   0xa   :  { %183 = vmatpush.bf16.msra.mxu0 %v474_v2  ;;  %483 = vmatpush.bf16.msra.mxu1 %v474_v2 }
   0xb   :  { %484 = vmatpush.bf16.msra.mxu2 %v474_v2  ;;  %485 = vmatpush.bf16.msra.mxu3 %v474_v2 }
   0xe   :  { %184 = vmatpush.bf16.msra.mxu0 %v473_v3  ;;  %486 = vmatpush.bf16.msra.mxu1 %v473_v3 }
   0xf   :  { %487 = vmatpush.bf16.msra.mxu2 %v473_v3  ;;  %488 = vmatpush.bf16.msra.mxu3 %v473_v3 }
  0x12   :  { %185 = vmatpush.bf16.msra.mxu0 %v472_v4  ;;  %489 = vmatpush.bf16.msra.mxu1 %v472_v4 }
  0x13   :  { %490 = vmatpush.bf16.msra.mxu2 %v472_v4  ;;  %491 = vmatpush.bf16.msra.mxu3 %v472_v4 }
  0x16   :  { %186 = vmatpush.bf16.msra.mxu0 %v471_v5  ;;  %492 = vmatpush.bf16.msra.mxu1 %v471_v5 }
  0x17   :  { %493 = vmatpush.bf16.msra.mxu2 %v471_v5  ;;  %494 = vmatpush.bf16.msra.mxu3 %v471_v5 }
  0x1a   :  { %187 = vmatpush.bf16.msra.mxu0 %v470_v6  ;;  %495 = vmatpush.bf16.msra.mxu1 %v470_v6 }
  0x1b   :  { %496 = vmatpush.bf16.msra.mxu2 %v470_v6  ;;  %497 = vmatpush.bf16.msra.mxu3 %v470_v6 }
  0x1e   :  { %188 = vmatpush.bf16.msra.mxu0 %v469_v7  ;;  %498 = vmatpush.bf16.msra.mxu1 %v469_v7 }
  0x1f   :  { %499 = vmatpush.bf16.msra.mxu2 %v469_v7  ;;  %500 = vmatpush.bf16.msra.mxu3 %v469_v7 }
  0x21   :  { %189 = vmatmul.bf16.vlgmr.msra.gmra.mxu0 %v461_v8  ;;  %199 = vmatmul.bf16.vlgmr.msra.gmra.mxu1 %v463_v9 }
  0x22   :  { %209 = vmatmul.bf16.vlgmr.msra.gmra.mxu2 %v465_v10  ;;  %219 = vmatmul.bf16.vlgmr.msra.gmra.mxu3 %v467_v11 }
  0x31   :  { %194 = vmatmul.bf16.gmra.mxu0 %v462_v12  ;;  %204 = vmatmul.bf16.gmra.mxu1 %v464_v13 }
  0x32   :  { %214 = vmatmul.bf16.gmra.mxu2 %v466_v14  ;;  %224 = vmatmul.bf16.gmra.mxu3 %v468_v15 }
  0x9e   :  { %v190_v17 = vpop.f32.mrf.mxu0  ;;  %v200_v18 = vpop.f32.mrf.mxu1 }
  0x9f   :  { %v285_v19 = vadd.f32 %v502_v16, %v190_v17  ;;  %v289_v20 = vadd.f32 %v502_v16, %v200_v18 }
  0xa1   :  { %301 = vst [vmem:[%s666_s3] sm:$0xff] %v285_v19  ;;  %v339_v38 = vmul.f32 %v285_v19, %v285_v19  ;;  %v343_v54 = vmul.f32 %v289_v20, %v289_v20 }
  0xa2   :  { %305 = vst [vmem:[%s666_s3 + $0x20] sm:$0xff] %v289_v20 }
  0xa5   :  { %v210_v21 = vpop.f32.mrf.mxu2  ;;  %v220_v22 = vpop.f32.mrf.mxu3 }
  0xa6   :  { %v192_v23 = vpop.f32.mrf.mxu0  ;;  %v202_v24 = vpop.f32.mrf.mxu1  ;;  %v293_v25 = vadd.f32 %v502_v16, %v210_v21  ;;  %v612_v28 = vadd.f32 %v502_v16, %v220_v22 }
  0xa7   :  { %v286_v26 = vadd.f32 %v502_v16, %v192_v23  ;;  %v290_v27 = vadd.f32 %v502_v16, %v202_v24 }
  0xa8   :  { %309 = vst [vmem:[%s666_s3 + $0x40] sm:$0xff] %v293_v25  ;;  %v347_v6 = vmul.f32 %v293_v25, %v293_v25  ;;  %v351_v18 = vmul.f32 %v612_v28, %v612_v28 }
  0xa9   :  { %302 = vst [vmem:[%s666_s3 + $0x8] sm:$0xff] %v286_v26  ;;  %v340_v37 = vmul.f32 %v286_v26, %v286_v26  ;;  %v317_v39 = vadd.f32 %v286_v26, %v285_v19  ;;  %v344_v57 = vmul.f32 %v290_v27, %v290_v27 }
  0xaa   :  { %306 = vst [vmem:[%s666_s3 + $0x28] sm:$0xff] %v290_v27 }
  0xab   :  { %313 = vst [vmem:[%s666_s3 + $0x60] sm:$0xff] %v612_v28  ;;  %v355_v43 = vadd.f32 %v340_v37, %v339_v38 }
  0xad   :  { %v212_v29 = vpop.f32.mrf.mxu2  ;;  %v222_v30 = vpop.f32.mrf.mxu3 }
  0xae   :  { %v195_v31 = vpop.f32.mrf.mxu0  ;;  %v205_v32 = vpop.f32.mrf.mxu1  ;;  %v294_v33 = vadd.f32 %v502_v16, %v212_v29  ;;  %v298_v36 = vadd.f32 %v502_v16, %v222_v30 }
  0xaf   :  { %v287_v34 = vadd.f32 %v502_v16, %v195_v31  ;;  %v291_v35 = vadd.f32 %v502_v16, %v205_v32 }
  0xb0   :  { %310 = vst [vmem:[%s666_s3 + $0x48] sm:$0xff] %v294_v33  ;;  %v348_v9 = vmul.f32 %v294_v33, %v294_v33  ;;  %v352_v21 = vmul.f32 %v298_v36, %v298_v36 }
  0xb1   :  { %303 = vst [vmem:[%s666_s3 + $0x10] sm:$0xff] %v287_v34  ;;  %v341_v40 = vmul.f32 %v287_v34, %v287_v34  ;;  %v318_v47 = vadd.f32 %v317_v39, %v287_v34  ;;  %v345_v0 = vmul.f32 %v291_v35, %v291_v35 }
  0xb2   :  { %307 = vst [vmem:[%s666_s3 + $0x30] sm:$0xff] %v291_v35 }
  0xb3   :  { %314 = vst [vmem:[%s666_s3 + $0x68] sm:$0xff] %v298_v36  ;;  %v356_v51 = vadd.f32 %v355_v43, %v341_v40 }
  0xb5   :  { %v215_v41 = vpop.f32.mrf.mxu2  ;;  %v225_v42 = vpop.f32.mrf.mxu3 }
  0xb6   :  { %v197_v44 = vpop.f32.mrf.mxu0  ;;  %v207_v45 = vpop.f32.mrf.mxu1  ;;  %v295_v46 = vadd.f32 %v502_v16, %v215_v41  ;;  %v299_v50 = vadd.f32 %v502_v16, %v225_v42 }
  0xb7   :  { %v288_v48 = vadd.f32 %v502_v16, %v197_v44  ;;  %v292_v49 = vadd.f32 %v502_v16, %v207_v45 }
  0xb8   :  { %311 = vst [vmem:[%s666_s3 + $0x50] sm:$0xff] %v295_v46  ;;  %v349_v13 = vmul.f32 %v295_v46, %v295_v46 }
  0xb9   :  { %304 = vst [vmem:[%s666_s3 + $0x18] sm:$0xff] %v288_v48  ;;  %v319_v52 = vadd.f32 %v318_v47, %v288_v48  ;;  %v342_v53 = vmul.f32 %v288_v48, %v288_v48  ;;  %v346_v4 = vmul.f32 %v292_v49, %v292_v49 }
  0xba   :  { %308 = vst [vmem:[%s666_s3 + $0x38] sm:$0xff] %v292_v49 }
  0xbb   :  { %v320_v55 = vadd.f32 %v319_v52, %v289_v20  ;;  %v357_v56 = vadd.f32 %v356_v51, %v342_v53  ;;  %315 = vst [vmem:[%s666_s3 + $0x70] sm:$0xff] %v299_v50 }
  0xbd   :  { %v358_v58 = vadd.f32 %v357_v56, %v343_v54  ;;  %v321_v59 = vadd.f32 %v320_v55, %v290_v27  ;;  %v217_v60 = vpop.f32.mrf.mxu2  ;;  %v227_v61 = vpop.f32.mrf.mxu3 }
  0xbe   :  { %v296_v62 = vadd.f32 %v502_v16, %v217_v60  ;;  %v300_v63 = vadd.f32 %v502_v16, %v227_v61 }
  0xbf   :  { %v322_v1 = vadd.f32 %v321_v59, %v291_v35  ;;  %v359_v2 = vadd.f32 %v358_v58, %v344_v57 }
  0xc0   :  { %312 = vst [vmem:[%s666_s3 + $0x58] sm:$0xff] %v296_v62  ;;  %v350_v17 = vmul.f32 %v296_v62, %v296_v62  ;;  %v354_v30 = vmul.f32 %v300_v63, %v300_v63 }
  0xc1   :  { %v323_v3 = vadd.f32 %v322_v1, %v292_v49  ;;  %v360_v5 = vadd.f32 %v359_v2, %v345_v0  ;;  %316 = vst [vmem:[%s666_s3 + $0x78] sm:$0xff] %v300_v63  ;;  %s529_s3 = smov [#allocation3]  }
  0xc2   :  { %s384_s25 = sshll.u32 %s529_s3, 4  ;;  %s385_s25 = int_to_ptr.vmem [resolvable:$true] %s384_s25 }
  0xc3   :  { %v324_v7 = vadd.f32 %v323_v3, %v293_v25  ;;  %v361_v8 = vadd.f32 %v360_v5, %v346_v4  ;;  %v353_v25 = vmul.f32 %v299_v50, %v299_v50 }
  0xc5   :  { %v362_v10 = vadd.f32 %v361_v8, %v347_v6  ;;  %v325_v11 = vadd.f32 %v324_v7, %v294_v33 }
  0xc7   :  { %v326_v12 = vadd.f32 %v325_v11, %v295_v46  ;;  %v363_v14 = vadd.f32 %v362_v10, %v348_v9 }
  0xc9   :  { %v364_v15 = vadd.f32 %v363_v14, %v349_v13  ;;  %v327_v16 = vadd.f32 %v326_v12, %v296_v62 }
  0xcb   :  { %v328_v19 = vadd.f32 %v327_v16, %v612_v28  ;;  %v365_v20 = vadd.f32 %v364_v15, %v350_v17 }
  0xcd   :  { %v366_v22 = vadd.f32 %v365_v20, %v351_v18  ;;  %v329_v23 = vadd.f32 %v328_v19, %v298_v36 }
  0xcf   :  { %v330_v24 = vadd.f32 %v329_v23, %v299_v50  ;;  %v367_v26 = vadd.f32 %v366_v22, %v352_v21 }
  0xd1   :  { %v368_v27 = vadd.f32 %v367_v26, %v353_v25  ;;  %v331_v29 = vadd.f32 %v330_v24, %v300_v63 }
  0xd3   :  { %v332_v31 = vrot.slane %v331_v29, 4  ;;  %v369_v32 = vadd.f32 %v368_v27, %v354_v30 }
  0xd5   :  { %v333_v33 = vadd.f32 %v332_v31, %v331_v29  ;;  %v370_v34 = vrot.slane %v369_v32, 4 }
  0xd7   :  { %v334_v35 = vrot.slane %v333_v33, 2  ;;  %v371_v37 = vadd.f32 %v370_v34, %v369_v32 }
  0xd9   :  { %v335_v38 = vadd.f32 %v334_v35, %v333_v33  ;;  %v372_v39 = vrot.slane %v371_v37, 2 }
  0xdb   :  { %v336_v40 = vrot.slane %v335_v38, 1  ;;  %v373_v28 = vadd.f32 %v372_v39, %v371_v37 }
  0xdd   :  { %v337_v36 = vadd.f32 %v336_v40, %v335_v38  ;;  %v374_v41 = vrot.slane %v373_v28, 1 }
  0xdf   :  { %338 = vst [vmem:[#allocation3] sm:$0x1] %v337_v36  ;;  %v375_v42 = vadd.f32 %v374_v41, %v373_v28 }
  0xe1   :  { %376 = vst [vmem:[#allocation3 + $0x1] sm:$0x1] %v375_v42 }
  0xe2   :  { %389 = dma.vmem_to_hbm [thread:$0]  %s385_s25, 128, %s387_s26, [#allocation4]  }
  0xe3   :  { %527 = dma.done.wait [#allocation4], 128  }
  0xe4   :  { %528 = vsyncadd [#allocation4], 4294967168 }
  0xe5   :  { %396 = vsyncpa [#allocation4], 1 }

// kernel: nlayer_discriminator.32
= control target key start
LH: loop header
LB: loop body
LE: loop exit
PB: predicated region body
PF: predicated region fallthrough
CT: control target
= control target key end

     0   :  { %s80_s0 = inlined_call_operand.vmem [shape: f32[8,128], index: 0, kind: input, shape index: {}]   ;;  %s81_s1 = inlined_call_operand.vmem [shape: f32[1,128], index: 1, kind: input, shape index: {}]   ;;  %s82_s2 = inlined_call_operand.vmem [shape: f32[1,128], index: 2, kind: input, shape index: {}]   ;;  %s83_s3 = inlined_call_operand.vmem [shape: f32[8,128], index: 3, kind: input, shape index: {}]   ;;  %s84_s4 = inlined_call_operand.vmem [shape: f32[8,128], index: 4, kind: output, shape index: {}]  }
   0x1   :  { %v17_v0 = vld [vmem:[%s80_s0] sm:$0xff] }
   0x2   :  { %v38_v1 = vld [vmem:[%s81_s1] ss:$0 sm:$0xff] }
   0x3   :  { %v39_v2 = vld [vmem:[%s82_s2] ss:$0 sm:$0xff]  ;;  %v22_v3 = vmul.f32 %v38_v1, %v17_v0 }
   0x4   :  { %v28_v4 = vld [vmem:[%s83_s3] sm:$0xff] }
   0x5   :  { %v27_v5 = vadd.f32 %v39_v2, %v22_v3 }
   0x7   :  { %v29_v6 = vadd.f32 %v28_v4, %v27_v5 }
   0x9   :  { %vm30_vm0 = vcmp.ge.f32.partialorder %v29_v6, 0.0  ;;  %v31_v7 = vmul.f32 0.1, %v29_v6 }
   0xb   :  { %v32_v8 = vsel %vm30_vm0, %v29_v6, %v31_v7 }
   0xc   :  { %33 = vst [vmem:[%s84_s4] sm:$0xff] %v32_v8 }

// kernel: tile.93
= control target key start
LH: loop header
LB: loop body
LE: loop exit
PB: predicated region body
PF: predicated region fallthrough
CT: control target
= control target key end

     0   :  { %s22_s0 = inlined_call_operand.vmem [shape: f32[64], index: 0, kind: input, shape index: {}]   ;;  %s23_s1 = inlined_call_operand.vmem [shape: f32[3,64], index: 1, kind: output, shape index: {}]  }
   0x1   :  { %v4_v0 = vld [vmem:[%s22_s0] ss:$0 sm:$0xff] }
   0x2   :  { %5 = vst [vmem:[%s23_s1] sm:$0xf] %v4_v0 }

// kernel: tile.98
= control target key start
LH: loop header
LB: loop body
LE: loop exit
PB: predicated region body
PF: predicated region fallthrough
CT: control target
= control target key end

     0   :  { %vm8_vm0 = vcmask 523264   ;;  %s30_s8 = smov 64   ;;  %vm14_vm1 = vcmask 1048064   ;;  %s50_s0 = inlined_call_operand.vmem [shape: f32[3,64], index: 0, kind: input, shape index: {}]   ;;  %s51_s1 = inlined_call_operand.vmem [shape: f32[1,192], index: 1, kind: output, shape index: {}]  }
   0x1   :  { %v4_v0 = vld [vmem:[%s50_s0] sm:$0xf]  ;;  %s6_s0 = smov 3 }
   0x2   :  { %5 = vst [vmem:[#allocation1] sm:$0xf] %v4_v0 }
   0x9   :  { %v11_v1 = vld [vmem:[#allocation1 + $0x1] sm:$0x1]   ;;  %v7_v2 = vld [vmem:[#allocation1] ss:$2 sm:%s6_s0]  }
   0xa   :  { %12 = vrot.lane.b32.xlu0 %v11_v1, %s30_s8  ;;  %9 = vst.msk [vmem:[#allocation0] ss:$8 sm:$0x3] %vm8_vm0, %v7_v2  }
  0x11   :  { %v23_v3 = vld [vmem:[#allocation0 + $0x8] sm:$0x1] }
  0x12   :  { %28 = vst [vmem:[%s51_s1 + $0x1] sm:$0x1] %v23_v3 }
  0x7c   :  { %v13_v4 = vpop.permute.xlu0 %12  }
  0x7d   :  { %15 = vst.msk [vmem:[#allocation0] sm:$0x1] %vm14_vm1, %v13_v4  }
  0x84   :  { %v18_v5 = vld [vmem:[#allocation0] sm:$0x1] }
  0x85   :  { %21 = vst [vmem:[%s51_s1] sm:$0x1] %v18_v5 }

// kernel: nlayer_discriminator.34
= control target key start
LH: loop header
LB: loop body
LE: loop exit
PB: predicated region body
PF: predicated region fallthrough
CT: control target
= control target key end

     0   :  { %vm39_vm2 = vcmask 521216   ;;  %s83_s0 = inlined_call_operand.vmem [shape: f32[6,192], index: 0, kind: input, shape index: {}]   ;;  %s84_s1 = inlined_call_operand.vmem [shape: f32[1,192], index: 1, kind: input, shape index: {}]   ;;  %s85_s2 = inlined_call_operand.vmem [shape: f32[1,192], index: 2, kind: input, shape index: {}]   ;;  %s86_s3 = inlined_call_operand.vmem [shape: f32[6,192], index: 3, kind: output, shape index: {}]  }
   0x1   :  { %v14_v0 = vld [vmem:[%s83_s0] sm:$0x3f]  ;;  %v15_v5 = vld [vmem:[%s83_s0 + $0x8] sm:$0x3f] }
   0x2   :  { %v16_v1 = vld [vmem:[%s84_s1] sm:$0x3] }
   0x3   :  { %v24_v2 = vld [vmem:[%s85_s2] sm:$0x3]  ;;  %v18_v3 = vperm.slane %v16_v1, 0  ;;  %v19_v6 = vperm.slane %v16_v1, 1 }
   0x4   :  { %v26_v4 = vperm.slane %v24_v2, 0  ;;  %v27_v7 = vperm.slane %v24_v2, 1 }
   0x5   :  { %v22_v8 = vmul.f32 %v18_v3, %v14_v0  ;;  %v23_v9 = vmul.f32 %v19_v6, %v15_v5 }
   0x7   :  { %v30_v10 = vadd.f32 %v26_v4, %v22_v8  ;;  %v31_v11 = vadd.f32 %v27_v7, %v23_v9 }
   0x9   :  { %vm32_vm0 = vcmp.ge.f32.partialorder %v30_v10, 0.0  ;;  %v34_v12 = vmul.f32 0.2, %v30_v10  ;;  %vm33_vm1 = vcmp.ge.f32.partialorder %v31_v11, 0.0  ;;  %v35_v13 = vmul.f32 0.2, %v31_v11 }
   0xb   :  { %v36_v14 = vsel %vm32_vm0, %v30_v10, %v34_v12  ;;  %v37_v15 = vsel %vm33_vm1, %v31_v11, %v35_v13 }
   0xc   :  { %38 = vst [vmem:[%s86_s3] sm:$0x3f] %v36_v14 }
   0xd   :  { %40 = vst.msk [vmem:[%s86_s3 + $0x8] sm:$0x3f] %vm39_vm2, %v37_v15 }

// kernel: nlayer_discriminator.33
= control target key start
LH: loop header
LB: loop body
LE: loop exit
PB: predicated region body
PF: predicated region fallthrough
CT: control target
= control target key end

     0   :  { %v630_v54 = vmov 0.0   ;;  %vm417_vm0 = vcmask 1041408   ;;  %s800_s1 = inlined_call_operand.vmem [shape: bf16[512,128], index: 1, kind: input, shape index: {}]   ;;  %s801_s0 = inlined_call_operand.vmem [shape: bf16[18,512], index: 0, kind: input, shape index: {}]   ;;  %s802_s2 = inlined_call_operand.vmem [shape: f32[1,128], index: 2, kind: input, shape index: {}]   ;;  %s803_s3 = inlined_call_operand.vmem [shape: f32[18,128], index: 3, kind: output, shape index: {0}]   ;;  %s804_s4 = inlined_call_operand.vmem [shape: f32[8,128], index: 4, kind: output, shape index: {1}]  }
   0x1   :  { %v603_v0 = vld [vmem:[%s800_s1 + $0x38] sm:$0xff]  ;;  %v602_v4 = vld [vmem:[%s800_s1 + $0x30] sm:$0xff]  ;;  %v601_v8 = vld [vmem:[%s800_s1 + $0x28] sm:$0xff]  ;;  %22 = vst [vmem:[#allocation2 + $0x8] sm:$0x3] %v630_v54 }
   0x2   :  { %v611_v1 = vld [vmem:[%s800_s1 + $0x78] sm:$0xff]  ;;  %322 = vmatpush.bf16.msra.mxu0 %v603_v0  ;;  %v610_v5 = vld [vmem:[%s800_s1 + $0x70] sm:$0xff]  ;;  %v609_v9 = vld [vmem:[%s800_s1 + $0x68] sm:$0xff] }
   0x3   :  { %v619_v2 = vld [vmem:[%s800_s1 + $0xb8] sm:$0xff]  ;;  %340 = vmatpush.bf16.msra.mxu1 %v611_v1  ;;  %v618_v6 = vld [vmem:[%s800_s1 + $0xb0] sm:$0xff]  ;;  %v617_v10 = vld [vmem:[%s800_s1 + $0xa8] sm:$0xff] }
   0x4   :  { %v627_v3 = vld [vmem:[%s800_s1 + $0xf8] sm:$0xff]  ;;  %358 = vmatpush.bf16.msra.mxu2 %v619_v2  ;;  %v626_v7 = vld [vmem:[%s800_s1 + $0xf0] sm:$0xff]  ;;  %v625_v11 = vld [vmem:[%s800_s1 + $0xe8] sm:$0xff] }
   0x5   :  { %376 = vmatpush.bf16.msra.mxu3 %v627_v3  ;;  %v600_v12 = vld [vmem:[%s800_s1 + $0x20] sm:$0xff]  ;;  %v599_v16 = vld [vmem:[%s800_s1 + $0x18] sm:$0xff]  ;;  %v598_v20 = vld [vmem:[%s800_s1 + $0x10] sm:$0xff] }
   0x6   :  { %323 = vmatpush.bf16.msra.mxu0 %v602_v4  ;;  %v608_v13 = vld [vmem:[%s800_s1 + $0x60] sm:$0xff]  ;;  %v607_v17 = vld [vmem:[%s800_s1 + $0x58] sm:$0xff]  ;;  %v606_v21 = vld [vmem:[%s800_s1 + $0x50] sm:$0xff] }
   0x7   :  { %341 = vmatpush.bf16.msra.mxu1 %v610_v5  ;;  %v616_v14 = vld [vmem:[%s800_s1 + $0xa0] sm:$0xff]  ;;  %v615_v18 = vld [vmem:[%s800_s1 + $0x98] sm:$0xff]  ;;  %v614_v22 = vld [vmem:[%s800_s1 + $0x90] sm:$0xff] }
   0x8   :  { %359 = vmatpush.bf16.msra.mxu2 %v618_v6  ;;  %v624_v15 = vld [vmem:[%s800_s1 + $0xe0] sm:$0xff]  ;;  %v623_v19 = vld [vmem:[%s800_s1 + $0xd8] sm:$0xff]  ;;  %v622_v23 = vld [vmem:[%s800_s1 + $0xd0] sm:$0xff] }
   0x9   :  { %377 = vmatpush.bf16.msra.mxu3 %v626_v7  ;;  %v597_v24 = vld [vmem:[%s800_s1 + $0x8] sm:$0xff]  ;;  %v596_v28 = vld [vmem:[%s800_s1] sm:$0xff]  ;;  %v594_v33 = vld [vmem:[%s801_s0 + $0xc] sm:$0xf0] }
   0xa   :  { %324 = vmatpush.bf16.msra.mxu0 %v601_v8  ;;  %v605_v25 = vld [vmem:[%s800_s1 + $0x48] sm:$0xff]  ;;  %v604_v29 = vld [vmem:[%s800_s1 + $0x40] sm:$0xff]  ;;  %v452_v35 = vld [vmem:[%s801_s0 + $0x10] sm:$0xf0] }
   0xb   :  { %342 = vmatpush.bf16.msra.mxu1 %v609_v9  ;;  %v613_v26 = vld [vmem:[%s800_s1 + $0x88] sm:$0xff]  ;;  %v612_v30 = vld [vmem:[%s800_s1 + $0x80] sm:$0xff]  ;;  %v595_v37 = vld [vmem:[%s801_s0 + $0x14] sm:$0xf0] }
   0xc   :  { %360 = vmatpush.bf16.msra.mxu2 %v617_v10  ;;  %v621_v27 = vld [vmem:[%s800_s1 + $0xc8] sm:$0xff]  ;;  %v620_v31 = vld [vmem:[%s800_s1 + $0xc0] sm:$0xff]  ;;  %v460_v39 = vld [vmem:[%s801_s0 + $0x18] sm:$0xf0] }
   0xd   :  { %378 = vmatpush.bf16.msra.mxu3 %v625_v11  ;;  %v450_v32 = vld [vmem:[%s801_s0] sm:$0xf]  ;;  %v592_v34 = vld [vmem:[%s801_s0 + $0x4] sm:$0xf]  ;;  %v458_v36 = vld [vmem:[%s801_s0 + $0x8] sm:$0xf] }
   0xe   :  { %325 = vmatpush.bf16.msra.mxu0 %v600_v12  ;;  %v593_v38 = vld [vmem:[%s801_s0 + $0xc] sm:$0xf]  ;;  %v451_v40 = vor.u32 %v594_v33, %v450_v32  ;;  %v455_v41 = vor.u32 %v592_v34, %v452_v35  ;;  %v459_v42 = vor.u32 %v595_v37, %v458_v36  ;;  %v30_v44 = vld [vmem:[%s801_s0 + $0x20] sm:$0x11] }
   0xf   :  { %343 = vmatpush.bf16.msra.mxu1 %v608_v13  ;;  %v463_v43 = vor.u32 %v593_v38, %v460_v39  ;;  %v31_v45 = vld [vmem:[%s801_s0 + $0x28] sm:$0x11]  ;;  %v110_v46 = vunpack.c.l.b16 %v30_v44  ;;  %v111_v47 = vunpack.c.h.b16 %v30_v44  ;;  %v629_v0 = vld [vmem:[%s802_s2] ss:$0 sm:$0xff] }
  0x10   :  { %361 = vmatpush.bf16.msra.mxu2 %v616_v14  ;;  %v112_v48 = vunpack.c.l.b16 %v31_v45  ;;  %v113_v49 = vunpack.c.h.b16 %v31_v45 }
  0x11   :  { %379 = vmatpush.bf16.msra.mxu3 %v624_v15  ;;  %v118_v50 = vpack.c.b16 %v110_v46, %v110_v46  ;;  %v119_v51 = vpack.c.b16 %v111_v47, %v111_v47 }
  0x12   :  { %326 = vmatpush.bf16.msra.mxu0 %v599_v16  ;;  %v120_v52 = vpack.c.b16 %v112_v48, %v112_v48  ;;  %v121_v53 = vpack.c.b16 %v113_v49, %v113_v49  ;;  %v25_v16 = vld [vmem:[#allocation2 + $0x8] sm:$0x3] }
  0x13   :  { %344 = vmatpush.bf16.msra.mxu1 %v607_v17 }
  0x14   :  { %362 = vmatpush.bf16.msra.mxu2 %v615_v18 }
  0x15   :  { %380 = vmatpush.bf16.msra.mxu3 %v623_v19 }
  0x16   :  { %327 = vmatpush.bf16.msra.mxu0 %v598_v20 }
  0x17   :  { %345 = vmatpush.bf16.msra.mxu1 %v606_v21 }
  0x18   :  { %363 = vmatpush.bf16.msra.mxu2 %v614_v22 }
  0x19   :  { %381 = vmatpush.bf16.msra.mxu3 %v622_v23 }
  0x1a   :  { %328 = vmatpush.bf16.msra.mxu0 %v597_v24 }
  0x1b   :  { %346 = vmatpush.bf16.msra.mxu1 %v605_v25 }
  0x1c   :  { %364 = vmatpush.bf16.msra.mxu2 %v613_v26 }
  0x1d   :  { %382 = vmatpush.bf16.msra.mxu3 %v621_v27 }
  0x1e   :  { %329 = vmatpush.bf16.msra.mxu0 %v596_v28 }
  0x1f   :  { %347 = vmatpush.bf16.msra.mxu1 %v604_v29 }
  0x20   :  { %365 = vmatpush.bf16.msra.mxu2 %v612_v30 }
  0x21   :  { %383 = vmatpush.bf16.msra.mxu3 %v620_v31  ;;  %330 = vmatmul.bf16.vlgmr.msra.gmra.mxu0 %v451_v40 }
  0x22   :  { %348 = vmatmul.bf16.vlgmr.msra.gmra.mxu1 %v455_v41 }
  0x23   :  { %366 = vmatmul.bf16.vlgmr.msra.gmra.mxu2 %v459_v42 }
  0x24   :  { %384 = vmatmul.bf16.vlgmr.msra.gmra.mxu3 %v463_v43 }
  0x31   :  { %335 = vmatmul.bf16.gmra.mxu0 %v118_v50 }
  0x32   :  { %353 = vmatmul.bf16.gmra.mxu1 %v119_v51 }
  0x33   :  { %371 = vmatmul.bf16.gmra.mxu2 %v120_v52 }
  0x34   :  { %389 = vmatmul.bf16.gmra.mxu3 %v121_v53 }
  0x9e   :  { %v331_v55 = vpop.f32.mrf.mxu0 }
  0x9f   :  { %v349_v56 = vpop.f32.mrf.mxu1 }
  0xa0   :  { %v350_v57 = vadd.f32 %v349_v56, %v331_v55 }
  0xa6   :  { %v367_v58 = vpop.f32.mrf.mxu2  ;;  %v333_v61 = vpop.f32.mrf.mxu0 }
  0xa7   :  { %v385_v59 = vpop.f32.mrf.mxu3  ;;  %v368_v60 = vadd.f32 %v367_v58, %v350_v57  ;;  %v351_v62 = vpop.f32.mrf.mxu1 }
  0xa8   :  { %v352_v2 = vadd.f32 %v351_v62, %v333_v61 }
  0xa9   :  { %v386_v63 = vadd.f32 %v385_v59, %v368_v60 }
  0xab   :  { %v410_v1 = vadd.f32 %v629_v0, %v386_v63 }
  0xad   :  { %413 = vst [vmem:[%s803_s3] sm:$0xff] %v410_v1  ;;  %v427_v24 = vmul.f32 %v410_v1, %v410_v1 }
  0xae   :  { %v369_v3 = vpop.f32.mrf.mxu2  ;;  %v336_v6 = vpop.f32.mrf.mxu0 }
  0xaf   :  { %v387_v4 = vpop.f32.mrf.mxu3  ;;  %v370_v5 = vadd.f32 %v369_v3, %v352_v2  ;;  %v354_v7 = vpop.f32.mrf.mxu1 }
  0xb0   :  { %v355_v9 = vadd.f32 %v354_v7, %v336_v6 }
  0xb1   :  { %v388_v8 = vadd.f32 %v387_v4, %v370_v5 }
  0xb3   :  { %v411_v10 = vadd.f32 %v629_v0, %v388_v8 }
  0xb5   :  { %414 = vst [vmem:[%s803_s3 + $0x8] sm:$0xff] %v411_v10  ;;  %v428_v21 = vmul.f32 %v411_v10, %v411_v10  ;;  %v416_v25 = vadd.f32 %v411_v10, %v410_v1 }
  0xb6   :  { %v372_v11 = vpop.f32.mrf.mxu2  ;;  %v338_v14 = vpop.f32.mrf.mxu0 }
  0xb7   :  { %v390_v12 = vpop.f32.mrf.mxu3  ;;  %v373_v13 = vadd.f32 %v372_v11, %v355_v9  ;;  %v356_v15 = vpop.f32.mrf.mxu1  ;;  %v430_v28 = vadd.f32 %v428_v21, %v427_v24 }
  0xb9   :  { %v391_v17 = vadd.f32 %v390_v12, %v373_v13 }
  0xbb   :  { %v396_v18 = vadd.f32 %v391_v17, %v25_v16 }
  0xbd   :  { %399 = vst [vmem:[#allocation2 + $0x8] sm:$0x3] %v396_v18 }
  0xbe   :  { %v374_v19 = vpop.f32.mrf.mxu2 }
  0xbf   :  { %v392_v20 = vpop.f32.mrf.mxu3 }
  0xc4   :  { %v405_v22 = vld [vmem:[#allocation2 + $0x8] sm:$0x3] }
  0xc5   :  { %v412_v23 = vadd.f32 %v629_v0, %v405_v22 }
  0xc7   :  { %415 = vst [vmem:[%s803_s3 + $0x10] sm:$0x3] %v412_v23  ;;  %v418_v26 = vsel %vm417_vm0, %v412_v23, 0.0  ;;  %v429_v27 = vmul.f32 %v412_v23, %v412_v23 }
  0xc8   :  { %v419_v29 = vadd.f32 %v418_v26, %v416_v25 }
  0xc9   :  { %v431_v30 = vsel %vm417_vm0, %v429_v27, 0.0 }
  0xca   :  { %v420_v31 = vrot.slane %v419_v29, 4  ;;  %v432_v32 = vadd.f32 %v431_v30, %v430_v28 }
  0xcc   :  { %v421_v33 = vadd.f32 %v420_v31, %v419_v29  ;;  %v433_v34 = vrot.slane %v432_v32, 4 }
  0xce   :  { %v422_v35 = vrot.slane %v421_v33, 2  ;;  %v434_v36 = vadd.f32 %v433_v34, %v432_v32 }
  0xd0   :  { %v423_v37 = vadd.f32 %v422_v35, %v421_v33  ;;  %v435_v38 = vrot.slane %v434_v36, 2 }
  0xd2   :  { %v424_v39 = vrot.slane %v423_v37, 1  ;;  %v436_v40 = vadd.f32 %v435_v38, %v434_v36 }
  0xd4   :  { %v425_v41 = vadd.f32 %v424_v39, %v423_v37  ;;  %v437_v42 = vrot.slane %v436_v40, 1 }
  0xd6   :  { %426 = vst [vmem:[%s804_s4] sm:$0x1] %v425_v41  ;;  %v438_v43 = vadd.f32 %v437_v42, %v436_v40 }
  0xd8   :  { %439 = vst [vmem:[%s804_s4 + $0x1] sm:$0x1] %v438_v43 }

// kernel: nlayer_discriminator.35
= control target key start
LH: loop header
LB: loop body
LE: loop exit
PB: predicated region body
PF: predicated region fallthrough
CT: control target
= control target key end

     0   :  { %10 = vsyncpa [#allocation4], 0  ;;  %s1006_s15 = smov 0   ;;  %s1008_s16 = smov 0   ;;  %s1095_s0 = inlined_call_operand.vmem [shape: bf16[8,1024], index: 0, kind: input, shape index: {}]   ;;  %s1096_s1 = inlined_call_operand.vmem [shape: bf16[1024,128], index: 1, kind: input, shape index: {}]   ;;  %s1097_s2 = inlined_call_operand.vmem [shape: f32[1,128], index: 2, kind: input, shape index: {}]   ;;  %s1098_s3 = inlined_call_operand.vmem [shape: f32[8,128], index: 3, kind: output, shape index: {0}]   ;;  %s1099_s4 = inlined_call_operand.hbm [shape: f32[8,128], index: 4, kind: output, shape index: {1}]  }
   0x1   :  { %s1010_s17 = smov 0  }
   0x2 LB: > { %s715_s18 = sadd.s32 4294967295, %s977_s17   ;;  %s25_s19 = sadd.s32 1, %s973_s16  ;;  %s977_s17 = sphi %s1010_s17, %s16_s17   ;;  %s973_s16 = sphi %s1008_s16, %s1101_s16   ;;  %s969_s15 = sphi %s1006_s15, %s1100_s15  }
   0x3   : > { %p26_p0 = scmp.ge.s32.totalorder %s25_s19, 2  ;;  %p718_p1 = scmp.ge.s32.totalorder %s977_s17, 1 }
   0x4   : > { %p196_p2 = scmp.lt.s32.totalorder %s977_s17, 3 }
   0x5   : > { %s1103_s19 = smov (%p26_p0, %s25_s19), 0 }
   0x6   : > { %p197_p3 = pnand %p718_p1, %p196_p2 }
   0x7   : > { %s719_s20 = sshll.u32 (!%p197_p3), %s969_s15, 2  ;;  %s721_s21 = sshll.u32 (!%p197_p3), %s969_s15, 6 }
   0x8   : > { %200 = sbr.rel (%p197_p3) target bundleno = 226 (0xe2), region = 32  ;;  %p233_p4 = scmp.lt.s32.totalorder (!%p197_p3), %s719_s20, 7 }
   0x9   : > { %p241_p5 = scmp.lt.s32.totalorder (!%p197_p3), %s721_s21, 127  ;;  %p723_p6 = scmp.ne.s32.totalorder (!%p197_p3), %s969_s15, 0 }
   0xd   : > { %s1105_s20 = smov (!%p233_p4, %s719_s20), 7  ;;  %s1107_s21 = smov (!%p241_p5, %s721_s21), 127 }
   0xe   : > { %s720_s22 = sshll.u32 %s1105_s20, 2  ;;  %s722_s26 = sshll.u32 %s1107_s21, 2 }
   0xf   : > { %s1032_s25 = scalar_lea.vmem %s1095_s0, %s720_s22  ;;  %s1037_s29 = scalar_lea.vmem %s1096_s1, %s722_s26 }
  0x10   : > { %253 = sbr.rel (%p723_p6) target bundleno = 23 (0x17), region = 36 }
  0x15   : > { %v979_v0 = vmov 0.0  }
  0x16   : > { %254 = vst [vmem:[#allocation2] sm:$0xff] %v979_v0 }
  0x17 PF: > { %v865_v1 = vld [vmem:[%s1037_s29 + $0x38] sm:$0xff]  ;;  %v864_v5 = vld [vmem:[%s1037_s29 + $0x30] sm:$0xff]  ;;  %v863_v9 = vld [vmem:[%s1037_s29 + $0x28] sm:$0xff]  ;;  %p852_p7 = scmp.ne.s32.totalorder %s969_s15, 1 }
  0x18   : > { %v873_v2 = vld [vmem:[%s1037_s29 + $0x78] sm:$0xff]  ;;  %528 = vmatpush.bf16.msra.mxu0 %v865_v1  ;;  %v872_v6 = vld [vmem:[%s1037_s29 + $0x70] sm:$0xff]  ;;  %v871_v10 = vld [vmem:[%s1037_s29 + $0x68] sm:$0xff] }
  0x19   : > { %v881_v3 = vld [vmem:[%s1037_s29 + $0xb8] sm:$0xff]  ;;  %541 = vmatpush.bf16.msra.mxu1 %v873_v2  ;;  %v880_v7 = vld [vmem:[%s1037_s29 + $0xb0] sm:$0xff]  ;;  %v879_v11 = vld [vmem:[%s1037_s29 + $0xa8] sm:$0xff] }
  0x1a   : > { %v889_v4 = vld [vmem:[%s1037_s29 + $0xf8] sm:$0xff]  ;;  %554 = vmatpush.bf16.msra.mxu2 %v881_v3  ;;  %v888_v8 = vld [vmem:[%s1037_s29 + $0xf0] sm:$0xff]  ;;  %v887_v12 = vld [vmem:[%s1037_s29 + $0xe8] sm:$0xff] }
  0x1b   : > { %567 = vmatpush.bf16.msra.mxu3 %v889_v4  ;;  %v862_v13 = vld [vmem:[%s1037_s29 + $0x20] sm:$0xff]  ;;  %v861_v17 = vld [vmem:[%s1037_s29 + $0x18] sm:$0xff]  ;;  %v860_v21 = vld [vmem:[%s1037_s29 + $0x10] sm:$0xff] }
  0x1c   : > { %529 = vmatpush.bf16.msra.mxu0 %v864_v5  ;;  %v870_v14 = vld [vmem:[%s1037_s29 + $0x60] sm:$0xff]  ;;  %v869_v18 = vld [vmem:[%s1037_s29 + $0x58] sm:$0xff]  ;;  %v868_v22 = vld [vmem:[%s1037_s29 + $0x50] sm:$0xff] }
  0x1d   : > { %542 = vmatpush.bf16.msra.mxu1 %v872_v6  ;;  %v878_v15 = vld [vmem:[%s1037_s29 + $0xa0] sm:$0xff]  ;;  %v877_v19 = vld [vmem:[%s1037_s29 + $0x98] sm:$0xff]  ;;  %v876_v23 = vld [vmem:[%s1037_s29 + $0x90] sm:$0xff] }
  0x1e   : > { %555 = vmatpush.bf16.msra.mxu2 %v880_v7  ;;  %v886_v16 = vld [vmem:[%s1037_s29 + $0xe0] sm:$0xff]  ;;  %v885_v20 = vld [vmem:[%s1037_s29 + $0xd8] sm:$0xff]  ;;  %v884_v24 = vld [vmem:[%s1037_s29 + $0xd0] sm:$0xff] }
  0x1f   : > { %568 = vmatpush.bf16.msra.mxu3 %v888_v8  ;;  %v859_v25 = vld [vmem:[%s1037_s29 + $0x8] sm:$0xff]  ;;  %v256_v27 = vld [vmem:[%s1032_s25] sm:$0xff] }
  0x20   : > { %530 = vmatpush.bf16.msra.mxu0 %v863_v9  ;;  %v867_v26 = vld [vmem:[%s1037_s29 + $0x48] sm:$0xff]  ;;  %v324_v31 = vunpack.c.l.b16 %v256_v27  ;;  %v325_v32 = vunpack.c.h.b16 %v256_v27  ;;  %v858_v33 = vld [vmem:[%s1037_s29] sm:$0xff] }
  0x21   : > { %543 = vmatpush.bf16.msra.mxu1 %v871_v10  ;;  %v875_v28 = vld [vmem:[%s1037_s29 + $0x88] sm:$0xff]  ;;  %v866_v34 = vld [vmem:[%s1037_s29 + $0x40] sm:$0xff] }
  0x22   : > { %556 = vmatpush.bf16.msra.mxu2 %v879_v11  ;;  %v883_v29 = vld [vmem:[%s1037_s29 + $0xc8] sm:$0xff]  ;;  %v874_v37 = vld [vmem:[%s1037_s29 + $0x80] sm:$0xff]  ;;  %v328_v39 = vpack.c.b16 %v324_v31, %v324_v31  ;;  %v329_v40 = vpack.c.b16 %v325_v32, %v325_v32 }
  0x23   : > { %569 = vmatpush.bf16.msra.mxu3 %v887_v12  ;;  %v257_v30 = vld [vmem:[%s1032_s25 + $0x8] sm:$0xff]  ;;  %v882_v38 = vld [vmem:[%s1037_s29 + $0xc0] sm:$0xff] }
  0x24   : > { %531 = vmatpush.bf16.msra.mxu0 %v862_v13  ;;  %v326_v35 = vunpack.c.l.b16 %v257_v30  ;;  %v327_v36 = vunpack.c.h.b16 %v257_v30  ;;  %v255_v51 = vld [vmem:[#allocation2] sm:$0xff] }
  0x25   : > { %544 = vmatpush.bf16.msra.mxu1 %v870_v14 }
  0x26   : > { %557 = vmatpush.bf16.msra.mxu2 %v878_v15  ;;  %v330_v41 = vpack.c.b16 %v326_v35, %v326_v35  ;;  %v331_v42 = vpack.c.b16 %v327_v36, %v327_v36 }
  0x27   : > { %570 = vmatpush.bf16.msra.mxu3 %v886_v16 }
  0x28   : > { %532 = vmatpush.bf16.msra.mxu0 %v861_v17 }
  0x29   : > { %545 = vmatpush.bf16.msra.mxu1 %v869_v18 }
  0x2a   : > { %558 = vmatpush.bf16.msra.mxu2 %v877_v19 }
  0x2b   : > { %571 = vmatpush.bf16.msra.mxu3 %v885_v20 }
  0x2c   : > { %533 = vmatpush.bf16.msra.mxu0 %v860_v21 }
  0x2d   : > { %546 = vmatpush.bf16.msra.mxu1 %v868_v22 }
  0x2e   : > { %559 = vmatpush.bf16.msra.mxu2 %v876_v23 }
  0x2f   : > { %572 = vmatpush.bf16.msra.mxu3 %v884_v24 }
  0x30   : > { %534 = vmatpush.bf16.msra.mxu0 %v859_v25 }
  0x31   : > { %547 = vmatpush.bf16.msra.mxu1 %v867_v26 }
  0x32   : > { %560 = vmatpush.bf16.msra.mxu2 %v875_v28 }
  0x33   : > { %573 = vmatpush.bf16.msra.mxu3 %v883_v29 }
  0x34   : > { %535 = vmatpush.bf16.msra.mxu0 %v858_v33 }
  0x35   : > { %548 = vmatpush.bf16.msra.mxu1 %v866_v34 }
  0x36   : > { %561 = vmatpush.bf16.msra.mxu2 %v874_v37 }
  0x37   : > { %574 = vmatpush.bf16.msra.mxu3 %v882_v38  ;;  %536 = vmatmul.bf16.vlgmr.msra.gmra.mxu0 %v328_v39 }
  0x38   : > { %549 = vmatmul.bf16.vlgmr.msra.gmra.mxu1 %v329_v40 }
  0x39   : > { %562 = vmatmul.bf16.vlgmr.msra.gmra.mxu2 %v330_v41 }
  0x3a   : > { %575 = vmatmul.bf16.vlgmr.msra.gmra.mxu3 %v331_v42 }
  0xb4   : > { %v537_v43 = vpop.f32.mrf.mxu0 }
  0xb5   : > { %v550_v44 = vpop.f32.mrf.mxu1 }
  0xb6   : > { %v551_v45 = vadd.f32 %v550_v44, %v537_v43 }
  0xbc   : > { %v563_v46 = vpop.f32.mrf.mxu2  ;;  %v539_v49 = vpop.f32.mrf.mxu0 }
  0xbd   : > { %v576_v47 = vpop.f32.mrf.mxu3  ;;  %v564_v48 = vadd.f32 %v563_v46, %v551_v45  ;;  %v552_v50 = vpop.f32.mrf.mxu1 }
  0xbf   : > { %v577_v52 = vadd.f32 %v576_v47, %v564_v48 }
  0xc1   : > { %v580_v53 = vadd.f32 %v577_v52, %v255_v51  ;;  %585 = sbr.rel (%p852_p7) target bundleno = 220 (0xdc), region = 40 }
  0xc3   : > { %581 = vst [vmem:[#allocation2] sm:$0xff] %v580_v53 }
  0xc4   : > { %v565_v54 = vpop.f32.mrf.mxu2 }
  0xc5   : > { %v578_v55 = vpop.f32.mrf.mxu3 }
  0xc6   : > { %v922_v57 = vld [vmem:[%s1097_s2] ss:$0 sm:$0xff] }
  0xca   : > { %v586_v56 = vld [vmem:[#allocation2] sm:$0xff] }
  0xcb   : > { %v591_v58 = vadd.f32 %v922_v57, %v586_v56 }
  0xcd   : > { %592 = vst [vmem:[%s1098_s3] sm:$0xff] %v591_v58  ;;  %v593_v59 = vrot.slane %v591_v58, 4  ;;  %v600_v60 = vmul.f32 %v591_v58, %v591_v58 }
  0xcf   : > { %v594_v61 = vadd.f32 %v593_v59, %v591_v58  ;;  %v601_v62 = vrot.slane %v600_v60, 4 }
  0xd1   : > { %v595_v63 = vrot.slane %v594_v61, 2  ;;  %v602_v0 = vadd.f32 %v601_v62, %v600_v60 }
  0xd3   : > { %v596_v1 = vadd.f32 %v595_v63, %v594_v61  ;;  %v603_v2 = vrot.slane %v602_v0, 2 }
  0xd5   : > { %v597_v3 = vrot.slane %v596_v1, 1  ;;  %v604_v4 = vadd.f32 %v603_v2, %v602_v0 }
  0xd7   : > { %v598_v5 = vadd.f32 %v597_v3, %v596_v1  ;;  %v605_v6 = vrot.slane %v604_v4, 1 }
  0xd9   : > { %599 = vst [vmem:[#allocation3] sm:$0x1] %v598_v5  ;;  %v606_v7 = vadd.f32 %v605_v6, %v604_v4 }
  0xdb   : > { %607 = vst [vmem:[#allocation3 + $0x1] sm:$0x1] %v606_v7 }
  0xdc PF: > { %p894_p8 = scmp.eq.s32.totalorder %s715_s18, 1  ;;  %s625_s10 = sshll.u32 %s1099_s4, 4  ;;  %s626_s10 = int_to_ptr.hbm [resolvable:$true] %s625_s10 }
  0xdd   : > { %s980_s11 = smov [#allocation3]  }
  0xde   : > { %s623_s12 = sshll.u32 %s980_s11, 4  ;;  %s624_s12 = int_to_ptr.vmem [resolvable:$true] %s623_s12 }
  0xdf   : > { %891 = dma.vmem_to_hbm [thread:$0]  (%p894_p8), %s624_s12, 128, %s626_s10, [#allocation4]  }
  0xe0   : > { %964 = dma.done.wait (%p894_p8), [#allocation4], 128  }
  0xe1   : > { %966 = vsyncadd (%p894_p8), [#allocation4], 4294967168 }
  0xe2 PF: > { %s16_s17 = sadd.s32 1, %s977_s17   ;;  %s1100_s15 = smov %s973_s16 }
  0xe3   : > { %p13_p9 = scmp.ge.s32.totalorder %s16_s17, 4   ;;  %s1101_s16 = smov %s1103_s19 }
  0xe5   :  { %15 = sbr.rel (!%p13_p9) target bundleno = 2 (0x2), region = 83 }
  0xea   :  { %646 = vsyncpa [#allocation4], 1 }
  0xeb   :  { %648 = vsyncpa [#allocation4 + $0x1], 1 }

</bundles_post_ra>
